<compile_context>
chip_gen: v7x
topology: tpu7x:2x2x1
jax: 0.10.0
libtpu: 0.0.40
codegen_flags: <defaults>
</compile_context>

<pallas_src>
import functools
import math

import jax
import jax.numpy as jnp
from jax.experimental import pallas as pl
from jax.experimental.pallas import tpu as pltpu

_LN_EPS = 1e-5
# Approximate EUP reciprocal in softmax (rows sum to 1 +- ~2^-12).  Set False for an
# exact divide when bit-tight accuracy is required.
_SOFTMAX_APPROX_RECIP = True
_BATCH_BLOCK_CAP = 8            # batch elements per attention/projection grid step


def _default_vmem_limit():
    try:
        cap = int(pltpu.get_tpu_info().vmem_capacity_bytes)
    except Exception:
        cap = 64 * 1024 * 1024
    # leave headroom; <=56 MiB on v7x (64 MiB VMEM), capped at 100 MiB on v5e/v6e.
    return int(min(cap - 8 * 1024 * 1024, 100 * 1024 * 1024))


_VMEM_LIMIT = _default_vmem_limit()
_ROW_TILE = 512 if _VMEM_LIMIT >= 80 * 1024 * 1024 else 256


def _cparams(semantics):
    return pltpu.CompilerParams(dimension_semantics=semantics,
                                vmem_limit_bytes=_VMEM_LIMIT)


# ------------------------------ in-kernel helpers ---------------------------------

def _ln(x, g, b):
    mu = jnp.mean(x, axis=-1, keepdims=True)
    var = jnp.mean(jnp.square(x - mu), axis=-1, keepdims=True)
    return (x - mu) * jax.lax.rsqrt(var + _LN_EPS) * g + b


def _softmax_rows(s):
    s = s - jnp.max(s, axis=-1, keepdims=True)
    p = jnp.exp(s)
    den = jnp.sum(p, axis=-1, keepdims=True)
    if _SOFTMAX_APPROX_RECIP:
        return p * pl.reciprocal(den, approx=True)
    return p / den


# ---------------------------------- kernels ----------------------------------------

def _msg_branch_kernel(x_ref, fw_ref, fb_ref, g_ref, b_ref, w_ref, wb_ref,
                       ow_ref, ob_ref, o_ref, *, n_head, cdt):
    """Fused message branch for ONE outer-batch element:
    message_fc -> message_ln -> QKV -> MHA(seq=T) -> out-proj + residual.
    Everything stays on-chip; tiny (seq=T) per-head lane slices are acceptable here."""
    x = x_ref[0].astype(cdt)                                             # (T, d)
    msg = jnp.dot(x, fw_ref[...], preferred_element_type=jnp.float32) + fb_ref[...]
    xn = _ln(msg, g_ref[...], b_ref[...]).astype(cdt)
    qkv = jnp.dot(xn, w_ref[...], preferred_element_type=jnp.float32) + wb_ref[...]
    d = fw_ref.shape[0]
    hd = d // n_head
    t = x.shape[0]
    acc = jnp.zeros((t, d), jnp.float32)
    for h in range(n_head):                      # Q already scaled by 1/sqrt(hd)
        q = qkv[:, h * hd:(h + 1) * hd].astype(cdt)
        k = qkv[:, d + h * hd:d + (h + 1) * hd].astype(cdt)
        v = qkv[:, 2 * d + h * hd:2 * d + (h + 1) * hd].astype(cdt)
        s = jax.lax.dot_general(q, k, (((1,), (1,)), ((), ())),
                                preferred_element_type=jnp.float32)      # (T, T)
        p = _softmax_rows(s).astype(cdt)
        oh = jnp.dot(p, v, preferred_element_type=jnp.float32)           # (T, hd)
        acc = acc + jnp.dot(oh.astype(cdt), ow_ref[h],
                            preferred_element_type=jnp.float32)
    o_ref[0] = (msg + acc + ob_ref[...]).astype(o_ref.dtype)


def _ln_qkv_headsplit_kernel(x_ref, m_ref, g_ref, b_ref, w_ref, wb_ref,
                             q_ref, k_ref, v_ref, *, n_head, cdt):
    """LN1 -> fused QKV projection for a block of batch elements.
    The message token is concatenated in-kernel as sequence position L (no XLA
    concat).  Outputs are head-split (nb, H, L+1, hd) - lane-dense for attention."""
    nb, l, d = x_ref.shape
    hd = d // n_head
    for n in range(nb):
        xa = jnp.concatenate([x_ref[n], m_ref[n]], axis=0)               # (l+1, d)
        xn = _ln(xa, g_ref[...], b_ref[...]).astype(cdt)
        y = (jnp.dot(xn, w_ref[...], preferred_element_type=jnp.float32)
             + wb_ref[...]).astype(q_ref.dtype)                          # (l+1, 3d)
        for h in range(n_head):                   # head split paid once, here
            q_ref[n, h] = y[:, h * hd:(h + 1) * hd]
            k_ref[n, h] = y[:, d + h * hd:d + (h + 1) * hd]
            v_ref[n, h] = y[:, 2 * d + h * hd:2 * d + (h + 1) * hd]


def _mha_kernel(q_ref, k_ref, v_ref, o_ref, *, cdt):
    """Batched attention: one (batch-block, head) per grid step; no lane slicing.
    Q is already scaled by 1/sqrt(head_dim) (folded into the projection weights)."""
    q = q_ref[:, 0]                                                      # (nb, S, hd)
    k = k_ref[:, 0]
    v = v_ref[:, 0]
    s = jnp.einsum('nqc,nkc->nqk', q, k, preferred_element_type=jnp.float32)
    p = _softmax_rows(s).astype(cdt)
    o = jnp.einsum('nqk,nkc->nqc', p, v, preferred_element_type=jnp.float32)
    o_ref[:, 0] = o.astype(o_ref.dtype)


def _outproj_res_kernel(a_ref, r_ref, w_ref, b_ref, o_ref, *, n_head, cdt):
    """Attention out-projection consuming head-major input (nb, H, S, hd) via
    per-head accumulation; residual add folded into the output write.  The message
    position (row L) is dropped here (it is discarded by the module)."""
    nb = a_ref.shape[0]
    l, d = r_ref.shape[1], r_ref.shape[2]
    for n in range(nb):
        acc = jnp.zeros((l, d), jnp.float32)
        for h in range(n_head):
            acc = acc + jnp.dot(a_ref[n, h, :l, :], w_ref[h],
                                preferred_element_type=jnp.float32)
        o_ref[n] = (r_ref[n] + acc + b_ref[...]).astype(o_ref.dtype)


def _ln_mlp_res_kernel(x_ref, g_ref, b_ref, w1_ref, b1_ref, w2_ref, b2_ref, o_ref,
                       *, cdt):
    """LN2 -> c_fc -> QuickGELU -> c_proj -> + residual, fused per row tile.
    Row-independent, so ragged (cdiv) edge tiles are safe (garbage rows are masked
    on store and never mix with valid rows)."""
    x = x_ref[...]
    xn = _ln(x, g_ref[...], b_ref[...]).astype(cdt)
    h = jnp.dot(xn, w1_ref[...], preferred_element_type=jnp.float32) + b1_ref[...]
    h = h * jax.nn.sigmoid(1.702 * h)                                    # QuickGELU f32
    y = (jnp.dot(h.astype(cdt), w2_ref[...], preferred_element_type=jnp.float32)
         + b2_ref[...])
    o_ref[...] = (x + y).astype(o_ref.dtype)


# ------------------------------- pallas wrappers -----------------------------------

def _resident_specs(arrs):
    specs = []
    for a in arrs:
        zeros = (0,) * a.ndim
        specs.append(pl.BlockSpec(a.shape, lambda i, _z=zeros: _z))
    return specs


def _batch_block(n, cap=_BATCH_BLOCK_CAP):
    """Largest divisor of n that is <= cap and (if possible) keeps grid length >= 2
    so both v7x TensorCores stay busy."""
    for c in range(min(n, cap), 0, -1):
        if n % c == 0 and (n // c >= 2 or n <= 1):
            return c
    return 1


def _row_tile(rows):
    if rows <= _ROW_TILE:
        if rows >= 16:                       # split so the parallel grid has >= 2 steps
            half = -(-rows // 2)
            return ((half + 7) // 8) * 8
        return rows
    return _ROW_TILE


def _message_branch(x0, pp, n_head, cdt):
    """x0: (b, T, d) f32 -> (b, T, d) f32 message token (residual included)."""
    b, t, d = x0.shape
    res = [pp["msg_fc_w"], pp["msg_fc_b"], pp["msg_ln_g"], pp["msg_ln_b"],
           pp["msg_qkv_w"], pp["msg_qkv_b"], pp["msg_out_w"], pp["msg_out_b"]]
    return pl.pallas_call(
        functools.partial(_msg_branch_kernel, n_head=n_head, cdt=cdt),
        grid=(b,),
        in_specs=[pl.BlockSpec((1, t, d), lambda i: (i, 0, 0))] + _resident_specs(res),
        out_specs=pl.BlockSpec((1, t, d), lambda i: (i, 0, 0)),
        out_shape=jax.ShapeDtypeStruct((b, t, d), jnp.float32),
        compiler_params=_cparams(("parallel",)),
    )(x0, *res)


def _ln_qkv_projection(x_t, msg_rows, pp, n_head, cdt):
    """x_t: (N, l, d) f32, msg_rows: (N, 1, d) f32 ->  q/k/v each (N, H, l+1, hd)."""
    n, l, d = x_t.shape
    s = l + 1
    hd = d // n_head
    nb = _batch_block(n)
    res = [pp["ln1_g"], pp["ln1_b"], pp["qkv_w"], pp["qkv_b"]]
    out_spec = pl.BlockSpec((nb, n_head, s, hd), lambda i: (i, 0, 0, 0))
    out_shape = jax.ShapeDtypeStruct((n, n_head, s, hd), cdt)
    return pl.pallas_call(
        functools.partial(_ln_qkv_headsplit_kernel, n_head=n_head, cdt=cdt),
        grid=(n // nb,),
        in_specs=[pl.BlockSpec((nb, l, d), lambda i: (i, 0, 0)),
                  pl.BlockSpec((nb, 1, d), lambda i: (i, 0, 0))]
                 + _resident_specs(res),
        out_specs=(out_spec, out_spec, out_spec),
        out_shape=(out_shape, out_shape, out_shape),
        compiler_params=_cparams(("parallel",)),
    )(x_t, msg_rows, *res)


def _mha(q, k, v, cdt):
    """q/k/v: (N, H, S, hd).  Grid over (batch-blocks, heads); lane-dense output."""
    n, h, s, hd = q.shape
    nb = _batch_block(n)
    blk = pl.BlockSpec((nb, 1, s, hd), lambda i, j: (i, j, 0, 0))
    return pl.pallas_call(
        functools.partial(_mha_kernel, cdt=cdt),
        grid=(n // nb, h),
        in_specs=[blk, blk, blk],
        out_specs=blk,
        out_shape=jax.ShapeDtypeStruct((n, h, s, hd), cdt),
        compiler_params=_cparams(("parallel", "parallel")),
    )(q, k, v)


def _attn_out_proj(o, resid, pp, n_head, cdt):
    """o: (N, H, S, hd), resid: (N, l, d) f32 -> (N, l, d) f32 (row L dropped)."""
    n, h, s, hd = o.shape
    l, d = resid.shape[1], resid.shape[2]
    nb = _batch_block(n)
    res = [pp["attn_out_w"], pp["attn_out_b"]]
    return pl.pallas_call(
        functools.partial(_outproj_res_kernel, n_head=n_head, cdt=cdt),
        grid=(n // nb,),
        in_specs=[pl.BlockSpec((nb, h, s, hd), lambda i: (i, 0, 0, 0)),
                  pl.BlockSpec((nb, l, d), lambda i: (i, 0, 0))]
                 + _resident_specs(res),
        out_specs=pl.BlockSpec((nb, l, d), lambda i: (i, 0, 0)),
        out_shape=jax.ShapeDtypeStruct((n, l, d), jnp.float32),
        compiler_params=_cparams(("parallel",)),
    )(o, resid, *res)


def _ln_mlp_residual(x2d, pp, cdt):
    """x2d: (rows, d) f32 -> (rows, d) f32, row-tiled with a cdiv grid (no padding)."""
    rows, d = x2d.shape
    tile = _row_tile(rows)
    res = [pp["ln2_g"], pp["ln2_b"], pp["fc_w"], pp["fc_b"],
           pp["proj_w"], pp["proj_b"]]
    return pl.pallas_call(
        functools.partial(_ln_mlp_res_kernel, cdt=cdt),
        grid=(pl.cdiv(rows, tile),),
        in_specs=[pl.BlockSpec((tile, d), lambda i: (i, 0))] + _resident_specs(res),
        out_specs=pl.BlockSpec((tile, d), lambda i: (i, 0)),
        out_shape=jax.ShapeDtypeStruct((rows, d), jnp.float32),
        compiler_params=_cparams(("parallel",)),
    )(x2d, *res)


# -------------------------- parameter preparation (once) ---------------------------

def prepare_params(p, n_head, compute_dtype=jnp.float32):
    """One-time transform of PyTorch-layout params: transpose weights to (din, dout),
    fold 1/sqrt(head_dim) into the Q slices, reshape out-projection weights to
    head-major (H, hd, d), cast matmul weights to the compute dtype."""
    cdt = compute_dtype
    d = p["ln1_g"].shape[0]
    hd = d // n_head
    scale = 1.0 / math.sqrt(hd)

    def wT(w):
        return jnp.asarray(w, jnp.float32).T.astype(cdt)

    def w_heads(w):                      # (d, d) out-proj -> (H, hd, d) head-major
        return jnp.asarray(w, jnp.float32).T.reshape(n_head, hd, d).astype(cdt)

    def vec(b):
        return jnp.asarray(b, jnp.float32).reshape(1, -1)

    def qkv_fold(in_w, in_b):
        w = jnp.asarray(in_w, jnp.float32).at[:d].multiply(scale)
        bb = jnp.asarray(in_b, jnp.float32).at[:d].multiply(scale)
        return w.T.astype(cdt), bb.reshape(1, -1)

    msg_qkv_w, msg_qkv_b = qkv_fold(p["msg_attn_in_w"], p["msg_attn_in_b"])
    qkv_w, qkv_b = qkv_fold(p["attn_in_w"], p["attn_in_b"])
    return {
        "msg_fc_w": wT(p["msg_fc_w"]), "msg_fc_b": vec(p["msg_fc_b"]),
        "msg_ln_g": vec(p["msg_ln_g"]), "msg_ln_b": vec(p["msg_ln_b"]),
        "msg_qkv_w": msg_qkv_w, "msg_qkv_b": msg_qkv_b,
        "msg_out_w": w_heads(p["msg_attn_out_w"]), "msg_out_b": vec(p["msg_attn_out_b"]),
        "ln1_g": vec(p["ln1_g"]), "ln1_b": vec(p["ln1_b"]),
        "qkv_w": qkv_w, "qkv_b": qkv_b,
        "attn_out_w": w_heads(p["attn_out_w"]), "attn_out_b": vec(p["attn_out_b"]),
        "ln2_g": vec(p["ln2_g"]), "ln2_b": vec(p["ln2_b"]),
        "fc_w": wT(p["fc_w"]), "fc_b": vec(p["fc_b"]),
        "proj_w": wT(p["proj_w"]), "proj_b": vec(p["proj_b"]),
    }


# ------------------------------ full block forward ---------------------------------

@functools.partial(jax.jit, static_argnames=("T", "n_head", "compute_dtype"))
def cross_frame_attention_block(x, pp, T, n_head, compute_dtype=jnp.float32):
    """x: (L, B*T, D) float32.  Mirrors CrossFramelAttentionBlock.forward
    (num_experts=0, record_routing=False, attn_mask=None)."""
    l, bt, d = x.shape
    b = bt // T
    cdt = compute_dtype

    # --- fused message branch (one launch, gridded over outer batch b) -------------
    x0 = x[0].reshape(b, T, d)
    msg = _message_branch(x0, pp, n_head, cdt)                          # (b, T, d)
    msg_rows = msg.reshape(bt, 1, d)                                    # row = b_i*T + t

    # --- batch-major activations for the attention path ----------------------------
    x_t = x.transpose(1, 0, 2)                                          # (bt, l, d)

    # --- LN1 + QKV (concat of message token fused in-kernel; head-split output) ----
    q, k, v = _ln_qkv_projection(x_t, msg_rows, pp, n_head, cdt)        # (bt,H,l+1,hd)

    # --- batched multi-head attention: grid (batch-blocks, heads) ------------------
    o = _mha(q, k, v, cdt)                                              # (bt,H,l+1,hd)

    # --- out-projection + residual (message position dropped) ----------------------
    xa = _attn_out_proj(o, x_t, pp, n_head, cdt)                        # (bt, l, d)

    # --- LN2 -> MLP(QuickGELU) -> + residual, row-tiled -----------------------------
    out = _ln_mlp_residual(xa.reshape(bt * l, d), pp, cdt)
    return out.reshape(bt, l, d).transpose(1, 0, 2)                     # (l, bt, d)


# ------------------------------ pure-JAX reference ----------------------------------

def _ref_linear(x, w, b):
    return x @ w.T + b


def _ref_ln(x, g, b):
    mu = x.mean(-1, keepdims=True)
    var = ((x - mu) ** 2).mean(-1, keepdims=True)
    return (x - mu) / jnp.sqrt(var + _LN_EPS) * g + b


def _ref_mha(x, in_w, in_b, out_w, out_b, H):
    L, N, E = x.shape
    hd = E // H
    q = _ref_linear(x, in_w[:E], in_b[:E]) / math.sqrt(hd)
    k = _ref_linear(x, in_w[E:2 * E], in_b[E:2 * E])
    v = _ref_linear(x, in_w[2 * E:], in_b[2 * E:])

    def hds(t):
        return t.reshape(L, N * H, hd).transpose(1, 0, 2)

    s = jnp.einsum("nlh,nmh->nlm", hds(q), hds(k))
    pw = jax.nn.softmax(s, -1)
    o = jnp.einsum("nlm,nmh->nlh", pw, hds(v)).transpose(1, 0, 2).reshape(L, N, E)
    return _ref_linear(o, out_w, out_b)


def _ref_block(x, p, T, n_head):
    l, bt, d = x.shape
    b = bt // T
    x4 = x.reshape(l, b, T, d)
    msg_token = _ref_linear(x4[0], p["msg_fc_w"], p["msg_fc_b"]).transpose(1, 0, 2)
    mln = _ref_ln(msg_token, p["msg_ln_g"], p["msg_ln_b"])
    msg_token = msg_token + _ref_mha(mln, p["msg_attn_in_w"], p["msg_attn_in_b"],
                                     p["msg_attn_out_w"], p["msg_attn_out_b"], n_head)
    xc = jnp.concatenate([x4, msg_token.transpose(1, 0, 2)[None]], 0).reshape(l + 1, bt, d)
    ln1 = _ref_ln(xc, p["ln1_g"], p["ln1_b"])
    xc = xc + _ref_mha(ln1, p["attn_in_w"], p["attn_in_b"],
                       p["attn_out_w"], p["attn_out_b"], n_head)
    xr = xc[:l]
    ln2 = _ref_ln(xr, p["ln2_g"], p["ln2_b"])
    h = _ref_linear(ln2, p["fc_w"], p["fc_b"])
    h = h * jax.nn.sigmoid(1.702 * h)
    return xr + _ref_linear(h, p["proj_w"], p["proj_b"])


# --------------------------------- param init ---------------------------------------

def init_params(key, d):
    ks = jax.random.split(key, 12)

    def nrm(k, shape, s=0.02):
        return s * jax.random.normal(k, shape, jnp.float32)

    return {
        "msg_fc_w": nrm(ks[0], (d, d)), "msg_fc_b": nrm(ks[1], (d,)),
        "msg_ln_g": jnp.ones((d,), jnp.float32), "msg_ln_b": jnp.zeros((d,), jnp.float32),
        "msg_attn_in_w": nrm(ks[2], (3 * d, d)), "msg_attn_in_b": nrm(ks[3], (3 * d,)),
        "msg_attn_out_w": nrm(ks[4], (d, d)), "msg_attn_out_b": jnp.zeros((d,), jnp.float32),
        "attn_in_w": nrm(ks[5], (3 * d, d)), "attn_in_b": nrm(ks[6], (3 * d,)),
        "attn_out_w": nrm(ks[7], (d, d)), "attn_out_b": jnp.zeros((d,), jnp.float32),
        "ln1_g": jnp.ones((d,), jnp.float32), "ln1_b": jnp.zeros((d,), jnp.float32),
        "ln2_g": jnp.ones((d,), jnp.float32), "ln2_b": jnp.zeros((d,), jnp.float32),
        "fc_w": nrm(ks[8], (4 * d, d)), "fc_b": nrm(ks[9], (4 * d,)),
        "proj_w": nrm(ks[10], (d, 4 * d)), "proj_b": nrm(ks[11], (d,)),
    }


# ------------------------------------ main -------------------------------------------

if __name__ == "__main__":
    L, B, T, D, N_HEAD = 8, 2, 4, 32, 4        # bt = B*T = 8
    key = jax.random.PRNGKey(0)
    kx, kp = jax.random.split(key)
    x = jax.random.normal(kx, (L, B * T, D), jnp.float32)
    params = init_params(kp, D)

    ref = jax.block_until_ready(_ref_block(x, params, T, N_HEAD))

    # f32 path — tight correctness check against the pure-JAX reference.
    pp32 = prepare_params(params, N_HEAD, jnp.float32)
    out32 = jax.block_until_ready(
        cross_frame_attention_block(x, pp32, T=T, n_head=N_HEAD,
                                    compute_dtype=jnp.float32))
    assert out32.shape == (L, B * T, D)
    err32 = float(jnp.max(jnp.abs(out32 - ref)))
    assert jnp.allclose(out32, ref, rtol=2e-3, atol=2e-3), err32

    # bf16 MXU path (f32 accumulation; LN/softmax/GELU in f32) — loose sanity check.
    ppbf = prepare_params(params, N_HEAD, jnp.bfloat16)
    outbf = jax.block_until_ready(
        cross_frame_attention_block(x, ppbf, T=T, n_head=N_HEAD,
                                    compute_dtype=jnp.bfloat16))
    assert outbf.shape == (L, B * T, D)
    assert bool(jnp.isfinite(outbf.astype(jnp.float32)).all())
    errbf = float(jnp.max(jnp.abs(outbf.astype(jnp.float32) - ref)))
    assert errbf < 1e-1, errbf

    print("KERNEL_OK")
</pallas_src>

<mosaic_0001>
module attributes {stable_mosaic.version = 11 : i64} {
  func.func @_mha_kernel(%arg0: i32, %arg1: i32, %arg2: memref<4x1x9x8xf32, #tpu.memory_space<vmem>>, %arg3: memref<4x1x9x8xf32, #tpu.memory_space<vmem>>, %arg4: memref<4x1x9x8xf32, #tpu.memory_space<vmem>>, %arg5: memref<4x1x9x8xf32, #tpu.memory_space<vmem>>) attributes {dimension_semantics = [#tpu.dimension_semantics<parallel>, #tpu.dimension_semantics<parallel>], iteration_bounds = array<i64: 2, 4>, scalar_prefetch = 0 : i64, scratch_operands = 0 : i64, tpu.core_type = #tpu.core_type<tc>, window_params = [{transform_indices = @transform_0, window_bounds = array<i64: 4, 1, 9, 8>}, {transform_indices = @transform_1, window_bounds = array<i64: 4, 1, 9, 8>}, {transform_indices = @transform_2, window_bounds = array<i64: 4, 1, 9, 8>}, {transform_indices = @transform_3, window_bounds = array<i64: 4, 1, 9, 8>}]} {
    %c0 = arith.constant 0 : index
    %c0_0 = arith.constant 0 : index
    %c0_1 = arith.constant 0 : index
    %c0_2 = arith.constant 0 : index
    %0 = vector.load %arg2[%c0, %c0_0, %c0_1, %c0_2] : memref<4x1x9x8xf32, #tpu.memory_space<vmem>>, vector<4x1x9x8xf32>
    %1 = vector.shape_cast %0 : vector<4x1x9x8xf32> to vector<4x9x8xf32>
    %c0_3 = arith.constant 0 : index
    %c0_4 = arith.constant 0 : index
    %c0_5 = arith.constant 0 : index
    %c0_6 = arith.constant 0 : index
    %2 = vector.load %arg3[%c0_3, %c0_4, %c0_5, %c0_6] : memref<4x1x9x8xf32, #tpu.memory_space<vmem>>, vector<4x1x9x8xf32>
    %3 = vector.shape_cast %2 : vector<4x1x9x8xf32> to vector<4x9x8xf32>
    %c0_7 = arith.constant 0 : index
    %c0_8 = arith.constant 0 : index
    %c0_9 = arith.constant 0 : index
    %c0_10 = arith.constant 0 : index
    %4 = vector.load %arg4[%c0_7, %c0_8, %c0_9, %c0_10] : memref<4x1x9x8xf32, #tpu.memory_space<vmem>>, vector<4x1x9x8xf32>
    %5 = vector.shape_cast %4 : vector<4x1x9x8xf32> to vector<4x9x8xf32>
    "tpu.trace_start"() <{level = 10 : i32, message = "nqc,nkc->nqk"}> : () -> ()
    %cst = arith.constant dense<0.000000e+00> : vector<4x9x9xf32>
    %6 = tpu.matmul %1, %3, %cst {dimension_numbers = #tpu.dot_dimension_numbers<[2], [2], [1], [1], [0, 0, 0, 1, 1, 1], [0], [0]>} : vector<4x9x8xf32>, vector<4x9x8xf32>, vector<4x9x9xf32> -> vector<4x9x9xf32>
    "tpu.trace_stop"() : () -> ()
    %cst_11 = arith.constant dense<0xFF800000> : vector<4x9xf32>
    %7 = vector.multi_reduction <maximumf>, %6, %cst_11 [2] : vector<4x9x9xf32> to vector<4x9xf32>
    %8 = vector.shape_cast %7 : vector<4x9xf32> to vector<4x9x1xf32>
    %9 = vector.broadcast %8 : vector<4x9x1xf32> to vector<4x9x9xf32>
    %10 = arith.subf %6, %9 : vector<4x9x9xf32>
    %11 = math.exp %10 : vector<4x9x9xf32>
    %cst_12 = arith.constant dense<0.000000e+00> : vector<4x9xf32>
    %12 = vector.multi_reduction <add>, %11, %cst_12 [2] : vector<4x9x9xf32> to vector<4x9xf32>
    %13 = vector.shape_cast %12 : vector<4x9xf32> to vector<4x9x1xf32>
    %14 = tpu.reciprocal %13 {approx = true} : vector<4x9x1xf32> -> vector<4x9x1xf32>
    %15 = vector.broadcast %14 : vector<4x9x1xf32> to vector<4x9x9xf32>
    %16 = arith.mulf %11, %15 : vector<4x9x9xf32>
    "tpu.trace_start"() <{level = 10 : i32, message = "nqk,nkc->nqc"}> : () -> ()
    %cst_13 = arith.constant dense<0.000000e+00> : vector<4x9x8xf32>
    %17 = tpu.matmul %16, %5, %cst_13 {dimension_numbers = #tpu.dot_dimension_numbers<[2], [1], [1], [2], [0, 0, 0, 1, 1, 2], [0], [0]>} : vector<4x9x9xf32>, vector<4x9x8xf32>, vector<4x9x8xf32> -> vector<4x9x8xf32>
    "tpu.trace_stop"() : () -> ()
    %c0_14 = arith.constant 0 : index
    %c0_15 = arith.constant 0 : index
    %c0_16 = arith.constant 0 : index
    %c0_17 = arith.constant 0 : index
    %18 = vector.load %arg5[%c0_14, %c0_15, %c0_16, %c0_17] : memref<4x1x9x8xf32, #tpu.memory_space<vmem>>, vector<4x1x9x8xf32>
    %19 = vector.shape_cast %18 : vector<4x1x9x8xf32> to vector<4x9x8xf32>
    %20 = vector.shape_cast %17 : vector<4x9x8xf32> to vector<4x1x9x8xf32>
    tpu.vector_store %arg5[%c0_14, %c0_15, %c0_16, %c0_17], %20 {strides = array<i32>} : memref<4x1x9x8xf32, #tpu.memory_space<vmem>>, vector<4x1x9x8xf32>,
    return
  }
  func.func @transform_0(%arg0: i32, %arg1: i32) -> (i32, i32, i32, i32) {
    %c0_i32 = arith.constant 0 : i32
    %c0_i32_0 = arith.constant 0 : i32
    %c0_i32_1 = arith.constant 0 : i32
    return %arg0, %arg1, %c0_i32, %c0_i32_0 : i32, i32, i32, i32
  }
  func.func @transform_1(%arg0: i32, %arg1: i32) -> (i32, i32, i32, i32) {
    %c0_i32 = arith.constant 0 : i32
    %c0_i32_0 = arith.constant 0 : i32
    %c0_i32_1 = arith.constant 0 : i32
    return %arg0, %arg1, %c0_i32, %c0_i32_0 : i32, i32, i32, i32
  }
  func.func @transform_2(%arg0: i32, %arg1: i32) -> (i32, i32, i32, i32) {
    %c0_i32 = arith.constant 0 : i32
    %c0_i32_0 = arith.constant 0 : i32
    %c0_i32_1 = arith.constant 0 : i32
    return %arg0, %arg1, %c0_i32, %c0_i32_0 : i32, i32, i32, i32
  }
  func.func @transform_3(%arg0: i32, %arg1: i32) -> (i32, i32, i32, i32) {
    %c0_i32 = arith.constant 0 : i32
    %c0_i32_0 = arith.constant 0 : i32
    %c0_i32_1 = arith.constant 0 : i32
    return %arg0, %arg1, %c0_i32, %c0_i32_0 : i32, i32, i32, i32
  }
}

module attributes {stable_mosaic.version = 11 : i64} {
  func.func @_msg_branch_kernel(%arg0: i32, %arg1: memref<1x4x32xf32, #tpu.memory_space<vmem>>, %arg2: memref<32x32xf32, #tpu.memory_space<vmem>>, %arg3: memref<1x32xf32, #tpu.memory_space<vmem>>, %arg4: memref<1x32xf32, #tpu.memory_space<vmem>>, %arg5: memref<1x32xf32, #tpu.memory_space<vmem>>, %arg6: memref<32x96xf32, #tpu.memory_space<vmem>>, %arg7: memref<1x96xf32, #tpu.memory_space<vmem>>, %arg8: memref<4x8x32xf32, #tpu.memory_space<vmem>>, %arg9: memref<1x32xf32, #tpu.memory_space<vmem>>, %arg10: memref<1x4x32xf32, #tpu.memory_space<vmem>>) attributes {dimension_semantics = [#tpu.dimension_semantics<parallel>], iteration_bounds = array<i64: 2>, scalar_prefetch = 0 : i64, scratch_operands = 0 : i64, tpu.core_type = #tpu.core_type<tc>, window_params = [{transform_indices = @transform_0, window_bounds = array<i64: 1, 4, 32>}, {pipeline_mode = #tpu.pipeline_mode<synchronous>, transform_indices = @transform_1, window_bounds = array<i64: 32, 32>}, {pipeline_mode = #tpu.pipeline_mode<synchronous>, transform_indices = @transform_2, window_bounds = array<i64: 1, 32>}, {pipeline_mode = #tpu.pipeline_mode<synchronous>, transform_indices = @transform_3, window_bounds = array<i64: 1, 32>}, {pipeline_mode = #tpu.pipeline_mode<synchronous>, transform_indices = @transform_4, window_bounds = array<i64: 1, 32>}, {pipeline_mode = #tpu.pipeline_mode<synchronous>, transform_indices = @transform_5, window_bounds = array<i64: 32, 96>}, {pipeline_mode = #tpu.pipeline_mode<synchronous>, transform_indices = @transform_6, window_bounds = array<i64: 1, 96>}, {pipeline_mode = #tpu.pipeline_mode<synchronous>, transform_indices = @transform_7, window_bounds = array<i64: 4, 8, 32>}, {pipeline_mode = #tpu.pipeline_mode<synchronous>, transform_indices = @transform_8, window_bounds = array<i64: 1, 32>}, {transform_indices = @transform_9, window_bounds = array<i64: 1, 4, 32>}]} {
    %c0 = arith.constant 0 : index
    %c0_0 = arith.constant 0 : index
    %c0_1 = arith.constant 0 : index
    %0 = vector.load %arg1[%c0, %c0_0, %c0_1] : memref<1x4x32xf32, #tpu.memory_space<vmem>>, vector<1x4x32xf32>
    %1 = vector.shape_cast %0 : vector<1x4x32xf32> to vector<4x32xf32>
    %c0_2 = arith.constant 0 : index
    %c0_3 = arith.constant 0 : index
    %2 = vector.load %arg2[%c0_2, %c0_3] : memref<32x32xf32, #tpu.memory_space<vmem>>, vector<32x32xf32>
    %cst = arith.constant dense<0.000000e+00> : vector<4x32xf32>
    %3 = tpu.matmul %1, %2, %cst {dimension_numbers = #tpu.dot_dimension_numbers<[1], [0], [0], [1], [0, 0, 1, 1], [], []>} : vector<4x32xf32>, vector<32x32xf32>, vector<4x32xf32> -> vector<4x32xf32>
    %c0_4 = arith.constant 0 : index
    %c0_5 = arith.constant 0 : index
    %4 = vector.load %arg3[%c0_4, %c0_5] : memref<1x32xf32, #tpu.memory_space<vmem>>, vector<1x32xf32>
    %5 = vector.broadcast %4 : vector<1x32xf32> to vector<4x32xf32>
    %6 = arith.addf %3, %5 : vector<4x32xf32>
    %c0_6 = arith.constant 0 : index
    %c0_7 = arith.constant 0 : index
    %7 = vector.load %arg4[%c0_6, %c0_7] : memref<1x32xf32, #tpu.memory_space<vmem>>, vector<1x32xf32>
    %c0_8 = arith.constant 0 : index
    %c0_9 = arith.constant 0 : index
    %8 = vector.load %arg5[%c0_8, %c0_9] : memref<1x32xf32, #tpu.memory_space<vmem>>, vector<1x32xf32>
    %cst_10 = arith.constant dense<0.000000e+00> : vector<4xf32>
    %9 = vector.multi_reduction <add>, %6, %cst_10 [1] : vector<4x32xf32> to vector<4xf32>
    %10 = vector.shape_cast %9 : vector<4xf32> to vector<4x1xf32>
    %cst_11 = arith.constant 3.200000e+01 : f32
    %11 = vector.broadcast %cst_11 : f32 to vector<4x1xf32>
    %12 = arith.divf %10, %11 : vector<4x1xf32>
    %13 = vector.broadcast %12 : vector<4x1xf32> to vector<4x32xf32>
    %14 = arith.subf %6, %13 : vector<4x32xf32>
    %15 = arith.mulf %14, %14 : vector<4x32xf32>
    %cst_12 = arith.constant dense<0.000000e+00> : vector<4xf32>
    %16 = vector.multi_reduction <add>, %15, %cst_12 [1] : vector<4x32xf32> to vector<4xf32>
    %17 = vector.shape_cast %16 : vector<4xf32> to vector<4x1xf32>
    %cst_13 = arith.constant 3.200000e+01 : f32
    %18 = vector.broadcast %cst_13 : f32 to vector<4x1xf32>
    %19 = arith.divf %17, %18 : vector<4x1xf32>
    %20 = vector.broadcast %12 : vector<4x1xf32> to vector<4x32xf32>
    %21 = arith.subf %6, %20 : vector<4x32xf32>
    %cst_14 = arith.constant 9.99999974E-6 : f32
    %22 = vector.broadcast %cst_14 : f32 to vector<4x1xf32>
    %23 = arith.addf %19, %22 : vector<4x1xf32>
    %24 = math.rsqrt %23 : vector<4x1xf32>
    %25 = vector.broadcast %24 : vector<4x1xf32> to vector<4x32xf32>
    %26 = arith.mulf %21, %25 : vector<4x32xf32>
    %27 = vector.broadcast %7 : vector<1x32xf32> to vector<4x32xf32>
    %28 = arith.mulf %26, %27 : vector<4x32xf32>
    %29 = vector.broadcast %8 : vector<1x32xf32> to vector<4x32xf32>
    %30 = arith.addf %28, %29 : vector<4x32xf32>
    %c0_15 = arith.constant 0 : index
    %c0_16 = arith.constant 0 : index
    %31 = vector.load %arg6[%c0_15, %c0_16] : memref<32x96xf32, #tpu.memory_space<vmem>>, vector<32x96xf32>
    %cst_17 = arith.constant dense<0.000000e+00> : vector<4x96xf32>
    %32 = tpu.matmul %30, %31, %cst_17 {dimension_numbers = #tpu.dot_dimension_numbers<[1], [0], [0], [1], [0, 0, 1, 1], [], []>} : vector<4x32xf32>, vector<32x96xf32>, vector<4x96xf32> -> vector<4x96xf32>
    %c0_18 = arith.constant 0 : index
    %c0_19 = arith.constant 0 : index
    %33 = vector.load %arg7[%c0_18, %c0_19] : memref<1x96xf32, #tpu.memory_space<vmem>>, vector<1x96xf32>
    %34 = vector.broadcast %33 : vector<1x96xf32> to vector<4x96xf32>
    %35 = arith.addf %32, %34 : vector<4x96xf32>
    %cst_20 = arith.constant 0.000000e+00 : f32
    %36 = vector.broadcast %cst_20 : f32 to vector<4x32xf32>
    %37 = vector.extract_strided_slice %35 {offsets = [0, 0], sizes = [4, 8], strides = [1, 1]} : vector<4x96xf32> to vector<4x8xf32>
    %38 = vector.extract_strided_slice %35 {offsets = [0, 32], sizes = [4, 8], strides = [1, 1]} : vector<4x96xf32> to vector<4x8xf32>
    %39 = vector.extract_strided_slice %35 {offsets = [0, 64], sizes = [4, 8], strides = [1, 1]} : vector<4x96xf32> to vector<4x8xf32>
    %cst_21 = arith.constant dense<0.000000e+00> : vector<4x4xf32>
    %40 = tpu.matmul %37, %38, %cst_21 {dimension_numbers = #tpu.dot_dimension_numbers<[1], [1], [0], [0], [0, 0, 1, 0], [], []>} : vector<4x8xf32>, vector<4x8xf32>, vector<4x4xf32> -> vector<4x4xf32>
    %cst_22 = arith.constant dense<0xFF800000> : vector<4xf32>
    %41 = vector.multi_reduction <maximumf>, %40, %cst_22 [1] : vector<4x4xf32> to vector<4xf32>
    %42 = vector.shape_cast %41 : vector<4xf32> to vector<4x1xf32>
    %43 = vector.broadcast %42 : vector<4x1xf32> to vector<4x4xf32>
    %44 = arith.subf %40, %43 : vector<4x4xf32>
    %45 = math.exp %44 : vector<4x4xf32>
    %cst_23 = arith.constant dense<0.000000e+00> : vector<4xf32>
    %46 = vector.multi_reduction <add>, %45, %cst_23 [1] : vector<4x4xf32> to vector<4xf32>
    %47 = vector.shape_cast %46 : vector<4xf32> to vector<4x1xf32>
    %48 = tpu.reciprocal %47 {approx = true} : vector<4x1xf32> -> vector<4x1xf32>
    %49 = vector.broadcast %48 : vector<4x1xf32> to vector<4x4xf32>
    %50 = arith.mulf %45, %49 : vector<4x4xf32>
    %cst_24 = arith.constant dense<0.000000e+00> : vector<4x8xf32>
    %51 = tpu.matmul %50, %39, %cst_24 {dimension_numbers = #tpu.dot_dimension_numbers<[1], [0], [0], [1], [0, 0, 1, 1], [], []>} : vector<4x4xf32>, vector<4x8xf32>, vector<4x8xf32> -> vector<4x8xf32>
    %c0_25 = arith.constant 0 : index
    %c0_26 = arith.constant 0 : index
    %c0_27 = arith.constant 0 : index
    %52 = vector.load %arg8[%c0_25, %c0_26, %c0_27] : memref<4x8x32xf32, #tpu.memory_space<vmem>>, vector<1x8x32xf32>
    %53 = vector.shape_cast %52 : vector<1x8x32xf32> to vector<8x32xf32>
    %cst_28 = arith.constant dense<0.000000e+00> : vector<4x32xf32>
    %54 = tpu.matmul %51, %53, %cst_28 {dimension_numbers = #tpu.dot_dimension_numbers<[1], [0], [0], [1], [0, 0, 1, 1], [], []>} : vector<4x8xf32>, vector<8x32xf32>, vector<4x32xf32> -> vector<4x32xf32>
    %55 = arith.addf %36, %54 : vector<4x32xf32>
    %56 = vector.extract_strided_slice %35 {offsets = [0, 8], sizes = [4, 8], strides = [1, 1]} : vector<4x96xf32> to vector<4x8xf32>
    %57 = vector.extract_strided_slice %35 {offsets = [0, 40], sizes = [4, 8], strides = [1, 1]} : vector<4x96xf32> to vector<4x8xf32>
    %58 = vector.extract_strided_slice %35 {offsets = [0, 72], sizes = [4, 8], strides = [1, 1]} : vector<4x96xf32> to vector<4x8xf32>
    %cst_29 = arith.constant dense<0.000000e+00> : vector<4x4xf32>
    %59 = tpu.matmul %56, %57, %cst_29 {dimension_numbers = #tpu.dot_dimension_numbers<[1], [1], [0], [0], [0, 0, 1, 0], [], []>} : vector<4x8xf32>, vector<4x8xf32>, vector<4x4xf32> -> vector<4x4xf32>
    %cst_30 = arith.constant dense<0xFF800000> : vector<4xf32>
    %60 = vector.multi_reduction <maximumf>, %59, %cst_30 [1] : vector<4x4xf32> to vector<4xf32>
    %61 = vector.shape_cast %60 : vector<4xf32> to vector<4x1xf32>
    %62 = vector.broadcast %61 : vector<4x1xf32> to vector<4x4xf32>
    %63 = arith.subf %59, %62 : vector<4x4xf32>
    %64 = math.exp %63 : vector<4x4xf32>
    %cst_31 = arith.constant dense<0.000000e+00> : vector<4xf32>
    %65 = vector.multi_reduction <add>, %64, %cst_31 [1] : vector<4x4xf32> to vector<4xf32>
    %66 = vector.shape_cast %65 : vector<4xf32> to vector<4x1xf32>
    %67 = tpu.reciprocal %66 {approx = true} : vector<4x1xf32> -> vector<4x1xf32>
    %68 = vector.broadcast %67 : vector<4x1xf32> to vector<4x4xf32>
    %69 = arith.mulf %64, %68 : vector<4x4xf32>
    %cst_32 = arith.constant dense<0.000000e+00> : vector<4x8xf32>
    %70 = tpu.matmul %69, %58, %cst_32 {dimension_numbers = #tpu.dot_dimension_numbers<[1], [0], [0], [1], [0, 0, 1, 1], [], []>} : vector<4x4xf32>, vector<4x8xf32>, vector<4x8xf32> -> vector<4x8xf32>
    %c1 = arith.constant 1 : index
    %c0_33 = arith.constant 0 : index
    %c0_34 = arith.constant 0 : index
    %71 = vector.load %arg8[%c1, %c0_33, %c0_34] : memref<4x8x32xf32, #tpu.memory_space<vmem>>, vector<1x8x32xf32>
    %72 = vector.shape_cast %71 : vector<1x8x32xf32> to vector<8x32xf32>
    %cst_35 = arith.constant dense<0.000000e+00> : vector<4x32xf32>
    %73 = tpu.matmul %70, %72, %cst_35 {dimension_numbers = #tpu.dot_dimension_numbers<[1], [0], [0], [1], [0, 0, 1, 1], [], []>} : vector<4x8xf32>, vector<8x32xf32>, vector<4x32xf32> -> vector<4x32xf32>
    %74 = arith.addf %55, %73 : vector<4x32xf32>
    %75 = vector.extract_strided_slice %35 {offsets = [0, 16], sizes = [4, 8], strides = [1, 1]} : vector<4x96xf32> to vector<4x8xf32>
    %76 = vector.extract_strided_slice %35 {offsets = [0, 48], sizes = [4, 8], strides = [1, 1]} : vector<4x96xf32> to vector<4x8xf32>
    %77 = vector.extract_strided_slice %35 {offsets = [0, 80], sizes = [4, 8], strides = [1, 1]} : vector<4x96xf32> to vector<4x8xf32>
    %cst_36 = arith.constant dense<0.000000e+00> : vector<4x4xf32>
    %78 = tpu.matmul %75, %76, %cst_36 {dimension_numbers = #tpu.dot_dimension_numbers<[1], [1], [0], [0], [0, 0, 1, 0], [], []>} : vector<4x8xf32>, vector<4x8xf32>, vector<4x4xf32> -> vector<4x4xf32>
    %cst_37 = arith.constant dense<0xFF800000> : vector<4xf32>
    %79 = vector.multi_reduction <maximumf>, %78, %cst_37 [1] : vector<4x4xf32> to vector<4xf32>
    %80 = vector.shape_cast %79 : vector<4xf32> to vector<4x1xf32>
    %81 = vector.broadcast %80 : vector<4x1xf32> to vector<4x4xf32>
    %82 = arith.subf %78, %81 : vector<4x4xf32>
    %83 = math.exp %82 : vector<4x4xf32>
    %cst_38 = arith.constant dense<0.000000e+00> : vector<4xf32>
    %84 = vector.multi_reduction <add>, %83, %cst_38 [1] : vector<4x4xf32> to vector<4xf32>
    %85 = vector.shape_cast %84 : vector<4xf32> to vector<4x1xf32>
    %86 = tpu.reciprocal %85 {approx = true} : vector<4x1xf32> -> vector<4x1xf32>
    %87 = vector.broadcast %86 : vector<4x1xf32> to vector<4x4xf32>
    %88 = arith.mulf %83, %87 : vector<4x4xf32>
    %cst_39 = arith.constant dense<0.000000e+00> : vector<4x8xf32>
    %89 = tpu.matmul %88, %77, %cst_39 {dimension_numbers = #tpu.dot_dimension_numbers<[1], [0], [0], [1], [0, 0, 1, 1], [], []>} : vector<4x4xf32>, vector<4x8xf32>, vector<4x8xf32> -> vector<4x8xf32>
    %c2 = arith.constant 2 : index
    %c0_40 = arith.constant 0 : index
    %c0_41 = arith.constant 0 : index
    %90 = vector.load %arg8[%c2, %c0_40, %c0_41] : memref<4x8x32xf32, #tpu.memory_space<vmem>>, vector<1x8x32xf32>
    %91 = vector.shape_cast %90 : vector<1x8x32xf32> to vector<8x32xf32>
    %cst_42 = arith.constant dense<0.000000e+00> : vector<4x32xf32>
    %92 = tpu.matmul %89, %91, %cst_42 {dimension_numbers = #tpu.dot_dimension_numbers<[1], [0], [0], [1], [0, 0, 1, 1], [], []>} : vector<4x8xf32>, vector<8x32xf32>, vector<4x32xf32> -> vector<4x32xf32>
    %93 = arith.addf %74, %92 : vector<4x32xf32>
    %94 = vector.extract_strided_slice %35 {offsets = [0, 24], sizes = [4, 8], strides = [1, 1]} : vector<4x96xf32> to vector<4x8xf32>
    %95 = vector.extract_strided_slice %35 {offsets = [0, 56], sizes = [4, 8], strides = [1, 1]} : vector<4x96xf32> to vector<4x8xf32>
    %96 = vector.extract_strided_slice %35 {offsets = [0, 88], sizes = [4, 8], strides = [1, 1]} : vector<4x96xf32> to vector<4x8xf32>
    %cst_43 = arith.constant dense<0.000000e+00> : vector<4x4xf32>
    %97 = tpu.matmul %94, %95, %cst_43 {dimension_numbers = #tpu.dot_dimension_numbers<[1], [1], [0], [0], [0, 0, 1, 0], [], []>} : vector<4x8xf32>, vector<4x8xf32>, vector<4x4xf32> -> vector<4x4xf32>
    %cst_44 = arith.constant dense<0xFF800000> : vector<4xf32>
    %98 = vector.multi_reduction <maximumf>, %97, %cst_44 [1] : vector<4x4xf32> to vector<4xf32>
    %99 = vector.shape_cast %98 : vector<4xf32> to vector<4x1xf32>
    %100 = vector.broadcast %99 : vector<4x1xf32> to vector<4x4xf32>
    %101 = arith.subf %97, %100 : vector<4x4xf32>
    %102 = math.exp %101 : vector<4x4xf32>
    %cst_45 = arith.constant dense<0.000000e+00> : vector<4xf32>
    %103 = vector.multi_reduction <add>, %102, %cst_45 [1] : vector<4x4xf32> to vector<4xf32>
    %104 = vector.shape_cast %103 : vector<4xf32> to vector<4x1xf32>
    %105 = tpu.reciprocal %104 {approx = true} : vector<4x1xf32> -> vector<4x1xf32>
    %106 = vector.broadcast %105 : vector<4x1xf32> to vector<4x4xf32>
    %107 = arith.mulf %102, %106 : vector<4x4xf32>
    %cst_46 = arith.constant dense<0.000000e+00> : vector<4x8xf32>
    %108 = tpu.matmul %107, %96, %cst_46 {dimension_numbers = #tpu.dot_dimension_numbers<[1], [0], [0], [1], [0, 0, 1, 1], [], []>} : vector<4x4xf32>, vector<4x8xf32>, vector<4x8xf32> -> vector<4x8xf32>
    %c3 = arith.constant 3 : index
    %c0_47 = arith.constant 0 : index
    %c0_48 = arith.constant 0 : index
    %109 = vector.load %arg8[%c3, %c0_47, %c0_48] : memref<4x8x32xf32, #tpu.memory_space<vmem>>, vector<1x8x32xf32>
    %110 = vector.shape_cast %109 : vector<1x8x32xf32> to vector<8x32xf32>
    %cst_49 = arith.constant dense<0.000000e+00> : vector<4x32xf32>
    %111 = tpu.matmul %108, %110, %cst_49 {dimension_numbers = #tpu.dot_dimension_numbers<[1], [0], [0], [1], [0, 0, 1, 1], [], []>} : vector<4x8xf32>, vector<8x32xf32>, vector<4x32xf32> -> vector<4x32xf32>
    %112 = arith.addf %93, %111 : vector<4x32xf32>
    %113 = arith.addf %6, %112 : vector<4x32xf32>
    %c0_50 = arith.constant 0 : index
    %c0_51 = arith.constant 0 : index
    %114 = vector.load %arg9[%c0_50, %c0_51] : memref<1x32xf32, #tpu.memory_space<vmem>>, vector<1x32xf32>
    %115 = vector.broadcast %114 : vector<1x32xf32> to vector<4x32xf32>
    %116 = arith.addf %113, %115 : vector<4x32xf32>
    %c0_52 = arith.constant 0 : index
    %c0_53 = arith.constant 0 : index
    %c0_54 = arith.constant 0 : index
    %117 = vector.load %arg10[%c0_52, %c0_53, %c0_54] : memref<1x4x32xf32, #tpu.memory_space<vmem>>, vector<1x4x32xf32>
    %118 = vector.shape_cast %117 : vector<1x4x32xf32> to vector<4x32xf32>
    %119 = vector.shape_cast %116 : vector<4x32xf32> to vector<1x4x32xf32>
    tpu.vector_store %arg10[%c0_52, %c0_53, %c0_54], %119 {strides = array<i32>} : memref<1x4x32xf32, #tpu.memory_space<vmem>>, vector<1x4x32xf32>,
    return
  }
  func.func @transform_0(%arg0: i32) -> (i32, i32, i32) {
    %c0_i32 = arith.constant 0 : i32
    %c0_i32_0 = arith.constant 0 : i32
    %c0_i32_1 = arith.constant 0 : i32
    return %arg0, %c0_i32, %c0_i32_0 : i32, i32, i32
  }
  func.func @transform_1(%arg0: i32) -> (i32, i32) {
    %c0_i32 = arith.constant 0 : i32
    %c0_i32_0 = arith.constant 0 : i32
    %c0_i32_1 = arith.constant 0 : i32
    return %c0_i32, %c0_i32_0 : i32, i32
  }
  func.func @transform_2(%arg0: i32) -> (i32, i32) {
    %c0_i32 = arith.constant 0 : i32
    %c0_i32_0 = arith.constant 0 : i32
    %c0_i32_1 = arith.constant 0 : i32
    return %c0_i32, %c0_i32_0 : i32, i32
  }
  func.func @transform_3(%arg0: i32) -> (i32, i32) {
    %c0_i32 = arith.constant 0 : i32
    %c0_i32_0 = arith.constant 0 : i32
    %c0_i32_1 = arith.constant 0 : i32
    return %c0_i32, %c0_i32_0 : i32, i32
  }
  func.func @transform_4(%arg0: i32) -> (i32, i32) {
    %c0_i32 = arith.constant 0 : i32
    %c0_i32_0 = arith.constant 0 : i32
    %c0_i32_1 = arith.constant 0 : i32
    return %c0_i32, %c0_i32_0 : i32, i32
  }
  func.func @transform_5(%arg0: i32) -> (i32, i32) {
    %c0_i32 = arith.constant 0 : i32
    %c0_i32_0 = arith.constant 0 : i32
    %c0_i32_1 = arith.constant 0 : i32
    return %c0_i32, %c0_i32_0 : i32, i32
  }
  func.func @transform_6(%arg0: i32) -> (i32, i32) {
    %c0_i32 = arith.constant 0 : i32
    %c0_i32_0 = arith.constant 0 : i32
    %c0_i32_1 = arith.constant 0 : i32
    return %c0_i32, %c0_i32_0 : i32, i32
  }
  func.func @transform_7(%arg0: i32) -> (i32, i32, i32) {
    %c0_i32 = arith.constant 0 : i32
    %c0_i32_0 = arith.constant 0 : i32
    %c0_i32_1 = arith.constant 0 : i32
    %c0_i32_2 = arith.constant 0 : i32
    return %c0_i32, %c0_i32_0, %c0_i32_1 : i32, i32, i32
  }
  func.func @transform_8(%arg0: i32) -> (i32, i32) {
    %c0_i32 = arith.constant 0 : i32
    %c0_i32_0 = arith.constant 0 : i32
    %c0_i32_1 = arith.constant 0 : i32
    return %c0_i32, %c0_i32_0 : i32, i32
  }
  func.func @transform_9(%arg0: i32) -> (i32, i32, i32) {
    %c0_i32 = arith.constant 0 : i32
    %c0_i32_0 = arith.constant 0 : i32
    %c0_i32_1 = arith.constant 0 : i32
    return %arg0, %c0_i32, %c0_i32_0 : i32, i32, i32
  }
}

module attributes {stable_mosaic.version = 11 : i64} {
  func.func @_ln_qkv_headsplit_kernel(%arg0: i32, %arg1: memref<4x8x32xf32, #tpu.memory_space<vmem>>, %arg2: memref<4x1x32xf32, #tpu.memory_space<vmem>>, %arg3: memref<1x32xf32, #tpu.memory_space<vmem>>, %arg4: memref<1x32xf32, #tpu.memory_space<vmem>>, %arg5: memref<32x96xf32, #tpu.memory_space<vmem>>, %arg6: memref<1x96xf32, #tpu.memory_space<vmem>>, %arg7: memref<4x4x9x8xf32, #tpu.memory_space<vmem>>, %arg8: memref<4x4x9x8xf32, #tpu.memory_space<vmem>>, %arg9: memref<4x4x9x8xf32, #tpu.memory_space<vmem>>) attributes {dimension_semantics = [#tpu.dimension_semantics<parallel>], iteration_bounds = array<i64: 2>, scalar_prefetch = 0 : i64, scratch_operands = 0 : i64, tpu.core_type = #tpu.core_type<tc>, window_params = [{transform_indices = @transform_0, window_bounds = array<i64: 4, 8, 32>}, {transform_indices = @transform_1, window_bounds = array<i64: 4, 1, 32>}, {pipeline_mode = #tpu.pipeline_mode<synchronous>, transform_indices = @transform_2, window_bounds = array<i64: 1, 32>}, {pipeline_mode = #tpu.pipeline_mode<synchronous>, transform_indices = @transform_3, window_bounds = array<i64: 1, 32>}, {pipeline_mode = #tpu.pipeline_mode<synchronous>, transform_indices = @transform_4, window_bounds = array<i64: 32, 96>}, {pipeline_mode = #tpu.pipeline_mode<synchronous>, transform_indices = @transform_5, window_bounds = array<i64: 1, 96>}, {transform_indices = @transform_6, window_bounds = array<i64: 4, 4, 9, 8>}, {transform_indices = @transform_7, window_bounds = array<i64: 4, 4, 9, 8>}, {transform_indices = @transform_8, window_bounds = array<i64: 4, 4, 9, 8>}]} {
    %c0 = arith.constant 0 : index
    %c0_0 = arith.constant 0 : index
    %c0_1 = arith.constant 0 : index
    %0 = vector.load %arg1[%c0, %c0_0, %c0_1] : memref<4x8x32xf32, #tpu.memory_space<vmem>>, vector<1x8x32xf32>
    %1 = vector.shape_cast %0 : vector<1x8x32xf32> to vector<8x32xf32>
    %c0_2 = arith.constant 0 : index
    %c0_3 = arith.constant 0 : index
    %c0_4 = arith.constant 0 : index
    %2 = vector.load %arg2[%c0_2, %c0_3, %c0_4] : memref<4x1x32xf32, #tpu.memory_space<vmem>>, vector<1x1x32xf32>
    %3 = vector.shape_cast %2 : vector<1x1x32xf32> to vector<1x32xf32>
    %4 = tpu.concatenate %1, %3 in 0 : vector<8x32xf32>, vector<1x32xf32> -> vector<9x32xf32>
    %c0_5 = arith.constant 0 : index
    %c0_6 = arith.constant 0 : index
    %5 = vector.load %arg3[%c0_5, %c0_6] : memref<1x32xf32, #tpu.memory_space<vmem>>, vector<1x32xf32>
    %c0_7 = arith.constant 0 : index
    %c0_8 = arith.constant 0 : index
    %6 = vector.load %arg4[%c0_7, %c0_8] : memref<1x32xf32, #tpu.memory_space<vmem>>, vector<1x32xf32>
    %cst = arith.constant dense<0.000000e+00> : vector<9xf32>
    %7 = vector.multi_reduction <add>, %4, %cst [1] : vector<9x32xf32> to vector<9xf32>
    %8 = vector.shape_cast %7 : vector<9xf32> to vector<9x1xf32>
    %cst_9 = arith.constant 3.200000e+01 : f32
    %9 = vector.broadcast %cst_9 : f32 to vector<9x1xf32>
    %10 = arith.divf %8, %9 : vector<9x1xf32>
    %11 = vector.broadcast %10 : vector<9x1xf32> to vector<9x32xf32>
    %12 = arith.subf %4, %11 : vector<9x32xf32>
    %13 = arith.mulf %12, %12 : vector<9x32xf32>
    %cst_10 = arith.constant dense<0.000000e+00> : vector<9xf32>
    %14 = vector.multi_reduction <add>, %13, %cst_10 [1] : vector<9x32xf32> to vector<9xf32>
    %15 = vector.shape_cast %14 : vector<9xf32> to vector<9x1xf32>
    %cst_11 = arith.constant 3.200000e+01 : f32
    %16 = vector.broadcast %cst_11 : f32 to vector<9x1xf32>
    %17 = arith.divf %15, %16 : vector<9x1xf32>
    %18 = vector.broadcast %10 : vector<9x1xf32> to vector<9x32xf32>
    %19 = arith.subf %4, %18 : vector<9x32xf32>
    %cst_12 = arith.constant 9.99999974E-6 : f32
    %20 = vector.broadcast %cst_12 : f32 to vector<9x1xf32>
    %21 = arith.addf %17, %20 : vector<9x1xf32>
    %22 = math.rsqrt %21 : vector<9x1xf32>
    %23 = vector.broadcast %22 : vector<9x1xf32> to vector<9x32xf32>
    %24 = arith.mulf %19, %23 : vector<9x32xf32>
    %25 = vector.broadcast %5 : vector<1x32xf32> to vector<9x32xf32>
    %26 = arith.mulf %24, %25 : vector<9x32xf32>
    %27 = vector.broadcast %6 : vector<1x32xf32> to vector<9x32xf32>
    %28 = arith.addf %26, %27 : vector<9x32xf32>
    %c0_13 = arith.constant 0 : index
    %c0_14 = arith.constant 0 : index
    %29 = vector.load %arg5[%c0_13, %c0_14] : memref<32x96xf32, #tpu.memory_space<vmem>>, vector<32x96xf32>
    %cst_15 = arith.constant dense<0.000000e+00> : vector<9x96xf32>
    %30 = tpu.matmul %28, %29, %cst_15 {dimension_numbers = #tpu.dot_dimension_numbers<[1], [0], [0], [1], [0, 0, 1, 1], [], []>} : vector<9x32xf32>, vector<32x96xf32>, vector<9x96xf32> -> vector<9x96xf32>
    %c0_16 = arith.constant 0 : index
    %c0_17 = arith.constant 0 : index
    %31 = vector.load %arg6[%c0_16, %c0_17] : memref<1x96xf32, #tpu.memory_space<vmem>>, vector<1x96xf32>
    %32 = vector.broadcast %31 : vector<1x96xf32> to vector<9x96xf32>
    %33 = arith.addf %30, %32 : vector<9x96xf32>
    %34 = vector.extract_strided_slice %33 {offsets = [0, 0], sizes = [9, 8], strides = [1, 1]} : vector<9x96xf32> to vector<9x8xf32>
    %c0_18 = arith.constant 0 : index
    %c0_19 = arith.constant 0 : index
    %c0_20 = arith.constant 0 : index
    %c0_21 = arith.constant 0 : index
    %35 = vector.load %arg7[%c0_18, %c0_19, %c0_20, %c0_21] : memref<4x4x9x8xf32, #tpu.memory_space<vmem>>, vector<1x1x9x8xf32>
    %36 = vector.shape_cast %35 : vector<1x1x9x8xf32> to vector<9x8xf32>
    %37 = vector.shape_cast %34 : vector<9x8xf32> to vector<1x1x9x8xf32>
    tpu.vector_store %arg7[%c0_18, %c0_19, %c0_20, %c0_21], %37 {strides = array<i32>} : memref<4x4x9x8xf32, #tpu.memory_space<vmem>>, vector<1x1x9x8xf32>,
    %38 = vector.extract_strided_slice %33 {offsets = [0, 32], sizes = [9, 8], strides = [1, 1]} : vector<9x96xf32> to vector<9x8xf32>
    %c0_22 = arith.constant 0 : index
    %c0_23 = arith.constant 0 : index
    %c0_24 = arith.constant 0 : index
    %c0_25 = arith.constant 0 : index
    %39 = vector.load %arg8[%c0_22, %c0_23, %c0_24, %c0_25] : memref<4x4x9x8xf32, #tpu.memory_space<vmem>>, vector<1x1x9x8xf32>
    %40 = vector.shape_cast %39 : vector<1x1x9x8xf32> to vector<9x8xf32>
    %41 = vector.shape_cast %38 : vector<9x8xf32> to vector<1x1x9x8xf32>
    tpu.vector_store %arg8[%c0_22, %c0_23, %c0_24, %c0_25], %41 {strides = array<i32>} : memref<4x4x9x8xf32, #tpu.memory_space<vmem>>, vector<1x1x9x8xf32>,
    %42 = vector.extract_strided_slice %33 {offsets = [0, 64], sizes = [9, 8], strides = [1, 1]} : vector<9x96xf32> to vector<9x8xf32>
    %c0_26 = arith.constant 0 : index
    %c0_27 = arith.constant 0 : index
    %c0_28 = arith.constant 0 : index
    %c0_29 = arith.constant 0 : index
    %43 = vector.load %arg9[%c0_26, %c0_27, %c0_28, %c0_29] : memref<4x4x9x8xf32, #tpu.memory_space<vmem>>, vector<1x1x9x8xf32>
    %44 = vector.shape_cast %43 : vector<1x1x9x8xf32> to vector<9x8xf32>
    %45 = vector.shape_cast %42 : vector<9x8xf32> to vector<1x1x9x8xf32>
    tpu.vector_store %arg9[%c0_26, %c0_27, %c0_28, %c0_29], %45 {strides = array<i32>} : memref<4x4x9x8xf32, #tpu.memory_space<vmem>>, vector<1x1x9x8xf32>,
    %46 = vector.extract_strided_slice %33 {offsets = [0, 8], sizes = [9, 8], strides = [1, 1]} : vector<9x96xf32> to vector<9x8xf32>
    %c0_30 = arith.constant 0 : index
    %c1 = arith.constant 1 : index
    %c0_31 = arith.constant 0 : index
    %c0_32 = arith.constant 0 : index
    %47 = vector.load %arg7[%c0_30, %c1, %c0_31, %c0_32] : memref<4x4x9x8xf32, #tpu.memory_space<vmem>>, vector<1x1x9x8xf32>
    %48 = vector.shape_cast %47 : vector<1x1x9x8xf32> to vector<9x8xf32>
    %49 = vector.shape_cast %46 : vector<9x8xf32> to vector<1x1x9x8xf32>
    tpu.vector_store %arg7[%c0_30, %c1, %c0_31, %c0_32], %49 {strides = array<i32>} : memref<4x4x9x8xf32, #tpu.memory_space<vmem>>, vector<1x1x9x8xf32>,
    %50 = vector.extract_strided_slice %33 {offsets = [0, 40], sizes = [9, 8], strides = [1, 1]} : vector<9x96xf32> to vector<9x8xf32>
    %c0_33 = arith.constant 0 : index
    %c1_34 = arith.constant 1 : index
    %c0_35 = arith.constant 0 : index
    %c0_36 = arith.constant 0 : index
    %51 = vector.load %arg8[%c0_33, %c1_34, %c0_35, %c0_36] : memref<4x4x9x8xf32, #tpu.memory_space<vmem>>, vector<1x1x9x8xf32>
    %52 = vector.shape_cast %51 : vector<1x1x9x8xf32> to vector<9x8xf32>
    %53 = vector.shape_cast %50 : vector<9x8xf32> to vector<1x1x9x8xf32>
    tpu.vector_store %arg8[%c0_33, %c1_34, %c0_35, %c0_36], %53 {strides = array<i32>} : memref<4x4x9x8xf32, #tpu.memory_space<vmem>>, vector<1x1x9x8xf32>,
    %54 = vector.extract_strided_slice %33 {offsets = [0, 72], sizes = [9, 8], strides = [1, 1]} : vector<9x96xf32> to vector<9x8xf32>
    %c0_37 = arith.constant 0 : index
    %c1_38 = arith.constant 1 : index
    %c0_39 = arith.constant 0 : index
    %c0_40 = arith.constant 0 : index
    %55 = vector.load %arg9[%c0_37, %c1_38, %c0_39, %c0_40] : memref<4x4x9x8xf32, #tpu.memory_space<vmem>>, vector<1x1x9x8xf32>
    %56 = vector.shape_cast %55 : vector<1x1x9x8xf32> to vector<9x8xf32>
    %57 = vector.shape_cast %54 : vector<9x8xf32> to vector<1x1x9x8xf32>
    tpu.vector_store %arg9[%c0_37, %c1_38, %c0_39, %c0_40], %57 {strides = array<i32>} : memref<4x4x9x8xf32, #tpu.memory_space<vmem>>, vector<1x1x9x8xf32>,
    %58 = vector.extract_strided_slice %33 {offsets = [0, 16], sizes = [9, 8], strides = [1, 1]} : vector<9x96xf32> to vector<9x8xf32>
    %c0_41 = arith.constant 0 : index
    %c2 = arith.constant 2 : index
    %c0_42 = arith.constant 0 : index
    %c0_43 = arith.constant 0 : index
    %59 = vector.load %arg7[%c0_41, %c2, %c0_42, %c0_43] : memref<4x4x9x8xf32, #tpu.memory_space<vmem>>, vector<1x1x9x8xf32>
    %60 = vector.shape_cast %59 : vector<1x1x9x8xf32> to vector<9x8xf32>
    %61 = vector.shape_cast %58 : vector<9x8xf32> to vector<1x1x9x8xf32>
    tpu.vector_store %arg7[%c0_41, %c2, %c0_42, %c0_43], %61 {strides = array<i32>} : memref<4x4x9x8xf32, #tpu.memory_space<vmem>>, vector<1x1x9x8xf32>,
    %62 = vector.extract_strided_slice %33 {offsets = [0, 48], sizes = [9, 8], strides = [1, 1]} : vector<9x96xf32> to vector<9x8xf32>
    %c0_44 = arith.constant 0 : index
    %c2_45 = arith.constant 2 : index
    %c0_46 = arith.constant 0 : index
    %c0_47 = arith.constant 0 : index
    %63 = vector.load %arg8[%c0_44, %c2_45, %c0_46, %c0_47] : memref<4x4x9x8xf32, #tpu.memory_space<vmem>>, vector<1x1x9x8xf32>
    %64 = vector.shape_cast %63 : vector<1x1x9x8xf32> to vector<9x8xf32>
    %65 = vector.shape_cast %62 : vector<9x8xf32> to vector<1x1x9x8xf32>
    tpu.vector_store %arg8[%c0_44, %c2_45, %c0_46, %c0_47], %65 {strides = array<i32>} : memref<4x4x9x8xf32, #tpu.memory_space<vmem>>, vector<1x1x9x8xf32>,
    %66 = vector.extract_strided_slice %33 {offsets = [0, 80], sizes = [9, 8], strides = [1, 1]} : vector<9x96xf32> to vector<9x8xf32>
    %c0_48 = arith.constant 0 : index
    %c2_49 = arith.constant 2 : index
    %c0_50 = arith.constant 0 : index
    %c0_51 = arith.constant 0 : index
    %67 = vector.load %arg9[%c0_48, %c2_49, %c0_50, %c0_51] : memref<4x4x9x8xf32, #tpu.memory_space<vmem>>, vector<1x1x9x8xf32>
    %68 = vector.shape_cast %67 : vector<1x1x9x8xf32> to vector<9x8xf32>
    %69 = vector.shape_cast %66 : vector<9x8xf32> to vector<1x1x9x8xf32>
    tpu.vector_store %arg9[%c0_48, %c2_49, %c0_50, %c0_51], %69 {strides = array<i32>} : memref<4x4x9x8xf32, #tpu.memory_space<vmem>>, vector<1x1x9x8xf32>,
    %70 = vector.extract_strided_slice %33 {offsets = [0, 24], sizes = [9, 8], strides = [1, 1]} : vector<9x96xf32> to vector<9x8xf32>
    %c0_52 = arith.constant 0 : index
    %c3 = arith.constant 3 : index
    %c0_53 = arith.constant 0 : index
    %c0_54 = arith.constant 0 : index
    %71 = vector.load %arg7[%c0_52, %c3, %c0_53, %c0_54] : memref<4x4x9x8xf32, #tpu.memory_space<vmem>>, vector<1x1x9x8xf32>
    %72 = vector.shape_cast %71 : vector<1x1x9x8xf32> to vector<9x8xf32>
    %73 = vector.shape_cast %70 : vector<9x8xf32> to vector<1x1x9x8xf32>
    tpu.vector_store %arg7[%c0_52, %c3, %c0_53, %c0_54], %73 {strides = array<i32>} : memref<4x4x9x8xf32, #tpu.memory_space<vmem>>, vector<1x1x9x8xf32>,
    %74 = vector.extract_strided_slice %33 {offsets = [0, 56], sizes = [9, 8], strides = [1, 1]} : vector<9x96xf32> to vector<9x8xf32>
    %c0_55 = arith.constant 0 : index
    %c3_56 = arith.constant 3 : index
    %c0_57 = arith.constant 0 : index
    %c0_58 = arith.constant 0 : index
    %75 = vector.load %arg8[%c0_55, %c3_56, %c0_57, %c0_58] : memref<4x4x9x8xf32, #tpu.memory_space<vmem>>, vector<1x1x9x8xf32>
    %76 = vector.shape_cast %75 : vector<1x1x9x8xf32> to vector<9x8xf32>
    %77 = vector.shape_cast %74 : vector<9x8xf32> to vector<1x1x9x8xf32>
    tpu.vector_store %arg8[%c0_55, %c3_56, %c0_57, %c0_58], %77 {strides = array<i32>} : memref<4x4x9x8xf32, #tpu.memory_space<vmem>>, vector<1x1x9x8xf32>,
    %78 = vector.extract_strided_slice %33 {offsets = [0, 88], sizes = [9, 8], strides = [1, 1]} : vector<9x96xf32> to vector<9x8xf32>
    %c0_59 = arith.constant 0 : index
    %c3_60 = arith.constant 3 : index
    %c0_61 = arith.constant 0 : index
    %c0_62 = arith.constant 0 : index
    %79 = vector.load %arg9[%c0_59, %c3_60, %c0_61, %c0_62] : memref<4x4x9x8xf32, #tpu.memory_space<vmem>>, vector<1x1x9x8xf32>
    %80 = vector.shape_cast %79 : vector<1x1x9x8xf32> to vector<9x8xf32>
    %81 = vector.shape_cast %78 : vector<9x8xf32> to vector<1x1x9x8xf32>
    tpu.vector_store %arg9[%c0_59, %c3_60, %c0_61, %c0_62], %81 {strides = array<i32>} : memref<4x4x9x8xf32, #tpu.memory_space<vmem>>, vector<1x1x9x8xf32>,
    %c1_63 = arith.constant 1 : index
    %c0_64 = arith.constant 0 : index
    %c0_65 = arith.constant 0 : index
    %82 = vector.load %arg1[%c1_63, %c0_64, %c0_65] : memref<4x8x32xf32, #tpu.memory_space<vmem>>, vector<1x8x32xf32>
    %83 = vector.shape_cast %82 : vector<1x8x32xf32> to vector<8x32xf32>
    %c1_66 = arith.constant 1 : index
    %c0_67 = arith.constant 0 : index
    %c0_68 = arith.constant 0 : index
    %84 = vector.load %arg2[%c1_66, %c0_67, %c0_68] : memref<4x1x32xf32, #tpu.memory_space<vmem>>, vector<1x1x32xf32>
    %85 = vector.shape_cast %84 : vector<1x1x32xf32> to vector<1x32xf32>
    %86 = tpu.concatenate %83, %85 in 0 : vector<8x32xf32>, vector<1x32xf32> -> vector<9x32xf32>
    %c0_69 = arith.constant 0 : index
    %c0_70 = arith.constant 0 : index
    %87 = vector.load %arg3[%c0_69, %c0_70] : memref<1x32xf32, #tpu.memory_space<vmem>>, vector<1x32xf32>
    %c0_71 = arith.constant 0 : index
    %c0_72 = arith.constant 0 : index
    %88 = vector.load %arg4[%c0_71, %c0_72] : memref<1x32xf32, #tpu.memory_space<vmem>>, vector<1x32xf32>
    %cst_73 = arith.constant dense<0.000000e+00> : vector<9xf32>
    %89 = vector.multi_reduction <add>, %86, %cst_73 [1] : vector<9x32xf32> to vector<9xf32>
    %90 = vector.shape_cast %89 : vector<9xf32> to vector<9x1xf32>
    %cst_74 = arith.constant 3.200000e+01 : f32
    %91 = vector.broadcast %cst_74 : f32 to vector<9x1xf32>
    %92 = arith.divf %90, %91 : vector<9x1xf32>
    %93 = vector.broadcast %92 : vector<9x1xf32> to vector<9x32xf32>
    %94 = arith.subf %86, %93 : vector<9x32xf32>
    %95 = arith.mulf %94, %94 : vector<9x32xf32>
    %cst_75 = arith.constant dense<0.000000e+00> : vector<9xf32>
    %96 = vector.multi_reduction <add>, %95, %cst_75 [1] : vector<9x32xf32> to vector<9xf32>
    %97 = vector.shape_cast %96 : vector<9xf32> to vector<9x1xf32>
    %cst_76 = arith.constant 3.200000e+01 : f32
    %98 = vector.broadcast %cst_76 : f32 to vector<9x1xf32>
    %99 = arith.divf %97, %98 : vector<9x1xf32>
    %100 = vector.broadcast %92 : vector<9x1xf32> to vector<9x32xf32>
    %101 = arith.subf %86, %100 : vector<9x32xf32>
    %cst_77 = arith.constant 9.99999974E-6 : f32
    %102 = vector.broadcast %cst_77 : f32 to vector<9x1xf32>
    %103 = arith.addf %99, %102 : vector<9x1xf32>
    %104 = math.rsqrt %103 : vector<9x1xf32>
    %105 = vector.broadcast %104 : vector<9x1xf32> to vector<9x32xf32>
    %106 = arith.mulf %101, %105 : vector<9x32xf32>
    %107 = vector.broadcast %87 : vector<1x32xf32> to vector<9x32xf32>
    %108 = arith.mulf %106, %107 : vector<9x32xf32>
    %109 = vector.broadcast %88 : vector<1x32xf32> to vector<9x32xf32>
    %110 = arith.addf %108, %109 : vector<9x32xf32>
    %c0_78 = arith.constant 0 : index
    %c0_79 = arith.constant 0 : index
    %111 = vector.load %arg5[%c0_78, %c0_79] : memref<32x96xf32, #tpu.memory_space<vmem>>, vector<32x96xf32>
    %cst_80 = arith.constant dense<0.000000e+00> : vector<9x96xf32>
    %112 = tpu.matmul %110, %111, %cst_80 {dimension_numbers = #tpu.dot_dimension_numbers<[1], [0], [0], [1], [0, 0, 1, 1], [], []>} : vector<9x32xf32>, vector<32x96xf32>, vector<9x96xf32> -> vector<9x96xf32>
    %c0_81 = arith.constant 0 : index
    %c0_82 = arith.constant 0 : index
    %113 = vector.load %arg6[%c0_81, %c0_82] : memref<1x96xf32, #tpu.memory_space<vmem>>, vector<1x96xf32>
    %114 = vector.broadcast %113 : vector<1x96xf32> to vector<9x96xf32>
    %115 = arith.addf %112, %114 : vector<9x96xf32>
    %116 = vector.extract_strided_slice %115 {offsets = [0, 0], sizes = [9, 8], strides = [1, 1]} : vector<9x96xf32> to vector<9x8xf32>
    %c1_83 = arith.constant 1 : index
    %c0_84 = arith.constant 0 : index
    %c0_85 = arith.constant 0 : index
    %c0_86 = arith.constant 0 : index
    %117 = vector.load %arg7[%c1_83, %c0_84, %c0_85, %c0_86] : memref<4x4x9x8xf32, #tpu.memory_space<vmem>>, vector<1x1x9x8xf32>
    %118 = vector.shape_cast %117 : vector<1x1x9x8xf32> to vector<9x8xf32>
    %119 = vector.shape_cast %116 : vector<9x8xf32> to vector<1x1x9x8xf32>
    tpu.vector_store %arg7[%c1_83, %c0_84, %c0_85, %c0_86], %119 {strides = array<i32>} : memref<4x4x9x8xf32, #tpu.memory_space<vmem>>, vector<1x1x9x8xf32>,
    %120 = vector.extract_strided_slice %115 {offsets = [0, 32], sizes = [9, 8], strides = [1, 1]} : vector<9x96xf32> to vector<9x8xf32>
    %c1_87 = arith.constant 1 : index
    %c0_88 = arith.constant 0 : index
    %c0_89 = arith.constant 0 : index
    %c0_90 = arith.constant 0 : index
    %121 = vector.load %arg8[%c1_87, %c0_88, %c0_89, %c0_90] : memref<4x4x9x8xf32, #tpu.memory_space<vmem>>, vector<1x1x9x8xf32>
    %122 = vector.shape_cast %121 : vector<1x1x9x8xf32> to vector<9x8xf32>
    %123 = vector.shape_cast %120 : vector<9x8xf32> to vector<1x1x9x8xf32>
    tpu.vector_store %arg8[%c1_87, %c0_88, %c0_89, %c0_90], %123 {strides = array<i32>} : memref<4x4x9x8xf32, #tpu.memory_space<vmem>>, vector<1x1x9x8xf32>,
    %124 = vector.extract_strided_slice %115 {offsets = [0, 64], sizes = [9, 8], strides = [1, 1]} : vector<9x96xf32> to vector<9x8xf32>
    %c1_91 = arith.constant 1 : index
    %c0_92 = arith.constant 0 : index
    %c0_93 = arith.constant 0 : index
    %c0_94 = arith.constant 0 : index
    %125 = vector.load %arg9[%c1_91, %c0_92, %c0_93, %c0_94] : memref<4x4x9x8xf32, #tpu.memory_space<vmem>>, vector<1x1x9x8xf32>
    %126 = vector.shape_cast %125 : vector<1x1x9x8xf32> to vector<9x8xf32>
    %127 = vector.shape_cast %124 : vector<9x8xf32> to vector<1x1x9x8xf32>
    tpu.vector_store %arg9[%c1_91, %c0_92, %c0_93, %c0_94], %127 {strides = array<i32>} : memref<4x4x9x8xf32, #tpu.memory_space<vmem>>, vector<1x1x9x8xf32>,
    %128 = vector.extract_strided_slice %115 {offsets = [0, 8], sizes = [9, 8], strides = [1, 1]} : vector<9x96xf32> to vector<9x8xf32>
    %c1_95 = arith.constant 1 : index
    %c1_96 = arith.constant 1 : index
    %c0_97 = arith.constant 0 : index
    %c0_98 = arith.constant 0 : index
    %129 = vector.load %arg7[%c1_95, %c1_96, %c0_97, %c0_98] : memref<4x4x9x8xf32, #tpu.memory_space<vmem>>, vector<1x1x9x8xf32>
    %130 = vector.shape_cast %129 : vector<1x1x9x8xf32> to vector<9x8xf32>
    %131 = vector.shape_cast %128 : vector<9x8xf32> to vector<1x1x9x8xf32>
    tpu.vector_store %arg7[%c1_95, %c1_96, %c0_97, %c0_98], %131 {strides = array<i32>} : memref<4x4x9x8xf32, #tpu.memory_space<vmem>>, vector<1x1x9x8xf32>,
    %132 = vector.extract_strided_slice %115 {offsets = [0, 40], sizes = [9, 8], strides = [1, 1]} : vector<9x96xf32> to vector<9x8xf32>
    %c1_99 = arith.constant 1 : index
    %c1_100 = arith.constant 1 : index
    %c0_101 = arith.constant 0 : index
    %c0_102 = arith.constant 0 : index
    %133 = vector.load %arg8[%c1_99, %c1_100, %c0_101, %c0_102] : memref<4x4x9x8xf32, #tpu.memory_space<vmem>>, vector<1x1x9x8xf32>
    %134 = vector.shape_cast %133 : vector<1x1x9x8xf32> to vector<9x8xf32>
    %135 = vector.shape_cast %132 : vector<9x8xf32> to vector<1x1x9x8xf32>
    tpu.vector_store %arg8[%c1_99, %c1_100, %c0_101, %c0_102], %135 {strides = array<i32>} : memref<4x4x9x8xf32, #tpu.memory_space<vmem>>, vector<1x1x9x8xf32>,
    %136 = vector.extract_strided_slice %115 {offsets = [0, 72], sizes = [9, 8], strides = [1, 1]} : vector<9x96xf32> to vector<9x8xf32>
    %c1_103 = arith.constant 1 : index
    %c1_104 = arith.constant 1 : index
    %c0_105 = arith.constant 0 : index
    %c0_106 = arith.constant 0 : index
    %137 = vector.load %arg9[%c1_103, %c1_104, %c0_105, %c0_106] : memref<4x4x9x8xf32, #tpu.memory_space<vmem>>, vector<1x1x9x8xf32>
    %138 = vector.shape_cast %137 : vector<1x1x9x8xf32> to vector<9x8xf32>
    %139 = vector.shape_cast %136 : vector<9x8xf32> to vector<1x1x9x8xf32>
    tpu.vector_store %arg9[%c1_103, %c1_104, %c0_105, %c0_106], %139 {strides = array<i32>} : memref<4x4x9x8xf32, #tpu.memory_space<vmem>>, vector<1x1x9x8xf32>,
    %140 = vector.extract_strided_slice %115 {offsets = [0, 16], sizes = [9, 8], strides = [1, 1]} : vector<9x96xf32> to vector<9x8xf32>
    %c1_107 = arith.constant 1 : index
    %c2_108 = arith.constant 2 : index
    %c0_109 = arith.constant 0 : index
    %c0_110 = arith.constant 0 : index
    %141 = vector.load %arg7[%c1_107, %c2_108, %c0_109, %c0_110] : memref<4x4x9x8xf32, #tpu.memory_space<vmem>>, vector<1x1x9x8xf32>
    %142 = vector.shape_cast %141 : vector<1x1x9x8xf32> to vector<9x8xf32>
    %143 = vector.shape_cast %140 : vector<9x8xf32> to vector<1x1x9x8xf32>
    tpu.vector_store %arg7[%c1_107, %c2_108, %c0_109, %c0_110], %143 {strides = array<i32>} : memref<4x4x9x8xf32, #tpu.memory_space<vmem>>, vector<1x1x9x8xf32>,
    %144 = vector.extract_strided_slice %115 {offsets = [0, 48], sizes = [9, 8], strides = [1, 1]} : vector<9x96xf32> to vector<9x8xf32>
    %c1_111 = arith.constant 1 : index
    %c2_112 = arith.constant 2 : index
    %c0_113 = arith.constant 0 : index
    %c0_114 = arith.constant 0 : index
    %145 = vector.load %arg8[%c1_111, %c2_112, %c0_113, %c0_114] : memref<4x4x9x8xf32, #tpu.memory_space<vmem>>, vector<1x1x9x8xf32>
    %146 = vector.shape_cast %145 : vector<1x1x9x8xf32> to vector<9x8xf32>
    %147 = vector.shape_cast %144 : vector<9x8xf32> to vector<1x1x9x8xf32>
    tpu.vector_store %arg8[%c1_111, %c2_112, %c0_113, %c0_114], %147 {strides = array<i32>} : memref<4x4x9x8xf32, #tpu.memory_space<vmem>>, vector<1x1x9x8xf32>,
    %148 = vector.extract_strided_slice %115 {offsets = [0, 80], sizes = [9, 8], strides = [1, 1]} : vector<9x96xf32> to vector<9x8xf32>
    %c1_115 = arith.constant 1 : index
    %c2_116 = arith.constant 2 : index
    %c0_117 = arith.constant 0 : index
    %c0_118 = arith.constant 0 : index
    %149 = vector.load %arg9[%c1_115, %c2_116, %c0_117, %c0_118] : memref<4x4x9x8xf32, #tpu.memory_space<vmem>>, vector<1x1x9x8xf32>
    %150 = vector.shape_cast %149 : vector<1x1x9x8xf32> to vector<9x8xf32>
    %151 = vector.shape_cast %148 : vector<9x8xf32> to vector<1x1x9x8xf32>
    tpu.vector_store %arg9[%c1_115, %c2_116, %c0_117, %c0_118], %151 {strides = array<i32>} : memref<4x4x9x8xf32, #tpu.memory_space<vmem>>, vector<1x1x9x8xf32>,
    %152 = vector.extract_strided_slice %115 {offsets = [0, 24], sizes = [9, 8], strides = [1, 1]} : vector<9x96xf32> to vector<9x8xf32>
    %c1_119 = arith.constant 1 : index
    %c3_120 = arith.constant 3 : index
    %c0_121 = arith.constant 0 : index
    %c0_122 = arith.constant 0 : index
    %153 = vector.load %arg7[%c1_119, %c3_120, %c0_121, %c0_122] : memref<4x4x9x8xf32, #tpu.memory_space<vmem>>, vector<1x1x9x8xf32>
    %154 = vector.shape_cast %153 : vector<1x1x9x8xf32> to vector<9x8xf32>
    %155 = vector.shape_cast %152 : vector<9x8xf32> to vector<1x1x9x8xf32>
    tpu.vector_store %arg7[%c1_119, %c3_120, %c0_121, %c0_122], %155 {strides = array<i32>} : memref<4x4x9x8xf32, #tpu.memory_space<vmem>>, vector<1x1x9x8xf32>,
    %156 = vector.extract_strided_slice %115 {offsets = [0, 56], sizes = [9, 8], strides = [1, 1]} : vector<9x96xf32> to vector<9x8xf32>
    %c1_123 = arith.constant 1 : index
    %c3_124 = arith.constant 3 : index
    %c0_125 = arith.constant 0 : index
    %c0_126 = arith.constant 0 : index
    %157 = vector.load %arg8[%c1_123, %c3_124, %c0_125, %c0_126] : memref<4x4x9x8xf32, #tpu.memory_space<vmem>>, vector<1x1x9x8xf32>
    %158 = vector.shape_cast %157 : vector<1x1x9x8xf32> to vector<9x8xf32>
    %159 = vector.shape_cast %156 : vector<9x8xf32> to vector<1x1x9x8xf32>
    tpu.vector_store %arg8[%c1_123, %c3_124, %c0_125, %c0_126], %159 {strides = array<i32>} : memref<4x4x9x8xf32, #tpu.memory_space<vmem>>, vector<1x1x9x8xf32>,
    %160 = vector.extract_strided_slice %115 {offsets = [0, 88], sizes = [9, 8], strides = [1, 1]} : vector<9x96xf32> to vector<9x8xf32>
    %c1_127 = arith.constant 1 : index
    %c3_128 = arith.constant 3 : index
    %c0_129 = arith.constant 0 : index
    %c0_130 = arith.constant 0 : index
    %161 = vector.load %arg9[%c1_127, %c3_128, %c0_129, %c0_130] : memref<4x4x9x8xf32, #tpu.memory_space<vmem>>, vector<1x1x9x8xf32>
    %162 = vector.shape_cast %161 : vector<1x1x9x8xf32> to vector<9x8xf32>
    %163 = vector.shape_cast %160 : vector<9x8xf32> to vector<1x1x9x8xf32>
    tpu.vector_store %arg9[%c1_127, %c3_128, %c0_129, %c0_130], %163 {strides = array<i32>} : memref<4x4x9x8xf32, #tpu.memory_space<vmem>>, vector<1x1x9x8xf32>,
    %c2_131 = arith.constant 2 : index
    %c0_132 = arith.constant 0 : index
    %c0_133 = arith.constant 0 : index
    %164 = vector.load %arg1[%c2_131, %c0_132, %c0_133] : memref<4x8x32xf32, #tpu.memory_space<vmem>>, vector<1x8x32xf32>
    %165 = vector.shape_cast %164 : vector<1x8x32xf32> to vector<8x32xf32>
    %c2_134 = arith.constant 2 : index
    %c0_135 = arith.constant 0 : index
    %c0_136 = arith.constant 0 : index
    %166 = vector.load %arg2[%c2_134, %c0_135, %c0_136] : memref<4x1x32xf32, #tpu.memory_space<vmem>>, vector<1x1x32xf32>
    %167 = vector.shape_cast %166 : vector<1x1x32xf32> to vector<1x32xf32>
    %168 = tpu.concatenate %165, %167 in 0 : vector<8x32xf32>, vector<1x32xf32> -> vector<9x32xf32>
    %c0_137 = arith.constant 0 : index
    %c0_138 = arith.constant 0 : index
    %169 = vector.load %arg3[%c0_137, %c0_138] : memref<1x32xf32, #tpu.memory_space<vmem>>, vector<1x32xf32>
    %c0_139 = arith.constant 0 : index
    %c0_140 = arith.constant 0 : index
    %170 = vector.load %arg4[%c0_139, %c0_140] : memref<1x32xf32, #tpu.memory_space<vmem>>, vector<1x32xf32>
    %cst_141 = arith.constant dense<0.000000e+00> : vector<9xf32>
    %171 = vector.multi_reduction <add>, %168, %cst_141 [1] : vector<9x32xf32> to vector<9xf32>
    %172 = vector.shape_cast %171 : vector<9xf32> to vector<9x1xf32>
    %cst_142 = arith.constant 3.200000e+01 : f32
    %173 = vector.broadcast %cst_142 : f32 to vector<9x1xf32>
    %174 = arith.divf %172, %173 : vector<9x1xf32>
    %175 = vector.broadcast %174 : vector<9x1xf32> to vector<9x32xf32>
    %176 = arith.subf %168, %175 : vector<9x32xf32>
    %177 = arith.mulf %176, %176 : vector<9x32xf32>
    %cst_143 = arith.constant dense<0.000000e+00> : vector<9xf32>
    %178 = vector.multi_reduction <add>, %177, %cst_143 [1] : vector<9x32xf32> to vector<9xf32>
    %179 = vector.shape_cast %178 : vector<9xf32> to vector<9x1xf32>
    %cst_144 = arith.constant 3.200000e+01 : f32
    %180 = vector.broadcast %cst_144 : f32 to vector<9x1xf32>
    %181 = arith.divf %179, %180 : vector<9x1xf32>
    %182 = vector.broadcast %174 : vector<9x1xf32> to vector<9x32xf32>
    %183 = arith.subf %168, %182 : vector<9x32xf32>
    %cst_145 = arith.constant 9.99999974E-6 : f32
    %184 = vector.broadcast %cst_145 : f32 to vector<9x1xf32>
    %185 = arith.addf %181, %184 : vector<9x1xf32>
    %186 = math.rsqrt %185 : vector<9x1xf32>
    %187 = vector.broadcast %186 : vector<9x1xf32> to vector<9x32xf32>
    %188 = arith.mulf %183, %187 : vector<9x32xf32>
    %189 = vector.broadcast %169 : vector<1x32xf32> to vector<9x32xf32>
    %190 = arith.mulf %188, %189 : vector<9x32xf32>
    %191 = vector.broadcast %170 : vector<1x32xf32> to vector<9x32xf32>
    %192 = arith.addf %190, %191 : vector<9x32xf32>
    %c0_146 = arith.constant 0 : index
    %c0_147 = arith.constant 0 : index
    %193 = vector.load %arg5[%c0_146, %c0_147] : memref<32x96xf32, #tpu.memory_space<vmem>>, vector<32x96xf32>
    %cst_148 = arith.constant dense<0.000000e+00> : vector<9x96xf32>
    %194 = tpu.matmul %192, %193, %cst_148 {dimension_numbers = #tpu.dot_dimension_numbers<[1], [0], [0], [1], [0, 0, 1, 1], [], []>} : vector<9x32xf32>, vector<32x96xf32>, vector<9x96xf32> -> vector<9x96xf32>
    %c0_149 = arith.constant 0 : index
    %c0_150 = arith.constant 0 : index
    %195 = vector.load %arg6[%c0_149, %c0_150] : memref<1x96xf32, #tpu.memory_space<vmem>>, vector<1x96xf32>
    %196 = vector.broadcast %195 : vector<1x96xf32> to vector<9x96xf32>
    %197 = arith.addf %194, %196 : vector<9x96xf32>
    %198 = vector.extract_strided_slice %197 {offsets = [0, 0], sizes = [9, 8], strides = [1, 1]} : vector<9x96xf32> to vector<9x8xf32>
    %c2_151 = arith.constant 2 : index
    %c0_152 = arith.constant 0 : index
    %c0_153 = arith.constant 0 : index
    %c0_154 = arith.constant 0 : index
    %199 = vector.load %arg7[%c2_151, %c0_152, %c0_153, %c0_154] : memref<4x4x9x8xf32, #tpu.memory_space<vmem>>, vector<1x1x9x8xf32>
    %200 = vector.shape_cast %199 : vector<1x1x9x8xf32> to vector<9x8xf32>
    %201 = vector.shape_cast %198 : vector<9x8xf32> to vector<1x1x9x8xf32>
    tpu.vector_store %arg7[%c2_151, %c0_152, %c0_153, %c0_154], %201 {strides = array<i32>} : memref<4x4x9x8xf32, #tpu.memory_space<vmem>>, vector<1x1x9x8xf32>,
    %202 = vector.extract_strided_slice %197 {offsets = [0, 32], sizes = [9, 8], strides = [1, 1]} : vector<9x96xf32> to vector<9x8xf32>
    %c2_155 = arith.constant 2 : index
    %c0_156 = arith.constant 0 : index
    %c0_157 = arith.constant 0 : index
    %c0_158 = arith.constant 0 : index
    %203 = vector.load %arg8[%c2_155, %c0_156, %c0_157, %c0_158] : memref<4x4x9x8xf32, #tpu.memory_space<vmem>>, vector<1x1x9x8xf32>
    %204 = vector.shape_cast %203 : vector<1x1x9x8xf32> to vector<9x8xf32>
    %205 = vector.shape_cast %202 : vector<9x8xf32> to vector<1x1x9x8xf32>
    tpu.vector_store %arg8[%c2_155, %c0_156, %c0_157, %c0_158], %205 {strides = array<i32>} : memref<4x4x9x8xf32, #tpu.memory_space<vmem>>, vector<1x1x9x8xf32>,
    %206 = vector.extract_strided_slice %197 {offsets = [0, 64], sizes = [9, 8], strides = [1, 1]} : vector<9x96xf32> to vector<9x8xf32>
    %c2_159 = arith.constant 2 : index
    %c0_160 = arith.constant 0 : index
    %c0_161 = arith.constant 0 : index
    %c0_162 = arith.constant 0 : index
    %207 = vector.load %arg9[%c2_159, %c0_160, %c0_161, %c0_162] : memref<4x4x9x8xf32, #tpu.memory_space<vmem>>, vector<1x1x9x8xf32>
    %208 = vector.shape_cast %207 : vector<1x1x9x8xf32> to vector<9x8xf32>
    %209 = vector.shape_cast %206 : vector<9x8xf32> to vector<1x1x9x8xf32>
    tpu.vector_store %arg9[%c2_159, %c0_160, %c0_161, %c0_162], %209 {strides = array<i32>} : memref<4x4x9x8xf32, #tpu.memory_space<vmem>>, vector<1x1x9x8xf32>,
    %210 = vector.extract_strided_slice %197 {offsets = [0, 8], sizes = [9, 8], strides = [1, 1]} : vector<9x96xf32> to vector<9x8xf32>
    %c2_163 = arith.constant 2 : index
    %c1_164 = arith.constant 1 : index
    %c0_165 = arith.constant 0 : index
    %c0_166 = arith.constant 0 : index
    %211 = vector.load %arg7[%c2_163, %c1_164, %c0_165, %c0_166] : memref<4x4x9x8xf32, #tpu.memory_space<vmem>>, vector<1x1x9x8xf32>
    %212 = vector.shape_cast %211 : vector<1x1x9x8xf32> to vector<9x8xf32>
    %213 = vector.shape_cast %210 : vector<9x8xf32> to vector<1x1x9x8xf32>
    tpu.vector_store %arg7[%c2_163, %c1_164, %c0_165, %c0_166], %213 {strides = array<i32>} : memref<4x4x9x8xf32, #tpu.memory_space<vmem>>, vector<1x1x9x8xf32>,
    %214 = vector.extract_strided_slice %197 {offsets = [0, 40], sizes = [9, 8], strides = [1, 1]} : vector<9x96xf32> to vector<9x8xf32>
    %c2_167 = arith.constant 2 : index
    %c1_168 = arith.constant 1 : index
    %c0_169 = arith.constant 0 : index
    %c0_170 = arith.constant 0 : index
    %215 = vector.load %arg8[%c2_167, %c1_168, %c0_169, %c0_170] : memref<4x4x9x8xf32, #tpu.memory_space<vmem>>, vector<1x1x9x8xf32>
    %216 = vector.shape_cast %215 : vector<1x1x9x8xf32> to vector<9x8xf32>
    %217 = vector.shape_cast %214 : vector<9x8xf32> to vector<1x1x9x8xf32>
    tpu.vector_store %arg8[%c2_167, %c1_168, %c0_169, %c0_170], %217 {strides = array<i32>} : memref<4x4x9x8xf32, #tpu.memory_space<vmem>>, vector<1x1x9x8xf32>,
    %218 = vector.extract_strided_slice %197 {offsets = [0, 72], sizes = [9, 8], strides = [1, 1]} : vector<9x96xf32> to vector<9x8xf32>
    %c2_171 = arith.constant 2 : index
    %c1_172 = arith.constant 1 : index
    %c0_173 = arith.constant 0 : index
    %c0_174 = arith.constant 0 : index
    %219 = vector.load %arg9[%c2_171, %c1_172, %c0_173, %c0_174] : memref<4x4x9x8xf32, #tpu.memory_space<vmem>>, vector<1x1x9x8xf32>
    %220 = vector.shape_cast %219 : vector<1x1x9x8xf32> to vector<9x8xf32>
    %221 = vector.shape_cast %218 : vector<9x8xf32> to vector<1x1x9x8xf32>
    tpu.vector_store %arg9[%c2_171, %c1_172, %c0_173, %c0_174], %221 {strides = array<i32>} : memref<4x4x9x8xf32, #tpu.memory_space<vmem>>, vector<1x1x9x8xf32>,
    %222 = vector.extract_strided_slice %197 {offsets = [0, 16], sizes = [9, 8], strides = [1, 1]} : vector<9x96xf32> to vector<9x8xf32>
    %c2_175 = arith.constant 2 : index
    %c2_176 = arith.constant 2 : index
    %c0_177 = arith.constant 0 : index
    %c0_178 = arith.constant 0 : index
    %223 = vector.load %arg7[%c2_175, %c2_176, %c0_177, %c0_178] : memref<4x4x9x8xf32, #tpu.memory_space<vmem>>, vector<1x1x9x8xf32>
    %224 = vector.shape_cast %223 : vector<1x1x9x8xf32> to vector<9x8xf32>
    %225 = vector.shape_cast %222 : vector<9x8xf32> to vector<1x1x9x8xf32>
    tpu.vector_store %arg7[%c2_175, %c2_176, %c0_177, %c0_178], %225 {strides = array<i32>} : memref<4x4x9x8xf32, #tpu.memory_space<vmem>>, vector<1x1x9x8xf32>,
    %226 = vector.extract_strided_slice %197 {offsets = [0, 48], sizes = [9, 8], strides = [1, 1]} : vector<9x96xf32> to vector<9x8xf32>
    %c2_179 = arith.constant 2 : index
    %c2_180 = arith.constant 2 : index
    %c0_181 = arith.constant 0 : index
    %c0_182 = arith.constant 0 : index
    %227 = vector.load %arg8[%c2_179, %c2_180, %c0_181, %c0_182] : memref<4x4x9x8xf32, #tpu.memory_space<vmem>>, vector<1x1x9x8xf32>
    %228 = vector.shape_cast %227 : vector<1x1x9x8xf32> to vector<9x8xf32>
    %229 = vector.shape_cast %226 : vector<9x8xf32> to vector<1x1x9x8xf32>
    tpu.vector_store %arg8[%c2_179, %c2_180, %c0_181, %c0_182], %229 {strides = array<i32>} : memref<4x4x9x8xf32, #tpu.memory_space<vmem>>, vector<1x1x9x8xf32>,
    %230 = vector.extract_strided_slice %197 {offsets = [0, 80], sizes = [9, 8], strides = [1, 1]} : vector<9x96xf32> to vector<9x8xf32>
    %c2_183 = arith.constant 2 : index
    %c2_184 = arith.constant 2 : index
    %c0_185 = arith.constant 0 : index
    %c0_186 = arith.constant 0 : index
    %231 = vector.load %arg9[%c2_183, %c2_184, %c0_185, %c0_186] : memref<4x4x9x8xf32, #tpu.memory_space<vmem>>, vector<1x1x9x8xf32>
    %232 = vector.shape_cast %231 : vector<1x1x9x8xf32> to vector<9x8xf32>
    %233 = vector.shape_cast %230 : vector<9x8xf32> to vector<1x1x9x8xf32>
    tpu.vector_store %arg9[%c2_183, %c2_184, %c0_185, %c0_186], %233 {strides = array<i32>} : memref<4x4x9x8xf32, #tpu.memory_space<vmem>>, vector<1x1x9x8xf32>,
    %234 = vector.extract_strided_slice %197 {offsets = [0, 24], sizes = [9, 8], strides = [1, 1]} : vector<9x96xf32> to vector<9x8xf32>
    %c2_187 = arith.constant 2 : index
    %c3_188 = arith.constant 3 : index
    %c0_189 = arith.constant 0 : index
    %c0_190 = arith.constant 0 : index
    %235 = vector.load %arg7[%c2_187, %c3_188, %c0_189, %c0_190] : memref<4x4x9x8xf32, #tpu.memory_space<vmem>>, vector<1x1x9x8xf32>
    %236 = vector.shape_cast %235 : vector<1x1x9x8xf32> to vector<9x8xf32>
    %237 = vector.shape_cast %234 : vector<9x8xf32> to vector<1x1x9x8xf32>
    tpu.vector_store %arg7[%c2_187, %c3_188, %c0_189, %c0_190], %237 {strides = array<i32>} : memref<4x4x9x8xf32, #tpu.memory_space<vmem>>, vector<1x1x9x8xf32>,
    %238 = vector.extract_strided_slice %197 {offsets = [0, 56], sizes = [9, 8], strides = [1, 1]} : vector<9x96xf32> to vector<9x8xf32>
    %c2_191 = arith.constant 2 : index
    %c3_192 = arith.constant 3 : index
    %c0_193 = arith.constant 0 : index
    %c0_194 = arith.constant 0 : index
    %239 = vector.load %arg8[%c2_191, %c3_192, %c0_193, %c0_194] : memref<4x4x9x8xf32, #tpu.memory_space<vmem>>, vector<1x1x9x8xf32>
    %240 = vector.shape_cast %239 : vector<1x1x9x8xf32> to vector<9x8xf32>
    %241 = vector.shape_cast %238 : vector<9x8xf32> to vector<1x1x9x8xf32>
    tpu.vector_store %arg8[%c2_191, %c3_192, %c0_193, %c0_194], %241 {strides = array<i32>} : memref<4x4x9x8xf32, #tpu.memory_space<vmem>>, vector<1x1x9x8xf32>,
    %242 = vector.extract_strided_slice %197 {offsets = [0, 88], sizes = [9, 8], strides = [1, 1]} : vector<9x96xf32> to vector<9x8xf32>
    %c2_195 = arith.constant 2 : index
    %c3_196 = arith.constant 3 : index
    %c0_197 = arith.constant 0 : index
    %c0_198 = arith.constant 0 : index
    %243 = vector.load %arg9[%c2_195, %c3_196, %c0_197, %c0_198] : memref<4x4x9x8xf32, #tpu.memory_space<vmem>>, vector<1x1x9x8xf32>
    %244 = vector.shape_cast %243 : vector<1x1x9x8xf32> to vector<9x8xf32>
    %245 = vector.shape_cast %242 : vector<9x8xf32> to vector<1x1x9x8xf32>
    tpu.vector_store %arg9[%c2_195, %c3_196, %c0_197, %c0_198], %245 {strides = array<i32>} : memref<4x4x9x8xf32, #tpu.memory_space<vmem>>, vector<1x1x9x8xf32>,
    %c3_199 = arith.constant 3 : index
    %c0_200 = arith.constant 0 : index
    %c0_201 = arith.constant 0 : index
    %246 = vector.load %arg1[%c3_199, %c0_200, %c0_201] : memref<4x8x32xf32, #tpu.memory_space<vmem>>, vector<1x8x32xf32>
    %247 = vector.shape_cast %246 : vector<1x8x32xf32> to vector<8x32xf32>
    %c3_202 = arith.constant 3 : index
    %c0_203 = arith.constant 0 : index
    %c0_204 = arith.constant 0 : index
    %248 = vector.load %arg2[%c3_202, %c0_203, %c0_204] : memref<4x1x32xf32, #tpu.memory_space<vmem>>, vector<1x1x32xf32>
    %249 = vector.shape_cast %248 : vector<1x1x32xf32> to vector<1x32xf32>
    %250 = tpu.concatenate %247, %249 in 0 : vector<8x32xf32>, vector<1x32xf32> -> vector<9x32xf32>
    %c0_205 = arith.constant 0 : index
    %c0_206 = arith.constant 0 : index
    %251 = vector.load %arg3[%c0_205, %c0_206] : memref<1x32xf32, #tpu.memory_space<vmem>>, vector<1x32xf32>
    %c0_207 = arith.constant 0 : index
    %c0_208 = arith.constant 0 : index
    %252 = vector.load %arg4[%c0_207, %c0_208] : memref<1x32xf32, #tpu.memory_space<vmem>>, vector<1x32xf32>
    %cst_209 = arith.constant dense<0.000000e+00> : vector<9xf32>
    %253 = vector.multi_reduction <add>, %250, %cst_209 [1] : vector<9x32xf32> to vector<9xf32>
    %254 = vector.shape_cast %253 : vector<9xf32> to vector<9x1xf32>
    %cst_210 = arith.constant 3.200000e+01 : f32
    %255 = vector.broadcast %cst_210 : f32 to vector<9x1xf32>
    %256 = arith.divf %254, %255 : vector<9x1xf32>
    %257 = vector.broadcast %256 : vector<9x1xf32> to vector<9x32xf32>
    %258 = arith.subf %250, %257 : vector<9x32xf32>
    %259 = arith.mulf %258, %258 : vector<9x32xf32>
    %cst_211 = arith.constant dense<0.000000e+00> : vector<9xf32>
    %260 = vector.multi_reduction <add>, %259, %cst_211 [1] : vector<9x32xf32> to vector<9xf32>
    %261 = vector.shape_cast %260 : vector<9xf32> to vector<9x1xf32>
    %cst_212 = arith.constant 3.200000e+01 : f32
    %262 = vector.broadcast %cst_212 : f32 to vector<9x1xf32>
    %263 = arith.divf %261, %262 : vector<9x1xf32>
    %264 = vector.broadcast %256 : vector<9x1xf32> to vector<9x32xf32>
    %265 = arith.subf %250, %264 : vector<9x32xf32>
    %cst_213 = arith.constant 9.99999974E-6 : f32
    %266 = vector.broadcast %cst_213 : f32 to vector<9x1xf32>
    %267 = arith.addf %263, %266 : vector<9x1xf32>
    %268 = math.rsqrt %267 : vector<9x1xf32>
    %269 = vector.broadcast %268 : vector<9x1xf32> to vector<9x32xf32>
    %270 = arith.mulf %265, %269 : vector<9x32xf32>
    %271 = vector.broadcast %251 : vector<1x32xf32> to vector<9x32xf32>
    %272 = arith.mulf %270, %271 : vector<9x32xf32>
    %273 = vector.broadcast %252 : vector<1x32xf32> to vector<9x32xf32>
    %274 = arith.addf %272, %273 : vector<9x32xf32>
    %c0_214 = arith.constant 0 : index
    %c0_215 = arith.constant 0 : index
    %275 = vector.load %arg5[%c0_214, %c0_215] : memref<32x96xf32, #tpu.memory_space<vmem>>, vector<32x96xf32>
    %cst_216 = arith.constant dense<0.000000e+00> : vector<9x96xf32>
    %276 = tpu.matmul %274, %275, %cst_216 {dimension_numbers = #tpu.dot_dimension_numbers<[1], [0], [0], [1], [0, 0, 1, 1], [], []>} : vector<9x32xf32>, vector<32x96xf32>, vector<9x96xf32> -> vector<9x96xf32>
    %c0_217 = arith.constant 0 : index
    %c0_218 = arith.constant 0 : index
    %277 = vector.load %arg6[%c0_217, %c0_218] : memref<1x96xf32, #tpu.memory_space<vmem>>, vector<1x96xf32>
    %278 = vector.broadcast %277 : vector<1x96xf32> to vector<9x96xf32>
    %279 = arith.addf %276, %278 : vector<9x96xf32>
    %280 = vector.extract_strided_slice %279 {offsets = [0, 0], sizes = [9, 8], strides = [1, 1]} : vector<9x96xf32> to vector<9x8xf32>
    %c3_219 = arith.constant 3 : index
    %c0_220 = arith.constant 0 : index
    %c0_221 = arith.constant 0 : index
    %c0_222 = arith.constant 0 : index
    %281 = vector.load %arg7[%c3_219, %c0_220, %c0_221, %c0_222] : memref<4x4x9x8xf32, #tpu.memory_space<vmem>>, vector<1x1x9x8xf32>
    %282 = vector.shape_cast %281 : vector<1x1x9x8xf32> to vector<9x8xf32>
    %283 = vector.shape_cast %280 : vector<9x8xf32> to vector<1x1x9x8xf32>
    tpu.vector_store %arg7[%c3_219, %c0_220, %c0_221, %c0_222], %283 {strides = array<i32>} : memref<4x4x9x8xf32, #tpu.memory_space<vmem>>, vector<1x1x9x8xf32>,
    %284 = vector.extract_strided_slice %279 {offsets = [0, 32], sizes = [9, 8], strides = [1, 1]} : vector<9x96xf32> to vector<9x8xf32>
    %c3_223 = arith.constant 3 : index
    %c0_224 = arith.constant 0 : index
    %c0_225 = arith.constant 0 : index
    %c0_226 = arith.constant 0 : index
    %285 = vector.load %arg8[%c3_223, %c0_224, %c0_225, %c0_226] : memref<4x4x9x8xf32, #tpu.memory_space<vmem>>, vector<1x1x9x8xf32>
    %286 = vector.shape_cast %285 : vector<1x1x9x8xf32> to vector<9x8xf32>
    %287 = vector.shape_cast %284 : vector<9x8xf32> to vector<1x1x9x8xf32>
    tpu.vector_store %arg8[%c3_223, %c0_224, %c0_225, %c0_226], %287 {strides = array<i32>} : memref<4x4x9x8xf32, #tpu.memory_space<vmem>>, vector<1x1x9x8xf32>,
    %288 = vector.extract_strided_slice %279 {offsets = [0, 64], sizes = [9, 8], strides = [1, 1]} : vector<9x96xf32> to vector<9x8xf32>
    %c3_227 = arith.constant 3 : index
    %c0_228 = arith.constant 0 : index
    %c0_229 = arith.constant 0 : index
    %c0_230 = arith.constant 0 : index
    %289 = vector.load %arg9[%c3_227, %c0_228, %c0_229, %c0_230] : memref<4x4x9x8xf32, #tpu.memory_space<vmem>>, vector<1x1x9x8xf32>
    %290 = vector.shape_cast %289 : vector<1x1x9x8xf32> to vector<9x8xf32>
    %291 = vector.shape_cast %288 : vector<9x8xf32> to vector<1x1x9x8xf32>
    tpu.vector_store %arg9[%c3_227, %c0_228, %c0_229, %c0_230], %291 {strides = array<i32>} : memref<4x4x9x8xf32, #tpu.memory_space<vmem>>, vector<1x1x9x8xf32>,
    %292 = vector.extract_strided_slice %279 {offsets = [0, 8], sizes = [9, 8], strides = [1, 1]} : vector<9x96xf32> to vector<9x8xf32>
    %c3_231 = arith.constant 3 : index
    %c1_232 = arith.constant 1 : index
    %c0_233 = arith.constant 0 : index
    %c0_234 = arith.constant 0 : index
    %293 = vector.load %arg7[%c3_231, %c1_232, %c0_233, %c0_234] : memref<4x4x9x8xf32, #tpu.memory_space<vmem>>, vector<1x1x9x8xf32>
    %294 = vector.shape_cast %293 : vector<1x1x9x8xf32> to vector<9x8xf32>
    %295 = vector.shape_cast %292 : vector<9x8xf32> to vector<1x1x9x8xf32>
    tpu.vector_store %arg7[%c3_231, %c1_232, %c0_233, %c0_234], %295 {strides = array<i32>} : memref<4x4x9x8xf32, #tpu.memory_space<vmem>>, vector<1x1x9x8xf32>,
    %296 = vector.extract_strided_slice %279 {offsets = [0, 40], sizes = [9, 8], strides = [1, 1]} : vector<9x96xf32> to vector<9x8xf32>
    %c3_235 = arith.constant 3 : index
    %c1_236 = arith.constant 1 : index
    %c0_237 = arith.constant 0 : index
    %c0_238 = arith.constant 0 : index
    %297 = vector.load %arg8[%c3_235, %c1_236, %c0_237, %c0_238] : memref<4x4x9x8xf32, #tpu.memory_space<vmem>>, vector<1x1x9x8xf32>
    %298 = vector.shape_cast %297 : vector<1x1x9x8xf32> to vector<9x8xf32>
    %299 = vector.shape_cast %296 : vector<9x8xf32> to vector<1x1x9x8xf32>
    tpu.vector_store %arg8[%c3_235, %c1_236, %c0_237, %c0_238], %299 {strides = array<i32>} : memref<4x4x9x8xf32, #tpu.memory_space<vmem>>, vector<1x1x9x8xf32>,
    %300 = vector.extract_strided_slice %279 {offsets = [0, 72], sizes = [9, 8], strides = [1, 1]} : vector<9x96xf32> to vector<9x8xf32>
    %c3_239 = arith.constant 3 : index
    %c1_240 = arith.constant 1 : index
    %c0_241 = arith.constant 0 : index
    %c0_242 = arith.constant 0 : index
    %301 = vector.load %arg9[%c3_239, %c1_240, %c0_241, %c0_242] : memref<4x4x9x8xf32, #tpu.memory_space<vmem>>, vector<1x1x9x8xf32>
    %302 = vector.shape_cast %301 : vector<1x1x9x8xf32> to vector<9x8xf32>
    %303 = vector.shape_cast %300 : vector<9x8xf32> to vector<1x1x9x8xf32>
    tpu.vector_store %arg9[%c3_239, %c1_240, %c0_241, %c0_242], %303 {strides = array<i32>} : memref<4x4x9x8xf32, #tpu.memory_space<vmem>>, vector<1x1x9x8xf32>,
    %304 = vector.extract_strided_slice %279 {offsets = [0, 16], sizes = [9, 8], strides = [1, 1]} : vector<9x96xf32> to vector<9x8xf32>
    %c3_243 = arith.constant 3 : index
    %c2_244 = arith.constant 2 : index
    %c0_245 = arith.constant 0 : index
    %c0_246 = arith.constant 0 : index
    %305 = vector.load %arg7[%c3_243, %c2_244, %c0_245, %c0_246] : memref<4x4x9x8xf32, #tpu.memory_space<vmem>>, vector<1x1x9x8xf32>
    %306 = vector.shape_cast %305 : vector<1x1x9x8xf32> to vector<9x8xf32>
    %307 = vector.shape_cast %304 : vector<9x8xf32> to vector<1x1x9x8xf32>
    tpu.vector_store %arg7[%c3_243, %c2_244, %c0_245, %c0_246], %307 {strides = array<i32>} : memref<4x4x9x8xf32, #tpu.memory_space<vmem>>, vector<1x1x9x8xf32>,
    %308 = vector.extract_strided_slice %279 {offsets = [0, 48], sizes = [9, 8], strides = [1, 1]} : vector<9x96xf32> to vector<9x8xf32>
    %c3_247 = arith.constant 3 : index
    %c2_248 = arith.constant 2 : index
    %c0_249 = arith.constant 0 : index
    %c0_250 = arith.constant 0 : index
    %309 = vector.load %arg8[%c3_247, %c2_248, %c0_249, %c0_250] : memref<4x4x9x8xf32, #tpu.memory_space<vmem>>, vector<1x1x9x8xf32>
    %310 = vector.shape_cast %309 : vector<1x1x9x8xf32> to vector<9x8xf32>
    %311 = vector.shape_cast %308 : vector<9x8xf32> to vector<1x1x9x8xf32>
    tpu.vector_store %arg8[%c3_247, %c2_248, %c0_249, %c0_250], %311 {strides = array<i32>} : memref<4x4x9x8xf32, #tpu.memory_space<vmem>>, vector<1x1x9x8xf32>,
    %312 = vector.extract_strided_slice %279 {offsets = [0, 80], sizes = [9, 8], strides = [1, 1]} : vector<9x96xf32> to vector<9x8xf32>
    %c3_251 = arith.constant 3 : index
    %c2_252 = arith.constant 2 : index
    %c0_253 = arith.constant 0 : index
    %c0_254 = arith.constant 0 : index
    %313 = vector.load %arg9[%c3_251, %c2_252, %c0_253, %c0_254] : memref<4x4x9x8xf32, #tpu.memory_space<vmem>>, vector<1x1x9x8xf32>
    %314 = vector.shape_cast %313 : vector<1x1x9x8xf32> to vector<9x8xf32>
    %315 = vector.shape_cast %312 : vector<9x8xf32> to vector<1x1x9x8xf32>
    tpu.vector_store %arg9[%c3_251, %c2_252, %c0_253, %c0_254], %315 {strides = array<i32>} : memref<4x4x9x8xf32, #tpu.memory_space<vmem>>, vector<1x1x9x8xf32>,
    %316 = vector.extract_strided_slice %279 {offsets = [0, 24], sizes = [9, 8], strides = [1, 1]} : vector<9x96xf32> to vector<9x8xf32>
    %c3_255 = arith.constant 3 : index
    %c3_256 = arith.constant 3 : index
    %c0_257 = arith.constant 0 : index
    %c0_258 = arith.constant 0 : index
    %317 = vector.load %arg7[%c3_255, %c3_256, %c0_257, %c0_258] : memref<4x4x9x8xf32, #tpu.memory_space<vmem>>, vector<1x1x9x8xf32>
    %318 = vector.shape_cast %317 : vector<1x1x9x8xf32> to vector<9x8xf32>
    %319 = vector.shape_cast %316 : vector<9x8xf32> to vector<1x1x9x8xf32>
    tpu.vector_store %arg7[%c3_255, %c3_256, %c0_257, %c0_258], %319 {strides = array<i32>} : memref<4x4x9x8xf32, #tpu.memory_space<vmem>>, vector<1x1x9x8xf32>,
    %320 = vector.extract_strided_slice %279 {offsets = [0, 56], sizes = [9, 8], strides = [1, 1]} : vector<9x96xf32> to vector<9x8xf32>
    %c3_259 = arith.constant 3 : index
    %c3_260 = arith.constant 3 : index
    %c0_261 = arith.constant 0 : index
    %c0_262 = arith.constant 0 : index
    %321 = vector.load %arg8[%c3_259, %c3_260, %c0_261, %c0_262] : memref<4x4x9x8xf32, #tpu.memory_space<vmem>>, vector<1x1x9x8xf32>
    %322 = vector.shape_cast %321 : vector<1x1x9x8xf32> to vector<9x8xf32>
    %323 = vector.shape_cast %320 : vector<9x8xf32> to vector<1x1x9x8xf32>
    tpu.vector_store %arg8[%c3_259, %c3_260, %c0_261, %c0_262], %323 {strides = array<i32>} : memref<4x4x9x8xf32, #tpu.memory_space<vmem>>, vector<1x1x9x8xf32>,
    %324 = vector.extract_strided_slice %279 {offsets = [0, 88], sizes = [9, 8], strides = [1, 1]} : vector<9x96xf32> to vector<9x8xf32>
    %c3_263 = arith.constant 3 : index
    %c3_264 = arith.constant 3 : index
    %c0_265 = arith.constant 0 : index
    %c0_266 = arith.constant 0 : index
    %325 = vector.load %arg9[%c3_263, %c3_264, %c0_265, %c0_266] : memref<4x4x9x8xf32, #tpu.memory_space<vmem>>, vector<1x1x9x8xf32>
    %326 = vector.shape_cast %325 : vector<1x1x9x8xf32> to vector<9x8xf32>
    %327 = vector.shape_cast %324 : vector<9x8xf32> to vector<1x1x9x8xf32>
    tpu.vector_store %arg9[%c3_263, %c3_264, %c0_265, %c0_266], %327 {strides = array<i32>} : memref<4x4x9x8xf32, #tpu.memory_space<vmem>>, vector<1x1x9x8xf32>,
    return
  }
  func.func @transform_0(%arg0: i32) -> (i32, i32, i32) {
    %c0_i32 = arith.constant 0 : i32
    %c0_i32_0 = arith.constant 0 : i32
    %c0_i32_1 = arith.constant 0 : i32
    return %arg0, %c0_i32, %c0_i32_0 : i32, i32, i32
  }
  func.func @transform_1(%arg0: i32) -> (i32, i32, i32) {
    %c0_i32 = arith.constant 0 : i32
    %c0_i32_0 = arith.constant 0 : i32
    %c0_i32_1 = arith.constant 0 : i32
    return %arg0, %c0_i32, %c0_i32_0 : i32, i32, i32
  }
  func.func @transform_2(%arg0: i32) -> (i32, i32) {
    %c0_i32 = arith.constant 0 : i32
    %c0_i32_0 = arith.constant 0 : i32
    %c0_i32_1 = arith.constant 0 : i32
    return %c0_i32, %c0_i32_0 : i32, i32
  }
  func.func @transform_3(%arg0: i32) -> (i32, i32) {
    %c0_i32 = arith.constant 0 : i32
    %c0_i32_0 = arith.constant 0 : i32
    %c0_i32_1 = arith.constant 0 : i32
    return %c0_i32, %c0_i32_0 : i32, i32
  }
  func.func @transform_4(%arg0: i32) -> (i32, i32) {
    %c0_i32 = arith.constant 0 : i32
    %c0_i32_0 = arith.constant 0 : i32
    %c0_i32_1 = arith.constant 0 : i32
    return %c0_i32, %c0_i32_0 : i32, i32
  }
  func.func @transform_5(%arg0: i32) -> (i32, i32) {
    %c0_i32 = arith.constant 0 : i32
    %c0_i32_0 = arith.constant 0 : i32
    %c0_i32_1 = arith.constant 0 : i32
    return %c0_i32, %c0_i32_0 : i32, i32
  }
  func.func @transform_6(%arg0: i32) -> (i32, i32, i32, i32) {
    %c0_i32 = arith.constant 0 : i32
    %c0_i32_0 = arith.constant 0 : i32
    %c0_i32_1 = arith.constant 0 : i32
    %c0_i32_2 = arith.constant 0 : i32
    return %arg0, %c0_i32, %c0_i32_0, %c0_i32_1 : i32, i32, i32, i32
  }
  func.func @transform_7(%arg0: i32) -> (i32, i32, i32, i32) {
    %c0_i32 = arith.constant 0 : i32
    %c0_i32_0 = arith.constant 0 : i32
    %c0_i32_1 = arith.constant 0 : i32
    %c0_i32_2 = arith.constant 0 : i32
    return %arg0, %c0_i32, %c0_i32_0, %c0_i32_1 : i32, i32, i32, i32
  }
  func.func @transform_8(%arg0: i32) -> (i32, i32, i32, i32) {
    %c0_i32 = arith.constant 0 : i32
    %c0_i32_0 = arith.constant 0 : i32
    %c0_i32_1 = arith.constant 0 : i32
    %c0_i32_2 = arith.constant 0 : i32
    return %arg0, %c0_i32, %c0_i32_0, %c0_i32_1 : i32, i32, i32, i32
  }
}

module attributes {stable_mosaic.version = 11 : i64} {
  func.func @_outproj_res_kernel(%arg0: i32, %arg1: memref<4x4x9x8xf32, #tpu.memory_space<vmem>>, %arg2: memref<4x8x32xf32, #tpu.memory_space<vmem>>, %arg3: memref<4x8x32xf32, #tpu.memory_space<vmem>>, %arg4: memref<1x32xf32, #tpu.memory_space<vmem>>, %arg5: memref<4x8x32xf32, #tpu.memory_space<vmem>>) attributes {dimension_semantics = [#tpu.dimension_semantics<parallel>], iteration_bounds = array<i64: 2>, scalar_prefetch = 0 : i64, scratch_operands = 0 : i64, tpu.core_type = #tpu.core_type<tc>, window_params = [{transform_indices = @transform_0, window_bounds = array<i64: 4, 4, 9, 8>}, {transform_indices = @transform_1, window_bounds = array<i64: 4, 8, 32>}, {pipeline_mode = #tpu.pipeline_mode<synchronous>, transform_indices = @transform_2, window_bounds = array<i64: 4, 8, 32>}, {pipeline_mode = #tpu.pipeline_mode<synchronous>, transform_indices = @transform_3, window_bounds = array<i64: 1, 32>}, {transform_indices = @transform_4, window_bounds = array<i64: 4, 8, 32>}]} {
    %cst = arith.constant 0.000000e+00 : f32
    %0 = vector.broadcast %cst : f32 to vector<8x32xf32>
    %c0 = arith.constant 0 : index
    %c0_0 = arith.constant 0 : index
    %c0_1 = arith.constant 0 : index
    %c0_2 = arith.constant 0 : index
    %1 = vector.load %arg1[%c0, %c0_0, %c0_1, %c0_2] : memref<4x4x9x8xf32, #tpu.memory_space<vmem>>, vector<1x1x8x8xf32>
    %2 = vector.shape_cast %1 : vector<1x1x8x8xf32> to vector<8x8xf32>
    %c0_3 = arith.constant 0 : index
    %c0_4 = arith.constant 0 : index
    %c0_5 = arith.constant 0 : index
    %3 = vector.load %arg3[%c0_3, %c0_4, %c0_5] : memref<4x8x32xf32, #tpu.memory_space<vmem>>, vector<1x8x32xf32>
    %4 = vector.shape_cast %3 : vector<1x8x32xf32> to vector<8x32xf32>
    %cst_6 = arith.constant dense<0.000000e+00> : vector<8x32xf32>
    %5 = tpu.matmul %2, %4, %cst_6 {dimension_numbers = #tpu.dot_dimension_numbers<[1], [0], [0], [1], [0, 0, 1, 1], [], []>} : vector<8x8xf32>, vector<8x32xf32>, vector<8x32xf32> -> vector<8x32xf32>
    %6 = arith.addf %0, %5 : vector<8x32xf32>
    %c0_7 = arith.constant 0 : index
    %c1 = arith.constant 1 : index
    %c0_8 = arith.constant 0 : index
    %c0_9 = arith.constant 0 : index
    %7 = vector.load %arg1[%c0_7, %c1, %c0_8, %c0_9] : memref<4x4x9x8xf32, #tpu.memory_space<vmem>>, vector<1x1x8x8xf32>
    %8 = vector.shape_cast %7 : vector<1x1x8x8xf32> to vector<8x8xf32>
    %c1_10 = arith.constant 1 : index
    %c0_11 = arith.constant 0 : index
    %c0_12 = arith.constant 0 : index
    %9 = vector.load %arg3[%c1_10, %c0_11, %c0_12] : memref<4x8x32xf32, #tpu.memory_space<vmem>>, vector<1x8x32xf32>
    %10 = vector.shape_cast %9 : vector<1x8x32xf32> to vector<8x32xf32>
    %cst_13 = arith.constant dense<0.000000e+00> : vector<8x32xf32>
    %11 = tpu.matmul %8, %10, %cst_13 {dimension_numbers = #tpu.dot_dimension_numbers<[1], [0], [0], [1], [0, 0, 1, 1], [], []>} : vector<8x8xf32>, vector<8x32xf32>, vector<8x32xf32> -> vector<8x32xf32>
    %12 = arith.addf %6, %11 : vector<8x32xf32>
    %c0_14 = arith.constant 0 : index
    %c2 = arith.constant 2 : index
    %c0_15 = arith.constant 0 : index
    %c0_16 = arith.constant 0 : index
    %13 = vector.load %arg1[%c0_14, %c2, %c0_15, %c0_16] : memref<4x4x9x8xf32, #tpu.memory_space<vmem>>, vector<1x1x8x8xf32>
    %14 = vector.shape_cast %13 : vector<1x1x8x8xf32> to vector<8x8xf32>
    %c2_17 = arith.constant 2 : index
    %c0_18 = arith.constant 0 : index
    %c0_19 = arith.constant 0 : index
    %15 = vector.load %arg3[%c2_17, %c0_18, %c0_19] : memref<4x8x32xf32, #tpu.memory_space<vmem>>, vector<1x8x32xf32>
    %16 = vector.shape_cast %15 : vector<1x8x32xf32> to vector<8x32xf32>
    %cst_20 = arith.constant dense<0.000000e+00> : vector<8x32xf32>
    %17 = tpu.matmul %14, %16, %cst_20 {dimension_numbers = #tpu.dot_dimension_numbers<[1], [0], [0], [1], [0, 0, 1, 1], [], []>} : vector<8x8xf32>, vector<8x32xf32>, vector<8x32xf32> -> vector<8x32xf32>
    %18 = arith.addf %12, %17 : vector<8x32xf32>
    %c0_21 = arith.constant 0 : index
    %c3 = arith.constant 3 : index
    %c0_22 = arith.constant 0 : index
    %c0_23 = arith.constant 0 : index
    %19 = vector.load %arg1[%c0_21, %c3, %c0_22, %c0_23] : memref<4x4x9x8xf32, #tpu.memory_space<vmem>>, vector<1x1x8x8xf32>
    %20 = vector.shape_cast %19 : vector<1x1x8x8xf32> to vector<8x8xf32>
    %c3_24 = arith.constant 3 : index
    %c0_25 = arith.constant 0 : index
    %c0_26 = arith.constant 0 : index
    %21 = vector.load %arg3[%c3_24, %c0_25, %c0_26] : memref<4x8x32xf32, #tpu.memory_space<vmem>>, vector<1x8x32xf32>
    %22 = vector.shape_cast %21 : vector<1x8x32xf32> to vector<8x32xf32>
    %cst_27 = arith.constant dense<0.000000e+00> : vector<8x32xf32>
    %23 = tpu.matmul %20, %22, %cst_27 {dimension_numbers = #tpu.dot_dimension_numbers<[1], [0], [0], [1], [0, 0, 1, 1], [], []>} : vector<8x8xf32>, vector<8x32xf32>, vector<8x32xf32> -> vector<8x32xf32>
    %24 = arith.addf %18, %23 : vector<8x32xf32>
    %c0_28 = arith.constant 0 : index
    %c0_29 = arith.constant 0 : index
    %c0_30 = arith.constant 0 : index
    %25 = vector.load %arg2[%c0_28, %c0_29, %c0_30] : memref<4x8x32xf32, #tpu.memory_space<vmem>>, vector<1x8x32xf32>
    %26 = vector.shape_cast %25 : vector<1x8x32xf32> to vector<8x32xf32>
    %27 = arith.addf %26, %24 : vector<8x32xf32>
    %c0_31 = arith.constant 0 : index
    %c0_32 = arith.constant 0 : index
    %28 = vector.load %arg4[%c0_31, %c0_32] : memref<1x32xf32, #tpu.memory_space<vmem>>, vector<1x32xf32>
    %29 = vector.broadcast %28 : vector<1x32xf32> to vector<8x32xf32>
    %30 = arith.addf %27, %29 : vector<8x32xf32>
    %c0_33 = arith.constant 0 : index
    %c0_34 = arith.constant 0 : index
    %c0_35 = arith.constant 0 : index
    %31 = vector.load %arg5[%c0_33, %c0_34, %c0_35] : memref<4x8x32xf32, #tpu.memory_space<vmem>>, vector<1x8x32xf32>
    %32 = vector.shape_cast %31 : vector<1x8x32xf32> to vector<8x32xf32>
    %33 = vector.shape_cast %30 : vector<8x32xf32> to vector<1x8x32xf32>
    tpu.vector_store %arg5[%c0_33, %c0_34, %c0_35], %33 {strides = array<i32>} : memref<4x8x32xf32, #tpu.memory_space<vmem>>, vector<1x8x32xf32>,
    %cst_36 = arith.constant 0.000000e+00 : f32
    %34 = vector.broadcast %cst_36 : f32 to vector<8x32xf32>
    %c1_37 = arith.constant 1 : index
    %c0_38 = arith.constant 0 : index
    %c0_39 = arith.constant 0 : index
    %c0_40 = arith.constant 0 : index
    %35 = vector.load %arg1[%c1_37, %c0_38, %c0_39, %c0_40] : memref<4x4x9x8xf32, #tpu.memory_space<vmem>>, vector<1x1x8x8xf32>
    %36 = vector.shape_cast %35 : vector<1x1x8x8xf32> to vector<8x8xf32>
    %c0_41 = arith.constant 0 : index
    %c0_42 = arith.constant 0 : index
    %c0_43 = arith.constant 0 : index
    %37 = vector.load %arg3[%c0_41, %c0_42, %c0_43] : memref<4x8x32xf32, #tpu.memory_space<vmem>>, vector<1x8x32xf32>
    %38 = vector.shape_cast %37 : vector<1x8x32xf32> to vector<8x32xf32>
    %cst_44 = arith.constant dense<0.000000e+00> : vector<8x32xf32>
    %39 = tpu.matmul %36, %38, %cst_44 {dimension_numbers = #tpu.dot_dimension_numbers<[1], [0], [0], [1], [0, 0, 1, 1], [], []>} : vector<8x8xf32>, vector<8x32xf32>, vector<8x32xf32> -> vector<8x32xf32>
    %40 = arith.addf %34, %39 : vector<8x32xf32>
    %c1_45 = arith.constant 1 : index
    %c1_46 = arith.constant 1 : index
    %c0_47 = arith.constant 0 : index
    %c0_48 = arith.constant 0 : index
    %41 = vector.load %arg1[%c1_45, %c1_46, %c0_47, %c0_48] : memref<4x4x9x8xf32, #tpu.memory_space<vmem>>, vector<1x1x8x8xf32>
    %42 = vector.shape_cast %41 : vector<1x1x8x8xf32> to vector<8x8xf32>
    %c1_49 = arith.constant 1 : index
    %c0_50 = arith.constant 0 : index
    %c0_51 = arith.constant 0 : index
    %43 = vector.load %arg3[%c1_49, %c0_50, %c0_51] : memref<4x8x32xf32, #tpu.memory_space<vmem>>, vector<1x8x32xf32>
    %44 = vector.shape_cast %43 : vector<1x8x32xf32> to vector<8x32xf32>
    %cst_52 = arith.constant dense<0.000000e+00> : vector<8x32xf32>
    %45 = tpu.matmul %42, %44, %cst_52 {dimension_numbers = #tpu.dot_dimension_numbers<[1], [0], [0], [1], [0, 0, 1, 1], [], []>} : vector<8x8xf32>, vector<8x32xf32>, vector<8x32xf32> -> vector<8x32xf32>
    %46 = arith.addf %40, %45 : vector<8x32xf32>
    %c1_53 = arith.constant 1 : index
    %c2_54 = arith.constant 2 : index
    %c0_55 = arith.constant 0 : index
    %c0_56 = arith.constant 0 : index
    %47 = vector.load %arg1[%c1_53, %c2_54, %c0_55, %c0_56] : memref<4x4x9x8xf32, #tpu.memory_space<vmem>>, vector<1x1x8x8xf32>
    %48 = vector.shape_cast %47 : vector<1x1x8x8xf32> to vector<8x8xf32>
    %c2_57 = arith.constant 2 : index
    %c0_58 = arith.constant 0 : index
    %c0_59 = arith.constant 0 : index
    %49 = vector.load %arg3[%c2_57, %c0_58, %c0_59] : memref<4x8x32xf32, #tpu.memory_space<vmem>>, vector<1x8x32xf32>
    %50 = vector.shape_cast %49 : vector<1x8x32xf32> to vector<8x32xf32>
    %cst_60 = arith.constant dense<0.000000e+00> : vector<8x32xf32>
    %51 = tpu.matmul %48, %50, %cst_60 {dimension_numbers = #tpu.dot_dimension_numbers<[1], [0], [0], [1], [0, 0, 1, 1], [], []>} : vector<8x8xf32>, vector<8x32xf32>, vector<8x32xf32> -> vector<8x32xf32>
    %52 = arith.addf %46, %51 : vector<8x32xf32>
    %c1_61 = arith.constant 1 : index
    %c3_62 = arith.constant 3 : index
    %c0_63 = arith.constant 0 : index
    %c0_64 = arith.constant 0 : index
    %53 = vector.load %arg1[%c1_61, %c3_62, %c0_63, %c0_64] : memref<4x4x9x8xf32, #tpu.memory_space<vmem>>, vector<1x1x8x8xf32>
    %54 = vector.shape_cast %53 : vector<1x1x8x8xf32> to vector<8x8xf32>
    %c3_65 = arith.constant 3 : index
    %c0_66 = arith.constant 0 : index
    %c0_67 = arith.constant 0 : index
    %55 = vector.load %arg3[%c3_65, %c0_66, %c0_67] : memref<4x8x32xf32, #tpu.memory_space<vmem>>, vector<1x8x32xf32>
    %56 = vector.shape_cast %55 : vector<1x8x32xf32> to vector<8x32xf32>
    %cst_68 = arith.constant dense<0.000000e+00> : vector<8x32xf32>
    %57 = tpu.matmul %54, %56, %cst_68 {dimension_numbers = #tpu.dot_dimension_numbers<[1], [0], [0], [1], [0, 0, 1, 1], [], []>} : vector<8x8xf32>, vector<8x32xf32>, vector<8x32xf32> -> vector<8x32xf32>
    %58 = arith.addf %52, %57 : vector<8x32xf32>
    %c1_69 = arith.constant 1 : index
    %c0_70 = arith.constant 0 : index
    %c0_71 = arith.constant 0 : index
    %59 = vector.load %arg2[%c1_69, %c0_70, %c0_71] : memref<4x8x32xf32, #tpu.memory_space<vmem>>, vector<1x8x32xf32>
    %60 = vector.shape_cast %59 : vector<1x8x32xf32> to vector<8x32xf32>
    %61 = arith.addf %60, %58 : vector<8x32xf32>
    %c0_72 = arith.constant 0 : index
    %c0_73 = arith.constant 0 : index
    %62 = vector.load %arg4[%c0_72, %c0_73] : memref<1x32xf32, #tpu.memory_space<vmem>>, vector<1x32xf32>
    %63 = vector.broadcast %62 : vector<1x32xf32> to vector<8x32xf32>
    %64 = arith.addf %61, %63 : vector<8x32xf32>
    %c1_74 = arith.constant 1 : index
    %c0_75 = arith.constant 0 : index
    %c0_76 = arith.constant 0 : index
    %65 = vector.load %arg5[%c1_74, %c0_75, %c0_76] : memref<4x8x32xf32, #tpu.memory_space<vmem>>, vector<1x8x32xf32>
    %66 = vector.shape_cast %65 : vector<1x8x32xf32> to vector<8x32xf32>
    %67 = vector.shape_cast %64 : vector<8x32xf32> to vector<1x8x32xf32>
    tpu.vector_store %arg5[%c1_74, %c0_75, %c0_76], %67 {strides = array<i32>} : memref<4x8x32xf32, #tpu.memory_space<vmem>>, vector<1x8x32xf32>,
    %cst_77 = arith.constant 0.000000e+00 : f32
    %68 = vector.broadcast %cst_77 : f32 to vector<8x32xf32>
    %c2_78 = arith.constant 2 : index
    %c0_79 = arith.constant 0 : index
    %c0_80 = arith.constant 0 : index
    %c0_81 = arith.constant 0 : index
    %69 = vector.load %arg1[%c2_78, %c0_79, %c0_80, %c0_81] : memref<4x4x9x8xf32, #tpu.memory_space<vmem>>, vector<1x1x8x8xf32>
    %70 = vector.shape_cast %69 : vector<1x1x8x8xf32> to vector<8x8xf32>
    %c0_82 = arith.constant 0 : index
    %c0_83 = arith.constant 0 : index
    %c0_84 = arith.constant 0 : index
    %71 = vector.load %arg3[%c0_82, %c0_83, %c0_84] : memref<4x8x32xf32, #tpu.memory_space<vmem>>, vector<1x8x32xf32>
    %72 = vector.shape_cast %71 : vector<1x8x32xf32> to vector<8x32xf32>
    %cst_85 = arith.constant dense<0.000000e+00> : vector<8x32xf32>
    %73 = tpu.matmul %70, %72, %cst_85 {dimension_numbers = #tpu.dot_dimension_numbers<[1], [0], [0], [1], [0, 0, 1, 1], [], []>} : vector<8x8xf32>, vector<8x32xf32>, vector<8x32xf32> -> vector<8x32xf32>
    %74 = arith.addf %68, %73 : vector<8x32xf32>
    %c2_86 = arith.constant 2 : index
    %c1_87 = arith.constant 1 : index
    %c0_88 = arith.constant 0 : index
    %c0_89 = arith.constant 0 : index
    %75 = vector.load %arg1[%c2_86, %c1_87, %c0_88, %c0_89] : memref<4x4x9x8xf32, #tpu.memory_space<vmem>>, vector<1x1x8x8xf32>
    %76 = vector.shape_cast %75 : vector<1x1x8x8xf32> to vector<8x8xf32>
    %c1_90 = arith.constant 1 : index
    %c0_91 = arith.constant 0 : index
    %c0_92 = arith.constant 0 : index
    %77 = vector.load %arg3[%c1_90, %c0_91, %c0_92] : memref<4x8x32xf32, #tpu.memory_space<vmem>>, vector<1x8x32xf32>
    %78 = vector.shape_cast %77 : vector<1x8x32xf32> to vector<8x32xf32>
    %cst_93 = arith.constant dense<0.000000e+00> : vector<8x32xf32>
    %79 = tpu.matmul %76, %78, %cst_93 {dimension_numbers = #tpu.dot_dimension_numbers<[1], [0], [0], [1], [0, 0, 1, 1], [], []>} : vector<8x8xf32>, vector<8x32xf32>, vector<8x32xf32> -> vector<8x32xf32>
    %80 = arith.addf %74, %79 : vector<8x32xf32>
    %c2_94 = arith.constant 2 : index
    %c2_95 = arith.constant 2 : index
    %c0_96 = arith.constant 0 : index
    %c0_97 = arith.constant 0 : index
    %81 = vector.load %arg1[%c2_94, %c2_95, %c0_96, %c0_97] : memref<4x4x9x8xf32, #tpu.memory_space<vmem>>, vector<1x1x8x8xf32>
    %82 = vector.shape_cast %81 : vector<1x1x8x8xf32> to vector<8x8xf32>
    %c2_98 = arith.constant 2 : index
    %c0_99 = arith.constant 0 : index
    %c0_100 = arith.constant 0 : index
    %83 = vector.load %arg3[%c2_98, %c0_99, %c0_100] : memref<4x8x32xf32, #tpu.memory_space<vmem>>, vector<1x8x32xf32>
    %84 = vector.shape_cast %83 : vector<1x8x32xf32> to vector<8x32xf32>
    %cst_101 = arith.constant dense<0.000000e+00> : vector<8x32xf32>
    %85 = tpu.matmul %82, %84, %cst_101 {dimension_numbers = #tpu.dot_dimension_numbers<[1], [0], [0], [1], [0, 0, 1, 1], [], []>} : vector<8x8xf32>, vector<8x32xf32>, vector<8x32xf32> -> vector<8x32xf32>
    %86 = arith.addf %80, %85 : vector<8x32xf32>
    %c2_102 = arith.constant 2 : index
    %c3_103 = arith.constant 3 : index
    %c0_104 = arith.constant 0 : index
    %c0_105 = arith.constant 0 : index
    %87 = vector.load %arg1[%c2_102, %c3_103, %c0_104, %c0_105] : memref<4x4x9x8xf32, #tpu.memory_space<vmem>>, vector<1x1x8x8xf32>
    %88 = vector.shape_cast %87 : vector<1x1x8x8xf32> to vector<8x8xf32>
    %c3_106 = arith.constant 3 : index
    %c0_107 = arith.constant 0 : index
    %c0_108 = arith.constant 0 : index
    %89 = vector.load %arg3[%c3_106, %c0_107, %c0_108] : memref<4x8x32xf32, #tpu.memory_space<vmem>>, vector<1x8x32xf32>
    %90 = vector.shape_cast %89 : vector<1x8x32xf32> to vector<8x32xf32>
    %cst_109 = arith.constant dense<0.000000e+00> : vector<8x32xf32>
    %91 = tpu.matmul %88, %90, %cst_109 {dimension_numbers = #tpu.dot_dimension_numbers<[1], [0], [0], [1], [0, 0, 1, 1], [], []>} : vector<8x8xf32>, vector<8x32xf32>, vector<8x32xf32> -> vector<8x32xf32>
    %92 = arith.addf %86, %91 : vector<8x32xf32>
    %c2_110 = arith.constant 2 : index
    %c0_111 = arith.constant 0 : index
    %c0_112 = arith.constant 0 : index
    %93 = vector.load %arg2[%c2_110, %c0_111, %c0_112] : memref<4x8x32xf32, #tpu.memory_space<vmem>>, vector<1x8x32xf32>
    %94 = vector.shape_cast %93 : vector<1x8x32xf32> to vector<8x32xf32>
    %95 = arith.addf %94, %92 : vector<8x32xf32>
    %c0_113 = arith.constant 0 : index
    %c0_114 = arith.constant 0 : index
    %96 = vector.load %arg4[%c0_113, %c0_114] : memref<1x32xf32, #tpu.memory_space<vmem>>, vector<1x32xf32>
    %97 = vector.broadcast %96 : vector<1x32xf32> to vector<8x32xf32>
    %98 = arith.addf %95, %97 : vector<8x32xf32>
    %c2_115 = arith.constant 2 : index
    %c0_116 = arith.constant 0 : index
    %c0_117 = arith.constant 0 : index
    %99 = vector.load %arg5[%c2_115, %c0_116, %c0_117] : memref<4x8x32xf32, #tpu.memory_space<vmem>>, vector<1x8x32xf32>
    %100 = vector.shape_cast %99 : vector<1x8x32xf32> to vector<8x32xf32>
    %101 = vector.shape_cast %98 : vector<8x32xf32> to vector<1x8x32xf32>
    tpu.vector_store %arg5[%c2_115, %c0_116, %c0_117], %101 {strides = array<i32>} : memref<4x8x32xf32, #tpu.memory_space<vmem>>, vector<1x8x32xf32>,
    %cst_118 = arith.constant 0.000000e+00 : f32
    %102 = vector.broadcast %cst_118 : f32 to vector<8x32xf32>
    %c3_119 = arith.constant 3 : index
    %c0_120 = arith.constant 0 : index
    %c0_121 = arith.constant 0 : index
    %c0_122 = arith.constant 0 : index
    %103 = vector.load %arg1[%c3_119, %c0_120, %c0_121, %c0_122] : memref<4x4x9x8xf32, #tpu.memory_space<vmem>>, vector<1x1x8x8xf32>
    %104 = vector.shape_cast %103 : vector<1x1x8x8xf32> to vector<8x8xf32>
    %c0_123 = arith.constant 0 : index
    %c0_124 = arith.constant 0 : index
    %c0_125 = arith.constant 0 : index
    %105 = vector.load %arg3[%c0_123, %c0_124, %c0_125] : memref<4x8x32xf32, #tpu.memory_space<vmem>>, vector<1x8x32xf32>
    %106 = vector.shape_cast %105 : vector<1x8x32xf32> to vector<8x32xf32>
    %cst_126 = arith.constant dense<0.000000e+00> : vector<8x32xf32>
    %107 = tpu.matmul %104, %106, %cst_126 {dimension_numbers = #tpu.dot_dimension_numbers<[1], [0], [0], [1], [0, 0, 1, 1], [], []>} : vector<8x8xf32>, vector<8x32xf32>, vector<8x32xf32> -> vector<8x32xf32>
    %108 = arith.addf %102, %107 : vector<8x32xf32>
    %c3_127 = arith.constant 3 : index
    %c1_128 = arith.constant 1 : index
    %c0_129 = arith.constant 0 : index
    %c0_130 = arith.constant 0 : index
    %109 = vector.load %arg1[%c3_127, %c1_128, %c0_129, %c0_130] : memref<4x4x9x8xf32, #tpu.memory_space<vmem>>, vector<1x1x8x8xf32>
    %110 = vector.shape_cast %109 : vector<1x1x8x8xf32> to vector<8x8xf32>
    %c1_131 = arith.constant 1 : index
    %c0_132 = arith.constant 0 : index
    %c0_133 = arith.constant 0 : index
    %111 = vector.load %arg3[%c1_131, %c0_132, %c0_133] : memref<4x8x32xf32, #tpu.memory_space<vmem>>, vector<1x8x32xf32>
    %112 = vector.shape_cast %111 : vector<1x8x32xf32> to vector<8x32xf32>
    %cst_134 = arith.constant dense<0.000000e+00> : vector<8x32xf32>
    %113 = tpu.matmul %110, %112, %cst_134 {dimension_numbers = #tpu.dot_dimension_numbers<[1], [0], [0], [1], [0, 0, 1, 1], [], []>} : vector<8x8xf32>, vector<8x32xf32>, vector<8x32xf32> -> vector<8x32xf32>
    %114 = arith.addf %108, %113 : vector<8x32xf32>
    %c3_135 = arith.constant 3 : index
    %c2_136 = arith.constant 2 : index
    %c0_137 = arith.constant 0 : index
    %c0_138 = arith.constant 0 : index
    %115 = vector.load %arg1[%c3_135, %c2_136, %c0_137, %c0_138] : memref<4x4x9x8xf32, #tpu.memory_space<vmem>>, vector<1x1x8x8xf32>
    %116 = vector.shape_cast %115 : vector<1x1x8x8xf32> to vector<8x8xf32>
    %c2_139 = arith.constant 2 : index
    %c0_140 = arith.constant 0 : index
    %c0_141 = arith.constant 0 : index
    %117 = vector.load %arg3[%c2_139, %c0_140, %c0_141] : memref<4x8x32xf32, #tpu.memory_space<vmem>>, vector<1x8x32xf32>
    %118 = vector.shape_cast %117 : vector<1x8x32xf32> to vector<8x32xf32>
    %cst_142 = arith.constant dense<0.000000e+00> : vector<8x32xf32>
    %119 = tpu.matmul %116, %118, %cst_142 {dimension_numbers = #tpu.dot_dimension_numbers<[1], [0], [0], [1], [0, 0, 1, 1], [], []>} : vector<8x8xf32>, vector<8x32xf32>, vector<8x32xf32> -> vector<8x32xf32>
    %120 = arith.addf %114, %119 : vector<8x32xf32>
    %c3_143 = arith.constant 3 : index
    %c3_144 = arith.constant 3 : index
    %c0_145 = arith.constant 0 : index
    %c0_146 = arith.constant 0 : index
    %121 = vector.load %arg1[%c3_143, %c3_144, %c0_145, %c0_146] : memref<4x4x9x8xf32, #tpu.memory_space<vmem>>, vector<1x1x8x8xf32>
    %122 = vector.shape_cast %121 : vector<1x1x8x8xf32> to vector<8x8xf32>
    %c3_147 = arith.constant 3 : index
    %c0_148 = arith.constant 0 : index
    %c0_149 = arith.constant 0 : index
    %123 = vector.load %arg3[%c3_147, %c0_148, %c0_149] : memref<4x8x32xf32, #tpu.memory_space<vmem>>, vector<1x8x32xf32>
    %124 = vector.shape_cast %123 : vector<1x8x32xf32> to vector<8x32xf32>
    %cst_150 = arith.constant dense<0.000000e+00> : vector<8x32xf32>
    %125 = tpu.matmul %122, %124, %cst_150 {dimension_numbers = #tpu.dot_dimension_numbers<[1], [0], [0], [1], [0, 0, 1, 1], [], []>} : vector<8x8xf32>, vector<8x32xf32>, vector<8x32xf32> -> vector<8x32xf32>
    %126 = arith.addf %120, %125 : vector<8x32xf32>
    %c3_151 = arith.constant 3 : index
    %c0_152 = arith.constant 0 : index
    %c0_153 = arith.constant 0 : index
    %127 = vector.load %arg2[%c3_151, %c0_152, %c0_153] : memref<4x8x32xf32, #tpu.memory_space<vmem>>, vector<1x8x32xf32>
    %128 = vector.shape_cast %127 : vector<1x8x32xf32> to vector<8x32xf32>
    %129 = arith.addf %128, %126 : vector<8x32xf32>
    %c0_154 = arith.constant 0 : index
    %c0_155 = arith.constant 0 : index
    %130 = vector.load %arg4[%c0_154, %c0_155] : memref<1x32xf32, #tpu.memory_space<vmem>>, vector<1x32xf32>
    %131 = vector.broadcast %130 : vector<1x32xf32> to vector<8x32xf32>
    %132 = arith.addf %129, %131 : vector<8x32xf32>
    %c3_156 = arith.constant 3 : index
    %c0_157 = arith.constant 0 : index
    %c0_158 = arith.constant 0 : index
    %133 = vector.load %arg5[%c3_156, %c0_157, %c0_158] : memref<4x8x32xf32, #tpu.memory_space<vmem>>, vector<1x8x32xf32>
    %134 = vector.shape_cast %133 : vector<1x8x32xf32> to vector<8x32xf32>
    %135 = vector.shape_cast %132 : vector<8x32xf32> to vector<1x8x32xf32>
    tpu.vector_store %arg5[%c3_156, %c0_157, %c0_158], %135 {strides = array<i32>} : memref<4x8x32xf32, #tpu.memory_space<vmem>>, vector<1x8x32xf32>,
    return
  }
  func.func @transform_0(%arg0: i32) -> (i32, i32, i32, i32) {
    %c0_i32 = arith.constant 0 : i32
    %c0_i32_0 = arith.constant 0 : i32
    %c0_i32_1 = arith.constant 0 : i32
    %c0_i32_2 = arith.constant 0 : i32
    return %arg0, %c0_i32, %c0_i32_0, %c0_i32_1 : i32, i32, i32, i32
  }
  func.func @transform_1(%arg0: i32) -> (i32, i32, i32) {
    %c0_i32 = arith.constant 0 : i32
    %c0_i32_0 = arith.constant 0 : i32
    %c0_i32_1 = arith.constant 0 : i32
    return %arg0, %c0_i32, %c0_i32_0 : i32, i32, i32
  }
  func.func @transform_2(%arg0: i32) -> (i32, i32, i32) {
    %c0_i32 = arith.constant 0 : i32
    %c0_i32_0 = arith.constant 0 : i32
    %c0_i32_1 = arith.constant 0 : i32
    %c0_i32_2 = arith.constant 0 : i32
    return %c0_i32, %c0_i32_0, %c0_i32_1 : i32, i32, i32
  }
  func.func @transform_3(%arg0: i32) -> (i32, i32) {
    %c0_i32 = arith.constant 0 : i32
    %c0_i32_0 = arith.constant 0 : i32
    %c0_i32_1 = arith.constant 0 : i32
    return %c0_i32, %c0_i32_0 : i32, i32
  }
  func.func @transform_4(%arg0: i32) -> (i32, i32, i32) {
    %c0_i32 = arith.constant 0 : i32
    %c0_i32_0 = arith.constant 0 : i32
    %c0_i32_1 = arith.constant 0 : i32
    return %arg0, %c0_i32, %c0_i32_0 : i32, i32, i32
  }
}

module attributes {stable_mosaic.version = 11 : i64} {
  func.func @_ln_mlp_res_kernel(%arg0: i32, %arg1: memref<32x32xf32, #tpu.memory_space<vmem>>, %arg2: memref<1x32xf32, #tpu.memory_space<vmem>>, %arg3: memref<1x32xf32, #tpu.memory_space<vmem>>, %arg4: memref<32x128xf32, #tpu.memory_space<vmem>>, %arg5: memref<1x128xf32, #tpu.memory_space<vmem>>, %arg6: memref<128x32xf32, #tpu.memory_space<vmem>>, %arg7: memref<1x32xf32, #tpu.memory_space<vmem>>, %arg8: memref<32x32xf32, #tpu.memory_space<vmem>>) attributes {dimension_semantics = [#tpu.dimension_semantics<parallel>], iteration_bounds = array<i64: 2>, scalar_prefetch = 0 : i64, scratch_operands = 0 : i64, tpu.core_type = #tpu.core_type<tc>, window_params = [{transform_indices = @transform_0, window_bounds = array<i64: 32, 32>}, {pipeline_mode = #tpu.pipeline_mode<synchronous>, transform_indices = @transform_1, window_bounds = array<i64: 1, 32>}, {pipeline_mode = #tpu.pipeline_mode<synchronous>, transform_indices = @transform_2, window_bounds = array<i64: 1, 32>}, {pipeline_mode = #tpu.pipeline_mode<synchronous>, transform_indices = @transform_3, window_bounds = array<i64: 32, 128>}, {pipeline_mode = #tpu.pipeline_mode<synchronous>, transform_indices = @transform_4, window_bounds = array<i64: 1, 128>}, {pipeline_mode = #tpu.pipeline_mode<synchronous>, transform_indices = @transform_5, window_bounds = array<i64: 128, 32>}, {pipeline_mode = #tpu.pipeline_mode<synchronous>, transform_indices = @transform_6, window_bounds = array<i64: 1, 32>}, {transform_indices = @transform_7, window_bounds = array<i64: 32, 32>}]} {
    %c0 = arith.constant 0 : index
    %c0_0 = arith.constant 0 : index
    %0 = vector.load %arg1[%c0, %c0_0] : memref<32x32xf32, #tpu.memory_space<vmem>>, vector<32x32xf32>
    %c0_1 = arith.constant 0 : index
    %c0_2 = arith.constant 0 : index
    %1 = vector.load %arg2[%c0_1, %c0_2] : memref<1x32xf32, #tpu.memory_space<vmem>>, vector<1x32xf32>
    %c0_3 = arith.constant 0 : index
    %c0_4 = arith.constant 0 : index
    %2 = vector.load %arg3[%c0_3, %c0_4] : memref<1x32xf32, #tpu.memory_space<vmem>>, vector<1x32xf32>
    %cst = arith.constant dense<0.000000e+00> : vector<32xf32>
    %3 = vector.multi_reduction <add>, %0, %cst [1] : vector<32x32xf32> to vector<32xf32>
    %4 = vector.shape_cast %3 : vector<32xf32> to vector<32x1xf32>
    %cst_5 = arith.constant 3.200000e+01 : f32
    %5 = vector.broadcast %cst_5 : f32 to vector<32x1xf32>
    %6 = arith.divf %4, %5 : vector<32x1xf32>
    %7 = vector.broadcast %6 : vector<32x1xf32> to vector<32x32xf32>
    %8 = arith.subf %0, %7 : vector<32x32xf32>
    %9 = arith.mulf %8, %8 : vector<32x32xf32>
    %cst_6 = arith.constant dense<0.000000e+00> : vector<32xf32>
    %10 = vector.multi_reduction <add>, %9, %cst_6 [1] : vector<32x32xf32> to vector<32xf32>
    %11 = vector.shape_cast %10 : vector<32xf32> to vector<32x1xf32>
    %cst_7 = arith.constant 3.200000e+01 : f32
    %12 = vector.broadcast %cst_7 : f32 to vector<32x1xf32>
    %13 = arith.divf %11, %12 : vector<32x1xf32>
    %14 = vector.broadcast %6 : vector<32x1xf32> to vector<32x32xf32>
    %15 = arith.subf %0, %14 : vector<32x32xf32>
    %cst_8 = arith.constant 9.99999974E-6 : f32
    %16 = vector.broadcast %cst_8 : f32 to vector<32x1xf32>
    %17 = arith.addf %13, %16 : vector<32x1xf32>
    %18 = math.rsqrt %17 : vector<32x1xf32>
    %19 = vector.broadcast %18 : vector<32x1xf32> to vector<32x32xf32>
    %20 = arith.mulf %15, %19 : vector<32x32xf32>
    %21 = vector.broadcast %1 : vector<1x32xf32> to vector<32x32xf32>
    %22 = arith.mulf %20, %21 : vector<32x32xf32>
    %23 = vector.broadcast %2 : vector<1x32xf32> to vector<32x32xf32>
    %24 = arith.addf %22, %23 : vector<32x32xf32>
    %c0_9 = arith.constant 0 : index
    %c0_10 = arith.constant 0 : index
    %25 = vector.load %arg4[%c0_9, %c0_10] : memref<32x128xf32, #tpu.memory_space<vmem>>, vector<32x128xf32>
    %cst_11 = arith.constant dense<0.000000e+00> : vector<32x128xf32>
    %26 = tpu.matmul %24, %25, %cst_11 {dimension_numbers = #tpu.dot_dimension_numbers<[1], [0], [0], [1], [0, 0, 1, 1], [], []>} : vector<32x32xf32>, vector<32x128xf32>, vector<32x128xf32> -> vector<32x128xf32>
    %c0_12 = arith.constant 0 : index
    %c0_13 = arith.constant 0 : index
    %27 = vector.load %arg5[%c0_12, %c0_13] : memref<1x128xf32, #tpu.memory_space<vmem>>, vector<1x128xf32>
    %28 = vector.broadcast %27 : vector<1x128xf32> to vector<32x128xf32>
    %29 = arith.addf %26, %28 : vector<32x128xf32>
    %cst_14 = arith.constant 1.702000e+00 : f32
    %30 = vector.broadcast %cst_14 : f32 to vector<32x128xf32>
    %31 = arith.mulf %30, %29 : vector<32x128xf32>
    %32 = arith.negf %31 : vector<32x128xf32>
    %33 = math.exp %32 : vector<32x128xf32>
    %cst_15 = arith.constant 1.000000e+00 : f32
    %34 = vector.broadcast %cst_15 : f32 to vector<32x128xf32>
    %35 = arith.addf %34, %33 : vector<32x128xf32>
    %36 = arith.divf %34, %35 : vector<32x128xf32>
    %37 = arith.mulf %29, %36 : vector<32x128xf32>
    %c0_16 = arith.constant 0 : index
    %c0_17 = arith.constant 0 : index
    %38 = vector.load %arg6[%c0_16, %c0_17] : memref<128x32xf32, #tpu.memory_space<vmem>>, vector<128x32xf32>
    %cst_18 = arith.constant dense<0.000000e+00> : vector<32x32xf32>
    %39 = tpu.matmul %37, %38, %cst_18 {dimension_numbers = #tpu.dot_dimension_numbers<[1], [0], [0], [1], [0, 0, 1, 1], [], []>} : vector<32x128xf32>, vector<128x32xf32>, vector<32x32xf32> -> vector<32x32xf32>
    %c0_19 = arith.constant 0 : index
    %c0_20 = arith.constant 0 : index
    %40 = vector.load %arg7[%c0_19, %c0_20] : memref<1x32xf32, #tpu.memory_space<vmem>>, vector<1x32xf32>
    %41 = vector.broadcast %40 : vector<1x32xf32> to vector<32x32xf32>
    %42 = arith.addf %39, %41 : vector<32x32xf32>
    %43 = arith.addf %0, %42 : vector<32x32xf32>
    %c0_21 = arith.constant 0 : index
    %c0_22 = arith.constant 0 : index
    %44 = vector.load %arg8[%c0_21, %c0_22] : memref<32x32xf32, #tpu.memory_space<vmem>>, vector<32x32xf32>
    tpu.vector_store %arg8[%c0_21, %c0_22], %43 {strides = array<i32>} : memref<32x32xf32, #tpu.memory_space<vmem>>, vector<32x32xf32>,
    return
  }
  func.func @transform_0(%arg0: i32) -> (i32, i32) {
    %c0_i32 = arith.constant 0 : i32
    %c0_i32_0 = arith.constant 0 : i32
    return %arg0, %c0_i32 : i32, i32
  }
  func.func @transform_1(%arg0: i32) -> (i32, i32) {
    %c0_i32 = arith.constant 0 : i32
    %c0_i32_0 = arith.constant 0 : i32
    %c0_i32_1 = arith.constant 0 : i32
    return %c0_i32, %c0_i32_0 : i32, i32
  }
  func.func @transform_2(%arg0: i32) -> (i32, i32) {
    %c0_i32 = arith.constant 0 : i32
    %c0_i32_0 = arith.constant 0 : i32
    %c0_i32_1 = arith.constant 0 : i32
    return %c0_i32, %c0_i32_0 : i32, i32
  }
  func.func @transform_3(%arg0: i32) -> (i32, i32) {
    %c0_i32 = arith.constant 0 : i32
    %c0_i32_0 = arith.constant 0 : i32
    %c0_i32_1 = arith.constant 0 : i32
    return %c0_i32, %c0_i32_0 : i32, i32
  }
  func.func @transform_4(%arg0: i32) -> (i32, i32) {
    %c0_i32 = arith.constant 0 : i32
    %c0_i32_0 = arith.constant 0 : i32
    %c0_i32_1 = arith.constant 0 : i32
    return %c0_i32, %c0_i32_0 : i32, i32
  }
  func.func @transform_5(%arg0: i32) -> (i32, i32) {
    %c0_i32 = arith.constant 0 : i32
    %c0_i32_0 = arith.constant 0 : i32
    %c0_i32_1 = arith.constant 0 : i32
    return %c0_i32, %c0_i32_0 : i32, i32
  }
  func.func @transform_6(%arg0: i32) -> (i32, i32) {
    %c0_i32 = arith.constant 0 : i32
    %c0_i32_0 = arith.constant 0 : i32
    %c0_i32_1 = arith.constant 0 : i32
    return %c0_i32, %c0_i32_0 : i32, i32
  }
  func.func @transform_7(%arg0: i32) -> (i32, i32) {
    %c0_i32 = arith.constant 0 : i32
    %c0_i32_0 = arith.constant 0 : i32
    return %arg0, %c0_i32 : i32, i32
  }
}

</mosaic_0001>

<bundles_post_ra>
// kernel: cross_frame_attention_block.7
= control target key start
LH: loop header
LB: loop body
LE: loop exit
PB: predicated region body
PF: predicated region fallthrough
CT: control target
= control target key end

     0   :  { %s1790_s12 = smov 0   ;;  %s1792_s13 = smov 0   ;;  %s2024_s0 = inlined_call_operand.vmem [shape: f32[8,4,9,8], index: 0, kind: input, shape index: {}]   ;;  %s2025_s1 = inlined_call_operand.vmem [shape: f32[8,4,9,8], index: 1, kind: input, shape index: {}]   ;;  %s2026_s2 = inlined_call_operand.vmem [shape: f32[8,4,9,8], index: 2, kind: input, shape index: {}]   ;;  %s2027_s3 = inlined_call_operand.vmem [shape: f32[8,4,9,8], index: 3, kind: output, shape index: {}]  }
   0x1   :  { %s1794_s14 = smov 0   ;;  %s1796_s15 = smov 0  }
   0x2   :  { %s1798_s16 = smov 0   ;;  %s1800_s17 = smov 0  }
   0x3   :  { %s1802_s18 = smov 0  }
   0x4 LB: > { %s22_s19 = sadd.s32 1, %s1759_s16  ;;  %s25_s20 = sadd.s32 1, %s1763_s17  ;;  %s1767_s18 = sphi %s1802_s18, %s13_s18   ;;  %s1763_s17 = sphi %s1800_s17, %s2039_s17   ;;  %s1759_s16 = sphi %s1798_s16, %s2038_s16   ;;  %s1755_s15 = sphi %s1796_s15, %s2037_s15   ;;  %s1751_s14 = sphi %s1794_s14, %s2036_s14   ;;  %s1747_s13 = sphi %s1792_s13, %s2035_s13   ;;  %s1743_s12 = sphi %s1790_s12, %s2034_s12  }
   0x5   : > { %p23_p0 = scmp.ge.s32.totalorder %s22_s19, 4  ;;  %s1425_s21 = sadd.s32 4294967295, %s1767_s18  }
   0x6   : > { %p41_p1 = scmp.ne.s32.totalorder %s1747_s13, %s1743_s12  ;;  %p42_p2 = scmp.eq.s32.totalorder %s1767_s18, 0 }
   0x7   : > { %s2041_s19 = smov (%p23_p0, %s22_s19), 0  ;;  %s2043_s20 = smov (!%p23_p0, %s25_s20), %s1763_s17 }
   0x8   : > { %p27_p3 = scmp.ge.s32.totalorder %s2043_s20, 2  ;;  %p129_p4 = scmp.eq.s32.totalorder %s1425_s21, 7 }
   0x9   : > { %s30_s22 = ssub.s32 %s1759_s16, %s2041_s19  ;;  %p1836_p5 = por %p42_p2, %p41_p1 }
   0xa   : > { %s2045_s20 = smov (%p27_p3, %s2043_s20), 0  ;;  %p1842_p6 = por %p129_p4, %p41_p1 }
   0xb   : > { %s29_s25 = ssub.s32 %s1763_s17, %s2045_s20  ;;  %s34_s27 = sadd.s32 1, %s1747_s13 }
   0xc   : > { %s31_s26 = sor.u32 %s30_s22, %s29_s25  ;;  %p1428_p8 = scmp.ge.s32.totalorder %s1767_s18, 8 }
   0xd   : > { %p32_p7 = scmp.eq.s32.totalorder %s31_s26, 0 }
   0xe   : > { %151 = sbr.rel (%p1428_p8) target bundleno = 54 (0x36), region = 16 }
   0xf   : > { %s1850_s28 = scalar_select %p32_p7, %s1747_s13, %s34_s27  }
  0x15   : > { %154 = sbr.rel (!%p1836_p5) target bundleno = 32 (0x20), region = 20  ;;  %s156_s29 = sand.u32 (%p1836_p5), 1, %s1747_s13  }
  0x16   : > { %s1431_s30 = sshll.u32 (%p1836_p5), %s1759_s16, 1  ;;  %s1429_s4 = sshll.u32 (%p1836_p5), %s156_s29, 6 }
  0x17   : > { %s1484_s5 = sshll.u32 (%p1836_p5), %s1763_s17, 5  ;;  %s158_s11 = scalar_lea.vmem (%p1836_p5), [#allocation2], %s1429_s4 }
  0x18   : > { %s162_s6 = sadd.s32 (%p1836_p5), %s1484_s5, %s1431_s30 }
  0x19   : > { %s1433_s7 = sshll.u32 (%p1836_p5), %s162_s6, 3 }
  0x1a   : > { %s164_s10 = scalar_lea.vmem (%p1836_p5), %s2024_s0, %s1433_s7 }
  0x1b   : > { %v206_v0 = vld [vmem:[%s164_s10] sm:$0xff] (%p1836_p5)  ;;  %v208_v1 = vld [vmem:[%s164_s10 + $0x8] sm:$0xff] (%p1836_p5) }
  0x1c   : > { %v210_v2 = vld [vmem:[%s164_s10 + $0x40] sm:$0xff]  ;;  %207 = vst [vmem:[%s158_s11] sm:$0xff] %v206_v0  ;;  %209 = vst [vmem:[%s158_s11 + $0x8] sm:$0xff] %v208_v1  ;;  %v212_v3 = vld [vmem:[%s164_s10 + $0x48] sm:$0xff] }
  0x1d   : > { %211 = vst [vmem:[%s158_s11 + $0x10] sm:$0xff] %v210_v2  ;;  %v214_v4 = vld [vmem:[%s164_s10 + $0x80] sm:$0xff]  ;;  %v216_v5 = vld [vmem:[%s164_s10 + $0x88] sm:$0xff]  ;;  %213 = vst [vmem:[%s158_s11 + $0x18] sm:$0xff] %v212_v3 }
  0x1e   : > { %215 = vst [vmem:[%s158_s11 + $0x20] sm:$0xff] %v214_v4  ;;  %217 = vst [vmem:[%s158_s11 + $0x28] sm:$0xff] %v216_v5  ;;  %v218_v6 = vld [vmem:[%s164_s10 + $0xc0] sm:$0xff]  ;;  %v220_v7 = vld [vmem:[%s164_s10 + $0xc8] sm:$0xff] }
  0x1f   : > { %219 = vst [vmem:[%s158_s11 + $0x30] sm:$0xff] %v218_v6  ;;  %221 = vst [vmem:[%s158_s11 + $0x38] sm:$0xff] %v220_v7 }
  0x20 PF: > { %227 = sbr.rel (!%p1836_p5) target bundleno = 43 (0x2b), region = 58  ;;  %s229_s21 = sand.u32 (%p1836_p5), 1, %s1747_s13  }
  0x21   : > { %s1436_s22 = sshll.u32 (%p1836_p5), %s1759_s16, 1  ;;  %s1434_s25 = sshll.u32 (%p1836_p5), %s229_s21, 6 }
  0x22   : > { %s1485_s26 = sshll.u32 (%p1836_p5), %s1763_s17, 5  ;;  %s231_s6 = scalar_lea.vmem (%p1836_p5), [#allocation3], %s1434_s25 }
  0x23   : > { %s235_s27 = sadd.s32 (%p1836_p5), %s1485_s26, %s1436_s22 }
  0x24   : > { %s1438_s29 = sshll.u32 (%p1836_p5), %s235_s27, 3 }
  0x25   : > { %s237_s5 = scalar_lea.vmem (%p1836_p5), %s2025_s1, %s1438_s29 }
  0x26   : > { %v279_v8 = vld [vmem:[%s237_s5] sm:$0xff] (%p1836_p5)  ;;  %v281_v9 = vld [vmem:[%s237_s5 + $0x8] sm:$0xff] (%p1836_p5) }
  0x27   : > { %v283_v10 = vld [vmem:[%s237_s5 + $0x40] sm:$0xff]  ;;  %280 = vst [vmem:[%s231_s6] sm:$0xff] %v279_v8  ;;  %282 = vst [vmem:[%s231_s6 + $0x8] sm:$0xff] %v281_v9  ;;  %v285_v11 = vld [vmem:[%s237_s5 + $0x48] sm:$0xff] }
  0x28   : > { %284 = vst [vmem:[%s231_s6 + $0x10] sm:$0xff] %v283_v10  ;;  %v287_v12 = vld [vmem:[%s237_s5 + $0x80] sm:$0xff]  ;;  %v289_v13 = vld [vmem:[%s237_s5 + $0x88] sm:$0xff]  ;;  %286 = vst [vmem:[%s231_s6 + $0x18] sm:$0xff] %v285_v11 }
  0x29   : > { %288 = vst [vmem:[%s231_s6 + $0x20] sm:$0xff] %v287_v12  ;;  %290 = vst [vmem:[%s231_s6 + $0x28] sm:$0xff] %v289_v13  ;;  %v291_v14 = vld [vmem:[%s237_s5 + $0xc0] sm:$0xff]  ;;  %v293_v15 = vld [vmem:[%s237_s5 + $0xc8] sm:$0xff] }
  0x2a   : > { %292 = vst [vmem:[%s231_s6 + $0x30] sm:$0xff] %v291_v14  ;;  %294 = vst [vmem:[%s231_s6 + $0x38] sm:$0xff] %v293_v15 }
  0x2b PF: > { %300 = sbr.rel (!%p1836_p5) target bundleno = 54 (0x36), region = 96  ;;  %s302_s7 = sand.u32 (%p1836_p5), 1, %s1747_s13  }
  0x2c   : > { %s1441_s8 = sshll.u32 (%p1836_p5), %s1759_s16, 1  ;;  %s1439_s9 = sshll.u32 (%p1836_p5), %s302_s7, 6 }
  0x2d   : > { %s1486_s10 = sshll.u32 (%p1836_p5), %s1763_s17, 5  ;;  %s304_s27 = scalar_lea.vmem (%p1836_p5), [#allocation4], %s1439_s9 }
  0x2e   : > { %s308_s11 = sadd.s32 (%p1836_p5), %s1486_s10, %s1441_s8 }
  0x2f   : > { %s1443_s21 = sshll.u32 (%p1836_p5), %s308_s11, 3 }
  0x30   : > { %s310_s26 = scalar_lea.vmem (%p1836_p5), %s2026_s2, %s1443_s21 }
  0x31   : > { %v352_v16 = vld [vmem:[%s310_s26] sm:$0xff] (%p1836_p5)  ;;  %v354_v17 = vld [vmem:[%s310_s26 + $0x8] sm:$0xff] (%p1836_p5) }
  0x32   : > { %v356_v18 = vld [vmem:[%s310_s26 + $0x40] sm:$0xff]  ;;  %353 = vst [vmem:[%s304_s27] sm:$0xff] %v352_v16  ;;  %355 = vst [vmem:[%s304_s27 + $0x8] sm:$0xff] %v354_v17  ;;  %v358_v19 = vld [vmem:[%s310_s26 + $0x48] sm:$0xff] }
  0x33   : > { %357 = vst [vmem:[%s304_s27 + $0x10] sm:$0xff] %v356_v18  ;;  %v360_v20 = vld [vmem:[%s310_s26 + $0x80] sm:$0xff]  ;;  %v362_v21 = vld [vmem:[%s310_s26 + $0x88] sm:$0xff]  ;;  %359 = vst [vmem:[%s304_s27 + $0x18] sm:$0xff] %v358_v19 }
  0x34   : > { %361 = vst [vmem:[%s304_s27 + $0x20] sm:$0xff] %v360_v20  ;;  %363 = vst [vmem:[%s304_s27 + $0x28] sm:$0xff] %v362_v21  ;;  %v364_v22 = vld [vmem:[%s310_s26 + $0xc0] sm:$0xff]  ;;  %v366_v23 = vld [vmem:[%s310_s26 + $0xc8] sm:$0xff] }
  0x35   : > { %365 = vst [vmem:[%s304_s27 + $0x30] sm:$0xff] %v364_v22  ;;  %367 = vst [vmem:[%s304_s27 + $0x38] sm:$0xff] %v366_v23 }
  0x36 PF: > { %p1444_p9 = scmp.ge.s32.totalorder %s1767_s18, 1  ;;  %p372_p10 = scmp.lt.s32.totalorder %s1767_s18, 9 }
  0x38   : > { %p373_p11 = pnand %p1444_p9, %p372_p10 }
  0x39   : > { %s379_s23 = sand.u32 (!%p373_p11), 1, %s1743_s12   ;;  %vm451_vm0 = vcmask (!%p373_p11), 64512   ;;  %vm804_vm2 = vcmask (!%p373_p11), 65536   ;;  %vm800_vm3 = vcmask (!%p373_p11), 72704   ;;  %vm896_vm4 = vcmask (!%p373_p11), 1040384  }
  0x3a   : > { %376 = sbr.rel (%p373_p11) target bundleno = 835 (0x343), region = 134  ;;  %s1880_s29 = sshll.u32 (!%p373_p11), %s379_s23, 6  ;;  %vm1884_vm1 = vmpackc.low (!%p373_p11), %vm451_vm0, %vm451_vm0  ;;  %vm1769_vm5 = vmmov (!%p373_p11), 1   ;;  %vm1228_vm7 = vcmask (!%p373_p11), 57344  }
  0x3b   : > { %s388_s30 = scalar_lea.vmem (!%p373_p11), [#allocation3], %s1880_s29  ;;  %s381_s4 = scalar_lea.vmem (!%p373_p11), [#allocation2], %s1880_s29  ;;  %vm1955_vm6 = vmpackc.low (!%p373_p11), %vm896_vm4, %vm1769_vm5 }
  0x3c   : > { %v435_v25 = vld [vmem:[%s388_s30] sm:$0xff] (!%p373_p11)  ;;  %v436_v26 = vld [vmem:[%s388_s30 + $0x8] sm:$0x1] (!%p373_p11)  ;;  %v437_v27 = vld [vmem:[%s388_s30 + $0x10] sm:$0xff] (!%p373_p11)  ;;  %s395_s12 = scalar_lea.vmem (!%p373_p11), [#allocation4], %s1880_s29  ;;  %s422_s5 = scalar_lea.vmem (!%p373_p11), [#allocation5], %s1880_s29 }
  0x3d   : > { %v1576_v28 = vpack.c.bf16 (!%p373_p11), %v436_v26, %v435_v25  ;;  %v438_v29 = vld [vmem:[%s388_s30 + $0x18] sm:$0x1] (!%p373_p11)  ;;  %v427_v30 = vld [vmem:[%s381_s4] sm:$0xff] (!%p373_p11)  ;;  %v429_v32 = vld [vmem:[%s381_s4 + $0x10] sm:$0xff] (!%p373_p11) }
  0x3e   : > { %v1582_v31 = vpack.c.bf16 (!%p373_p11), %v438_v29, %v437_v27  ;;  %1524 = vmatprep.mubr.msk.f32.mxu0 (!%p373_p11), %vm451_vm0, %v427_v30  ;;  %v439_v33 = vld [vmem:[%s388_s30 + $0x20] sm:$0xff] (!%p373_p11)  ;;  %v440_v34 = vld [vmem:[%s388_s30 + $0x28] sm:$0x1] (!%p373_p11)  ;;  %1531 = vmatprep.mubr.msk.f32.mxu1 (!%p373_p11), %vm451_vm0, %v429_v32  ;;  %v441_v36 = vld [vmem:[%s388_s30 + $0x30] sm:$0xff] (!%p373_p11) }
  0x3f   : > { %1578 = vmatprep.subr.msk.bf16.mxu0 (!%p373_p11), %vm1884_vm1, %v1576_v28  ;;  %v1588_v35 = vpack.c.bf16 (!%p373_p11), %v440_v34, %v439_v33  ;;  %v442_v37 = vld [vmem:[%s388_s30 + $0x38] sm:$0x1] (!%p373_p11)  ;;  %v428_v39 = vld [vmem:[%s381_s4 + $0x8] sm:$0x1] (!%p373_p11)  ;;  %v431_v41 = vld [vmem:[%s381_s4 + $0x20] sm:$0xff] (!%p373_p11) }
  0x40   : > { %1584 = vmatprep.subr.msk.bf16.mxu1 (!%p373_p11), %vm1884_vm1, %v1582_v31  ;;  %1581 = vmatpush3.bf16.xpose.msk.msra.mxu0 (!%p373_p11), %vm1884_vm1, %v1576_v28  ;;  %v1594_v38 = vpack.c.bf16 (!%p373_p11), %v442_v37, %v441_v36  ;;  %v430_v40 = vld [vmem:[%s381_s4 + $0x18] sm:$0x1] (!%p373_p11)  ;;  %v433_v42 = vld [vmem:[%s381_s4 + $0x30] sm:$0xff] (!%p373_p11)  ;;  %v432_v43 = vld [vmem:[%s381_s4 + $0x28] sm:$0x1] (!%p373_p11) }
  0x41   : > { %1587 = vmatpush3.bf16.xpose.msk.msra.mxu1 %vm1884_vm1, %v1582_v31  ;;  %1590 = vmatprep.subr.msk.bf16.mxu0 %vm1884_vm1, %v1588_v35  ;;  %v434_v44 = vld [vmem:[%s381_s4 + $0x38] sm:$0x1]  ;;  %v443_v37 = vld [vmem:[%s395_s12] sm:$0xff]  ;;  %s1479_s6 = sshll.u32 (%p1842_p6), %s1751_s14, 1  ;;  %s1487_s7 = sshll.u32 (%p1842_p6), %s1755_s15, 5 }
  0x42   : > { %1596 = vmatprep.subr.msk.bf16.mxu1 %vm1884_vm1, %v1594_v38  ;;  %s1246_s8 = sadd.s32 (%p1842_p6), %s1487_s7, %s1479_s6 }
  0x43   : > { %s1481_s9 = sshll.u32 (%p1842_p6), %s1246_s8, 3 }
  0x44   : > { %s1248_s21 = scalar_lea.vmem (%p1842_p6), %s2027_s3, %s1481_s9 }
  0x47   : > { %1525 = vmatmul.mubr.msk.f32.vlgmr.msra.gmra.mrb[0].mxu0 %vm451_vm0, %v428_v39 }
  0x48   : > { %1532 = vmatmul.mubr.msk.f32.vlgmr.msra.gmra.mrb[0].mxu1 %vm451_vm0, %v430_v40  ;;  %1593 = vmatpush3.bf16.xpose.msk.msra.mxu0 %vm1884_vm1, %v1588_v35 }
  0x49   : > { %1599 = vmatpush3.bf16.xpose.msk.msra.mxu1 %vm1884_vm1, %v1594_v38  ;;  %1538 = vmatprep.mubr.msk.f32.mxu0 %vm451_vm0, %v431_v41  ;;  %v444_v38 = vld [vmem:[%s395_s12 + $0x8] sm:$0x1]  ;;  %v445_v41 = vld [vmem:[%s395_s12 + $0x10] sm:$0xff] }
  0x4a   : > { %1545 = vmatprep.mubr.msk.f32.mxu1 %vm451_vm0, %v433_v42  ;;  %v1600_v39 = vpack.c.bf16 %v444_v38, %v443_v37  ;;  %v446_v42 = vld [vmem:[%s395_s12 + $0x18] sm:$0x1] }
  0x4c   : > { %1602 = vmatprep.subr.msk.bf16.mxu0 %vm1955_vm6, %v1600_v39 }
  0x4f   : > { %1539 = vmatmul.mubr.msk.f32.vlgmr.msra.gmra.mrb[2].mxu0 %vm451_vm0, %v432_v43  ;;  %v1606_v43 = vpack.c.bf16 %v446_v42, %v445_v41 }
  0x50   : > { %1546 = vmatmul.mubr.msk.f32.vlgmr.msra.gmra.mrb[2].mxu1 %vm451_vm0, %v434_v44  ;;  %1605 = vmatpush3.bf16.msk.msra.mxu0 %vm1955_vm6, %v1600_v39  ;;  %v447_v44 = vld [vmem:[%s395_s12 + $0x20] sm:$0xff] }
  0x51   : > { %1608 = vmatprep.subr.msk.bf16.mxu1 %vm1955_vm6, %v1606_v43 }
  0x52   : > { %1611 = vmatpush3.bf16.msk.msra.mxu1 %vm1955_vm6, %v1606_v43 }
 0x11a   : > { %v1526_v45 = vpop.f32.mrb[0].mxu0 }
 0x11b   : > { %v530_v46 = vpop.f32.mrb[1].mxu0  ;;  %v805_v47 = vsel %vm804_vm2, %v1526_v45, -inf  ;;  %v1533_v48 = vpop.f32.mrb[0].mxu1 }
 0x11c   : > { %806 = vmax.xlane.f32.xlu1 %v805_v47  ;;  %v801_v49 = vsel %vm800_vm3, %v530_v46, -inf  ;;  %v617_v50 = vpop.f32.mrb[1].mxu1  ;;  %v811_v51 = vsel %vm804_vm2, %v1533_v48, -inf  ;;  %v449_v47 = vld [vmem:[%s395_s12 + $0x30] sm:$0xff] }
 0x11d   : > { %802 = vmax.xlane.f32.xlu0 %v801_v49  ;;  %v808_v52 = vsel %vm800_vm3, %v617_v50, -inf }
 0x120   : > { %812 = vmax.xlane.f32.xlu1 %v811_v51 }
 0x121   : > { %809 = vmax.xlane.f32.xlu0 %v808_v52 }
 0x122   : > { %v1540_v53 = vpop.f32.mrb[2].mxu0 }
 0x123   : > { %v1547_v54 = vpop.f32.mrb[2].mxu1  ;;  %v704_v55 = vpop.f32.mrb[3].mxu0  ;;  %v817_v59 = vsel %vm804_vm2, %v1540_v53, -inf }
 0x124   : > { %v791_v56 = vpop.f32.mrb[3].mxu1  ;;  %v814_v57 = vsel %vm800_vm3, %v704_v55, -inf  ;;  %v823_v60 = vsel %vm804_vm2, %v1547_v54, -inf }
 0x125   : > { %v820_v58 = vsel %vm800_vm3, %v791_v56, -inf  ;;  %815 = vmax.xlane.f32.xlu0 %v814_v57 }
 0x126   : > { %821 = vmax.xlane.f32.xlu1 %v820_v58 }
 0x129   : > { %818 = vmax.xlane.f32.xlu0 %v817_v59 }
 0x12a   : > { %824 = vmax.xlane.f32.xlu1 %v823_v60 }
 0x1a9   : > { %v807_v61 = vpop.xlane.xlu1 %806 }
 0x1aa   : > { %v827_v62 = vsub.f32 %v1526_v45, %v807_v61  ;;  %v803_v63 = vpop.xlane.xlu0 %802  ;;  %v448_v45 = vld [vmem:[%s395_s12 + $0x28] sm:$0x1] }
 0x1ab   : > { %v826_v0 = vsub.f32 %v530_v46, %v803_v63  ;;  %v1612_v46 = vpack.c.bf16 %v448_v45, %v447_v44 }
 0x1ac   : > { %v836_v1 = vmul.f32 1.442695, %v827_v62 }
 0x1ad   : > { %v834_v2 = vmul.f32 1.442695, %v826_v0  ;;  %v813_v3 = vpop.xlane.xlu1 %812  ;;  %1614 = vmatprep.subr.msk.bf16.mxu0 %vm1955_vm6, %v1612_v46 }
 0x1ae   : > { %1681 = vpow2.f32 %v836_v1  ;;  %v829_v4 = vsub.f32 %v1533_v48, %v813_v3  ;;  %v810_v5 = vpop.xlane.xlu0 %809  ;;  %v450_v48 = vld [vmem:[%s395_s12 + $0x38] sm:$0x1] }
 0x1af   : > { %v828_v6 = vsub.f32 %v617_v50, %v810_v5  ;;  %1683 = vpow2.f32 %v834_v2  ;;  %v1618_v49 = vpack.c.bf16 %v450_v48, %v449_v47 }
 0x1b0   : > { %v840_v7 = vmul.f32 1.442695, %v829_v4 }
 0x1b1   : > { %v838_v8 = vmul.f32 1.442695, %v828_v6  ;;  %1620 = vmatprep.subr.msk.bf16.mxu1 %vm1955_vm6, %v1618_v49 }
 0x1b2   : > { %1685 = vpow2.f32 %v840_v7  ;;  %v816_v9 = vpop.xlane.xlu0 %815 }
 0x1b3   : > { %v822_v10 = vpop.xlane.xlu1 %821  ;;  %v830_v11 = vsub.f32 %v704_v55, %v816_v9  ;;  %1687 = vpow2.f32 %v838_v8 }
 0x1b4   : > { %v832_v12 = vsub.f32 %v791_v56, %v822_v10 }
 0x1b5   : > { %v842_v13 = vmul.f32 1.442695, %v830_v11 }
 0x1b6   : > { %v846_v14 = vmul.f32 1.442695, %v832_v12  ;;  %v819_v15 = vpop.xlane.xlu0 %818 }
 0x1b7   : > { %1689 = vpow2.f32 %v842_v13  ;;  %v825_v16 = vpop.xlane.xlu1 %824  ;;  %v831_v17 = vsub.f32 %v1540_v53, %v819_v15 }
 0x1b8   : > { %v1922_v18 = vpop.eup %1681  ;;  %1691 = vpow2.f32 %v846_v14  ;;  %v833_v19 = vsub.f32 %v1547_v54, %v825_v16 }
 0x1b9   : > { %v844_v20 = vmul.f32 1.442695, %v831_v17  ;;  %v853_v21 = vsel %vm804_vm2, %v1922_v18, 0.0  ;;  %v1926_v22 = vpop.eup %1683 }
 0x1ba   : > { %v848_v23 = vmul.f32 1.442695, %v833_v19  ;;  %854 = vadd.xlane.f32.xlu0 %v853_v21  ;;  %v850_v26 = vsel %vm800_vm3, %v1926_v22, 0.0 }
 0x1bb   : > { %1693 = vpow2.f32 %v844_v20 }
 0x1bc   : > { %v1928_v24 = vpop.eup %1685  ;;  %1695 = vpow2.f32 %v848_v23 }
 0x1bd   : > { %v859_v25 = vsel %vm804_vm2, %v1928_v24, 0.0  ;;  %v1934_v27 = vpop.eup %1687 }
 0x1be   : > { %860 = vadd.xlane.f32.xlu1 %v859_v25  ;;  %851 = vadd.xlane.f32.xlu0 %v850_v26  ;;  %v856_v29 = vsel %vm800_vm3, %v1934_v27, 0.0 }
 0x1c1   : > { %v1936_v28 = vpop.eup %1689 }
 0x1c2   : > { %v1940_v30 = vpop.eup %1691  ;;  %857 = vadd.xlane.f32.xlu1 %v856_v29  ;;  %v862_v31 = vsel %vm800_vm3, %v1936_v28, 0.0 }
 0x1c3   : > { %863 = vadd.xlane.f32.xlu0 %v862_v31  ;;  %v868_v33 = vsel %vm800_vm3, %v1940_v30, 0.0 }
 0x1c5   : > { %v1944_v32 = vpop.eup %1693 }
 0x1c6   : > { %v1948_v34 = vpop.eup %1695  ;;  %869 = vadd.xlane.f32.xlu1 %v868_v33  ;;  %v865_v35 = vsel %vm804_vm2, %v1944_v32, 0.0 }
 0x1c7   : > { %866 = vadd.xlane.f32.xlu0 %v865_v35  ;;  %v871_v36 = vsel %vm804_vm2, %v1948_v34, 0.0 }
 0x1ca   : > { %872 = vadd.xlane.f32.xlu1 %v871_v36 }
 0x247   : > { %v855_v50 = vpop.xlane.xlu0 %854 }
 0x248   : > { %1697 = vrcp.f32 %v855_v50 }
 0x24b   : > { %v861_v51 = vpop.xlane.xlu1 %860  ;;  %v852_v52 = vpop.xlane.xlu0 %851 }
 0x24c   : > { %1699 = vrcp.f32 %v852_v52 }
 0x24d   : > { %1701 = vrcp.f32 %v861_v51 }
 0x24f   : > { %v858_v53 = vpop.xlane.xlu1 %857 }
 0x250   : > { %1703 = vrcp.f32 %v858_v53  ;;  %v864_v54 = vpop.xlane.xlu0 %863 }
 0x251   : > { %1705 = vrcp.f32 %v864_v54 }
 0x252   : > { %v1698_v57 = vpop.eup %1697 }
 0x253   : > { %v870_v55 = vpop.xlane.xlu1 %869  ;;  %v883_v62 = vmul.f32 %v1698_v57, %v1922_v18 }
 0x254   : > { %1707 = vrcp.f32 %v870_v55  ;;  %v867_v56 = vpop.xlane.xlu0 %866 }
 0x255   : > { %1709 = vrcp.f32 %v867_v56 }
 0x256   : > { %v1700_v58 = vpop.eup %1699 }
 0x257   : > { %v873_v59 = vpop.xlane.xlu1 %872  ;;  %v882_v60 = vmul.f32 %v1700_v58, %v1926_v22  ;;  %v1702_v61 = vpop.eup %1701 }
 0x258   : > { %1711 = vrcp.f32 %v873_v59  ;;  %v885_v2 = vmul.f32 %v1702_v61, %v1928_v24 }
 0x259   : > { %1552 = vmatprep.mubr.msk.f32.mxu0 %vm800_vm3, %v882_v60 }
 0x25a   : > { %v1704_v63 = vpop.eup %1703  ;;  %1553 = vmatmul.mubr.msk.f32.vlgmr.msra.gmra.mrb[4].mxu0 %vm800_vm3, %v883_v62 }
 0x25b   : > { %v1706_v0 = vpop.eup %1705  ;;  %v884_v1 = vmul.f32 %v1704_v63, %v1934_v27  ;;  %1617 = vmatpush3.bf16.msk.msra.mxu0 %vm1955_vm6, %v1612_v46 }
 0x25c   : > { %v886_v3 = vmul.f32 %v1706_v0, %v1936_v28 }
 0x25d   : > { %1559 = vmatprep.mubr.msk.f32.mxu1 %vm800_vm3, %v884_v1 }
 0x25e   : > { %v1708_v4 = vpop.eup %1707  ;;  %1560 = vmatmul.mubr.msk.f32.vlgmr.msra.gmra.mrb[4].mxu1 %vm800_vm3, %v885_v2  ;;  %1566 = vmatprep.mubr.msk.f32.mxu0 %vm800_vm3, %v886_v3 }
 0x25f   : > { %v1710_v5 = vpop.eup %1709  ;;  %1623 = vmatpush3.bf16.msk.msra.mxu1 %vm1955_vm6, %v1618_v49  ;;  %v888_v6 = vmul.f32 %v1708_v4, %v1940_v30 }
 0x260   : > { %v887_v7 = vmul.f32 %v1710_v5, %v1944_v32 }
 0x261   : > { %1573 = vmatprep.mubr.msk.f32.mxu1 %vm800_vm3, %v888_v6 }
 0x262   : > { %v1712_v8 = vpop.eup %1711  ;;  %1567 = vmatmul.mubr.msk.f32.vlgmr.msra.gmra.mrb[6].mxu0 %vm800_vm3, %v887_v7 }
 0x263   : > { %v889_v9 = vmul.f32 %v1712_v8, %v1948_v34 }
 0x265   : > { %1574 = vmatmul.mubr.msk.f32.vlgmr.msra.gmra.mrb[6].mxu1 %vm800_vm3, %v889_v9 }
 0x32d   : > { %v1554_v10 = vpop.f32.mrb[4].mxu0 }
 0x32e   : > { %1229 = vst.msk [vmem:[%s422_s5 + $0x8] sm:$0x1] %vm1228_vm7, %v1554_v10  ;;  %v966_v11 = vpop.f32.mrb[5].mxu0 }
 0x32f   : > { %1227 = vst.msk [vmem:[%s422_s5] sm:$0xff] %vm451_vm0, %v966_v11 }
 0x331   : > { %v1561_v12 = vpop.f32.mrb[4].mxu1 }
 0x332   : > { %1231 = vst.msk [vmem:[%s422_s5 + $0x18] sm:$0x1] %vm1228_vm7, %v1561_v12  ;;  %v1050_v13 = vpop.f32.mrb[5].mxu1 }
 0x333   : > { %1230 = vst.msk [vmem:[%s422_s5 + $0x10] sm:$0xff] %vm451_vm0, %v1050_v13 }
 0x334   : > { %1242 = sbr.rel (!%p1842_p6) target bundleno = 835 (0x343), region = 150 }
 0x335   : > { %v1568_v14 = vpop.f32.mrb[6].mxu0  ;;  %v1292_v19 = vld [vmem:[%s422_s5 + $0x8] sm:$0xff] (%p1842_p6) }
 0x336   : > { %1233 = vst.msk [vmem:[%s422_s5 + $0x28] sm:$0x1] %vm1228_vm7, %v1568_v14  ;;  %v1134_v15 = vpop.f32.mrb[7].mxu0  ;;  %v1290_v18 = vld [vmem:[%s422_s5] sm:$0xff] (%p1842_p6)  ;;  %1293 = vst [vmem:[%s1248_s21 + $0x8] sm:$0xff] (%p1842_p6), %v1292_v19 }
 0x337   : > { %1232 = vst.msk [vmem:[%s422_s5 + $0x20] sm:$0xff] %vm451_vm0, %v1134_v15  ;;  %1291 = vst [vmem:[%s1248_s21] sm:$0xff] (%p1842_p6), %v1290_v18 }
 0x338   : > { %v1575_v16 = vpop.f32.mrb[6].mxu1 }
 0x339   : > { %1235 = vst.msk [vmem:[%s422_s5 + $0x38] sm:$0x1] %vm1228_vm7, %v1575_v16  ;;  %v1218_v17 = vpop.f32.mrb[7].mxu1  ;;  %v1296_v21 = vld [vmem:[%s422_s5 + $0x18] sm:$0xff] (%p1842_p6) }
 0x33a   : > { %1234 = vst.msk [vmem:[%s422_s5 + $0x30] sm:$0xff] %vm451_vm0, %v1218_v17  ;;  %v1294_v20 = vld [vmem:[%s422_s5 + $0x10] sm:$0xff] (%p1842_p6)  ;;  %1297 = vst [vmem:[%s1248_s21 + $0x48] sm:$0xff] (%p1842_p6), %v1296_v21 }
 0x33b   : > { %1295 = vst [vmem:[%s1248_s21 + $0x40] sm:$0xff] %v1294_v20 }
 0x33d   : > { %v1300_v23 = vld [vmem:[%s422_s5 + $0x28] sm:$0xff] }
 0x33e   : > { %v1298_v22 = vld [vmem:[%s422_s5 + $0x20] sm:$0xff]  ;;  %1301 = vst [vmem:[%s1248_s21 + $0x88] sm:$0xff] %v1300_v23 }
 0x33f   : > { %1299 = vst [vmem:[%s1248_s21 + $0x80] sm:$0xff] %v1298_v22 }
 0x340   : > { %v1304_v25 = vld [vmem:[%s422_s5 + $0x38] sm:$0xff] }
 0x341   : > { %v1302_v24 = vld [vmem:[%s422_s5 + $0x30] sm:$0xff]  ;;  %1305 = vst [vmem:[%s1248_s21 + $0xc8] sm:$0xff] %v1304_v25 }
 0x342   : > { %1303 = vst [vmem:[%s1248_s21 + $0xc0] sm:$0xff] %v1302_v24 }
 0x343 PF: > { %s13_s18 = sadd.s32 1, %s1767_s18   ;;  %s2034_s12 = smov %s1747_s13 }
 0x344   : > { %p10_p12 = scmp.ge.s32.totalorder %s13_s18, 10   ;;  %s2035_s13 = smov %s1850_s28 }
 0x345   : > { %s2036_s14 = smov %s1759_s16  ;;  %s2037_s15 = smov %s1763_s17 }
 0x346   : > { %s2038_s16 = smov %s2041_s19  ;;  %s2039_s17 = smov %s2045_s20 }
 0x347   :  { %12 = sbr.rel (!%p10_p12) target bundleno = 4 (0x4), region = 235 }

// kernel: cross_frame_attention_block.5
= control target key start
LH: loop header
LB: loop body
LE: loop exit
PB: predicated region body
PF: predicated region fallthrough
CT: control target
= control target key end

     0   :  { %s1839_s30 = smov 0   ;;  %s2006_s0 = inlined_call_operand.vmem [shape: f32[2,4,32], index: 0, kind: input, shape index: {}]   ;;  %s2007_s1 = inlined_call_operand.vmem [shape: f32[32,32], index: 1, kind: input, shape index: {}]   ;;  %s2008_s2 = inlined_call_operand.vmem [shape: f32[1,32], index: 2, kind: input, shape index: {}]   ;;  %s2009_s3 = inlined_call_operand.vmem [shape: f32[1,32], index: 3, kind: input, shape index: {}]   ;;  %s2010_s4 = inlined_call_operand.vmem [shape: f32[1,32], index: 4, kind: input, shape index: {}]   ;;  %s2011_s5 = inlined_call_operand.vmem [shape: f32[32,96], index: 5, kind: input, shape index: {}]   ;;  %s2012_s6 = inlined_call_operand.vmem [shape: f32[1,96], index: 6, kind: input, shape index: {}]   ;;  %s2013_s7 = inlined_call_operand.vmem [shape: f32[4,8,32], index: 7, kind: input, shape index: {}]   ;;  %s2014_s8 = inlined_call_operand.vmem [shape: f32[1,32], index: 8, kind: input, shape index: {}]   ;;  %s2015_s9 = inlined_call_operand.vmem [shape: f32[2,4,32], index: 9, kind: output, shape index: {}]  }
   0x1 LB: > { %s1560_s10 = sadd.s32 4294967295, %s1773_s30   ;;  %p1564_p0 = scmp.ge.s32.totalorder %s1773_s30, 1  ;;  %s1773_s30 = sphi %s1839_s30, %s19_s30  }
   0x2   : > { %p286_p1 = scmp.lt.s32.totalorder %s1773_s30, 3 }
   0x4   : > { %p287_p2 = pnand %p1564_p0, %p286_p1 }
   0x5   : > { %v329_v0 = vld [vmem:[%s2007_s1] sm:$0xff] (!%p287_p2)  ;;  %v330_v1 = vld [vmem:[%s2007_s1 + $0x8] sm:$0xff] (!%p287_p2)  ;;  %v331_v2 = vld [vmem:[%s2007_s1 + $0x10] sm:$0xff] (!%p287_p2)  ;;  %v1775_v3 = vmov (!%p287_p2), 0.0|0.0   ;;  %vm1776_vm0 = vmmov (!%p287_p2), 0   ;;  %v1777_v6 = vmov (!%p287_p2), 0.0  }
   0x6   : > { %290 = sbr.rel (%p287_p2) target bundleno = 3109 (0xc25), region = 56  ;;  %1715 = vmatprep.subr.bf16.mxu0 (!%p287_p2), %v1775_v3  ;;  %v1716_v4 = vpack.c.bf16 (!%p287_p2), %v330_v1, %v329_v0  ;;  %v332_v5 = vld [vmem:[%s2007_s1 + $0x18] sm:$0xff] (!%p287_p2)  ;;  %1641 = vmatprep.mubr.msk.f32.mxu0 (!%p287_p2), %vm1776_vm0, %v1777_v6  ;;  %p320_p3 = scmp.lt.s32.totalorder (!%p287_p2), %s1560_s10, 1  ;;  %vm340_vm1 = vcmask (!%p287_p2), 261120   ;;  %v1567_v9 = vld [vmem:[%s2008_s2] ss:$0 sm:$0xff] (!%p287_p2) }
   0x7   : > { %1721 = vmatprep.subr.bf16.mxu1 (!%p287_p2), %v1775_v3  ;;  %1652 = vmatprep.mubr.msk.f32.mxu1 (!%p287_p2), %vm1776_vm0, %v1777_v6  ;;  %v1719_v7 = vpack.c.bf16 (!%p287_p2), %v332_v5, %v331_v2  ;;  %vm416_vm2 = vcmask (!%p287_p2), 257024   ;;  %v445_v19 = vld [vmem:[%s2011_s5] sm:$0xff] (!%p287_p2)  ;;  %v446_v20 = vld [vmem:[%s2011_s5 + $0x8] sm:$0xff] (!%p287_p2)  ;;  %v447_v21 = vld [vmem:[%s2011_s5 + $0x10] sm:$0xff] (!%p287_p2)  ;;  %s1778_s21 = smov (!%p287_p2), 120   ;;  %s1780_s23 = smov (!%p287_p2), 88  }
   0x8   : > { %1717 = vmatpush3.bf16.msra.mxu0 (!%p287_p2), %v1716_v4  ;;  %v1722_v22 = vpack.c.bf16 (!%p287_p2), %v446_v20, %v445_v19  ;;  %v448_v23 = vld [vmem:[%s2011_s5 + $0x18] sm:$0xff] (!%p287_p2)  ;;  %v1569_v29 = vld [vmem:[%s2009_s3] ss:$0 sm:$0xff] (!%p287_p2)  ;;  %vm532_vm3 = vcmask (!%p287_p2), 64512   ;;  %vm607_vm4 = vcmask (!%p287_p2), 27648   ;;  %s1781_s24 = smov (!%p287_p2), 56  }
   0x9   : > { %1718 = vmatprep.subr.bf16.mxu0 (!%p287_p2), %v1775_v3  ;;  %v1725_v24 = vpack.c.bf16 (!%p287_p2), %v448_v23, %v447_v21  ;;  %v1570_v31 = vld [vmem:[%s2010_s4] ss:$0 sm:$0xff] (!%p287_p2)  ;;  %s1782_s25 = smov (!%p287_p2), 64   ;;  %s1783_s26 = smov (!%p287_p2), 80   ;;  %v1581_v57 = vld [vmem:[%s2013_s7 + $0x8] sm:$0xff] (!%p287_p2)  ;;  %vm625_vm5 = vcmask (!%p287_p2), 1043456  }
   0xa   : > { %1723 = vmatpush3.bf16.msra.mxu1 (!%p287_p2), %v1722_v22  ;;  %v1571_v34 = vld [vmem:[%s2012_s6] ss:$0 sm:$0xff] (!%p287_p2)  ;;  %s1784_s27 = smov (!%p287_p2), 112   ;;  %vm621_vm6 = vcmask (!%p287_p2), 31744   ;;  %s1785_s13 = smov (!%p287_p2), 48  }
   0xb   : > { %1724 = vmatprep.subr.bf16.mxu1 (!%p287_p2), %v1775_v3  ;;  %v698_v2 = vld [vmem:[%s2013_s7] sm:$0xff] (!%p287_p2)  ;;  %s1786_s14 = smov (!%p287_p2), 104   ;;  %s1787_s15 = smov (!%p287_p2), 72  }
   0xc   : > { %1720 = vmatpush3.bf16.msra.mxu0 (!%p287_p2), %v1719_v7  ;;  %s1788_s18 = smov (!%p287_p2), 40  }
   0xd   : > { %s2017_s10 = smov (!%p320_p3, %s1560_s10), 1  ;;  %1655 = vmatprep.subr.mxu0 %v1777_v6 }
   0xe   : > { %s1565_s19 = sshll.u32 %s2017_s10, 2  ;;  %1726 = vmatpush3.bf16.msra.mxu1 %v1725_v24 }
   0xf   : > { %s323_s22 = scalar_lea.vmem %s2006_s0, %s1565_s19  ;;  %1660 = vmatprep.subr.mxu1 %v1777_v6 }
  0x10   : > { %v328_v8 = vld [vmem:[%s323_s22] sm:$0xf]  ;;  %s1779_s22 = smov 96  }
  0x11   : > { %1642 = vmatmul.mubr.msk.f32.vlgmr.msra.gmra.mrb[0].mxu0 %vm340_vm1, %v328_v8 }
  0x12   : > { %1657 = vmatprep.mubr.msk.f32.mxu0 %vm1776_vm0, %v1777_v6 }
  0xe4   : > { %v410_v10 = vpop.f32.mrb[0].mxu0 }
  0xe5   : > { %v1878_v11 = vadd.f32 %v1567_v9, %v410_v10  ;;  %v1643_v12 = vpop.f32.mrb[1].mxu0 }
  0xe7   : > { %v417_v13 = vsel %vm416_vm2, %v1878_v11, 0.0 }
  0xe8   : > { %418 = vadd.xlane.f32.xlu0 %v417_v13 }
 0x175   : > { %v419_v14 = vpop.xlane.xlu0 %418 }
 0x176   : > { %v421_v15 = vmul.f32 0.03125, %v419_v14 }
 0x178   : > { %v422_v16 = vsub.f32 %v1878_v11, %v421_v15 }
 0x17a   : > { %v423_v17 = vmul.f32 %v422_v16, %v422_v16 }
 0x17c   : > { %v424_v18 = vsel %vm416_vm2, %v423_v17, 0.0 }
 0x17d   : > { %425 = vadd.xlane.f32.xlu0 %v424_v18 }
 0x20a   : > { %v426_v25 = vpop.xlane.xlu0 %425 }
 0x20b   : > { %v427_v26 = vmul.f32 0.03125, %v426_v25 }
 0x20d   : > { %v428_v27 = vadd.f32 1e-05, %v427_v26 }
 0x20f   : > { %1749 = vrsqrt.f32 %v428_v27 }
 0x219   : > { %v1750_v28 = vpop.eup %1749 }
 0x21a   : > { %v430_v30 = vmul.f32 %v1750_v28, %v422_v16 }
 0x21c   : > { %v437_v32 = vmul.f32 %v1569_v29, %v430_v30  ;;  %v1588_v30 = vld [vmem:[%s2013_s7 + $0x10] sm:$0xff] }
 0x21e   : > { %v444_v33 = vadd.f32 %v1570_v31, %v437_v32 }
 0x220   : > { %1653 = vmatmul.mubr.msk.f32.vlgmr.msra.gmra.mrb[0].mxu1 %vm340_vm1, %v444_v33 }
 0x221   : > { %1662 = vmatprep.mubr.msk.f32.mxu1 %vm1776_vm0, %v1777_v6 }
 0x2f3   : > { %v525_v35 = vpop.f32.mrb[0].mxu1 }
 0x2f4   : > { %v1909_v36 = vadd.f32 %v1571_v34, %v525_v35  ;;  %v1654_v37 = vpop.f32.mrb[1].mxu1 }
 0x2f6   : > { %699 = vrot.lane.b32.xlu0 %v1909_v36, %s1778_s21  ;;  %530 = vrot.lane.b32.xlu1 %v1909_v36, %s1779_s22 }
 0x2fa   : > { %701 = vrot.lane.b32.xlu1 %v1909_v36, %s1780_s23 }
 0x368   : > { %v531_v38 = vpop.permute.xlu1 %530  ;;  %v700_v40 = vpop.permute.xlu0 %699 }
 0x369   : > { %1656 = vmatpush3.xpose.msk.msra.mxu0 %vm532_vm3, %v531_v38 }
 0x36a   : > { %1665 = vmatprep.subr.mxu0 %v1777_v6 }
 0x36c   : > { %1658 = vmatmul.mubr.msk.f32.vlgmr.msra.gmra.mrb[2].mxu0 %vm532_vm3, %v1909_v36  ;;  %v702_v39 = vpop.permute.xlu1 %701 }
 0x36d   : > { %1666 = vmatpush3.xpose.msk.msra.mxu0 %vm532_vm3, %v702_v39  ;;  %1667 = vmatprep.mubr.msk.f32.mxu0 %vm1776_vm0, %v1777_v6 }
 0x36e   : > { %1675 = vmatprep.subr.mxu0 %v1777_v6 }
 0x370   : > { %1668 = vmatmul.mubr.msk.f32.vlgmr.msra.gmra.mrb[4].mxu0 %vm532_vm3, %v700_v40 }
 0x371   : > { %1677 = vmatprep.mubr.msk.f32.mxu0 %vm1776_vm0, %v1777_v6  ;;  %1676 = vmatpush3.msra.mxu0 %v1581_v57 }
 0x372   : > { %1685 = vmatprep.subr.mxu0 %v1777_v6 }
 0x43f   : > { %v603_v41 = vpop.f32.mrb[2].mxu0 }
 0x440   : > { %v1659_v42 = vpop.f32.mrb[3].mxu0  ;;  %v608_v43 = vsel %vm607_vm4, %v603_v41, -inf }
 0x441   : > { %609 = vmax.xlane.f32.xlu1 %v608_v43 }
 0x443   : > { %v773_v44 = vpop.f32.mrb[4].mxu0 }
 0x444   : > { %v1669_v45 = vpop.f32.mrb[5].mxu0  ;;  %v777_v46 = vsel %vm607_vm4, %v773_v44, -inf }
 0x445   : > { %778 = vmax.xlane.f32.xlu0 %v777_v46 }
 0x45b   : > { %788 = vrot.lane.b32.xlu0 %v1909_v36, %s1781_s24 }
 0x4ce   : > { %v610_v47 = vpop.xlane.xlu1 %609 }
 0x4cf   : > { %v611_v48 = vsub.f32 %v603_v41, %v610_v47 }
 0x4d1   : > { %v612_v49 = vmul.f32 1.442695, %v611_v48 }
 0x4d2   : > { %v779_v50 = vpop.xlane.xlu0 %778 }
 0x4d3   : > { %1751 = vpow2.f32 %v612_v49  ;;  %v780_v51 = vsub.f32 %v773_v44, %v779_v50 }
 0x4d5   : > { %v781_v52 = vmul.f32 1.442695, %v780_v51 }
 0x4d6   : > { %v789_v63 = vpop.permute.xlu0 %788 }
 0x4d7   : > { %1753 = vpow2.f32 %v781_v52 }
 0x4dd   : > { %v1752_v53 = vpop.eup %1751 }
 0x4de   : > { %v614_v54 = vsel %vm607_vm4, %v1752_v53, 0.0 }
 0x4df   : > { %615 = vadd.xlane.f32.xlu1 %v614_v54 }
 0x4e1   : > { %v1754_v55 = vpop.eup %1753 }
 0x4e2   : > { %v783_v56 = vsel %vm607_vm4, %v1754_v55, 0.0 }
 0x4e3   : > { %784 = vadd.xlane.f32.xlu1 %v783_v56 }
 0x4f4   : > { %619 = vrot.lane.b32.xlu1 %v1909_v36, %s1782_s25 }
 0x4f8   : > { %1015 = vrot.lane.b32.xlu1 %v1909_v36, %s1783_s26  ;;  %s327_s26 = scalar_lea.vmem %s2015_s9, %s1565_s19 }
 0x4fc   : > { %1013 = vrot.lane.b32.xlu1 %v1909_v36, %s1784_s27 }
 0x56c   : > { %v616_v58 = vpop.xlane.xlu1 %615 }
 0x56d   : > { %1755 = vrcp.f32 %v616_v58 }
 0x570   : > { %v785_v59 = vpop.xlane.xlu1 %784 }
 0x571   : > { %1757 = vrcp.f32 %v785_v59 }
 0x574   : > { %v620_v60 = vpop.permute.xlu1 %619 }
 0x575   : > { %1661 = vmatpush3.msk.msra.mxu1 %vm625_vm5, %v620_v60 }
 0x576   : > { %1670 = vmatprep.subr.mxu1 %v1777_v6 }
 0x577   : > { %v1756_v61 = vpop.eup %1755 }
 0x578   : > { %v618_v62 = vmul.f32 %v1756_v61, %v1752_v53  ;;  %v1016_v5 = vpop.permute.xlu1 %1015  ;;  %v1596_v53 = vld [vmem:[%s2014_s8] ss:$0 sm:$0xff] }
 0x57a   : > { %1663 = vmatmul.mubr.msk.f32.vlgmr.msra.gmra.mrb[2].mxu1 %vm621_vm6, %v618_v62 }
 0x57b   : > { %v1758_v0 = vpop.eup %1757  ;;  %1671 = vmatpush3.msk.msra.mxu1 %vm625_vm5, %v789_v63  ;;  %1672 = vmatprep.mubr.msk.f32.mxu1 %vm1776_vm0, %v1777_v6 }
 0x57c   : > { %v787_v1 = vmul.f32 %v1758_v0, %v1754_v55  ;;  %1680 = vmatprep.subr.mxu1 %v1777_v6  ;;  %v1014_v9 = vpop.permute.xlu1 %1013 }
 0x57e   : > { %1673 = vmatmul.mubr.msk.f32.vlgmr.msra.gmra.mrb[4].mxu1 %vm621_vm6, %v787_v1 }
 0x57f   : > { %1682 = vmatprep.mubr.msk.f32.mxu1 %vm1776_vm0, %v1777_v6  ;;  %1681 = vmatpush3.msra.mxu1 %v698_v2 }
 0x580   : > { %1690 = vmatprep.subr.mxu1 %v1777_v6 }
 0x64d   : > { %v694_v3 = vpop.f32.mrb[2].mxu1 }
 0x64e   : > { %v1664_v4 = vpop.f32.mrb[3].mxu1  ;;  %1683 = vmatmul.mubr.msk.f32.vlgmr.msra.gmra.mrb[6].mxu1 %vm532_vm3, %v694_v3 }
 0x64f   : > { %1692 = vmatprep.mubr.msk.f32.mxu1 %vm1776_vm0, %v1777_v6 }
 0x651   : > { %v861_v7 = vpop.f32.mrb[4].mxu1 }
 0x652   : > { %v1674_v8 = vpop.f32.mrb[5].mxu1  ;;  %1678 = vmatmul.mubr.msk.f32.vlgmr.msra.gmra.mrb[6].mxu0 %vm532_vm3, %v861_v7 }
 0x653   : > { %1686 = vmatpush3.xpose.msk.msra.mxu0 %vm532_vm3, %v1016_v5  ;;  %1687 = vmatprep.mubr.msk.f32.mxu0 %vm1776_vm0, %v1777_v6 }
 0x654   : > { %1695 = vmatprep.subr.mxu0 %v1777_v6 }
 0x656   : > { %1688 = vmatmul.mubr.msk.f32.vlgmr.msra.gmra.mrb[8].mxu0 %vm532_vm3, %v1014_v9 }
 0x657   : > { %1697 = vmatprep.mubr.msk.f32.mxu0 %vm1776_vm0, %v1777_v6  ;;  %1696 = vmatpush3.msra.mxu0 %v1588_v30 }
 0x658   : > { %1705 = vmatprep.subr.mxu0 %v1777_v6 }
 0x721   : > { %v1009_v10 = vpop.f32.mrb[6].mxu1 }
 0x722   : > { %v1684_v12 = vpop.f32.mrb[7].mxu1 }
 0x725   : > { %v936_v13 = vpop.f32.mrb[6].mxu0 }
 0x726   : > { %v1010_v14 = vadd.f32 %v1009_v10, %v936_v13  ;;  %v1679_v15 = vpop.f32.mrb[7].mxu0 }
 0x729   : > { %v1087_v16 = vpop.f32.mrb[8].mxu0 }
 0x72a   : > { %v1689_v17 = vpop.f32.mrb[9].mxu0  ;;  %v1091_v18 = vsel %vm607_vm4, %v1087_v16, -inf }
 0x72b   : > { %1092 = vmax.xlane.f32.xlu1 %v1091_v18 }
 0x73c   : > { %1102 = vrot.lane.b32.xlu1 %v1909_v36, %s1785_s13 }
 0x740   : > { %1255 = vrot.lane.b32.xlu1 %v1909_v36, %s1786_s14 }
 0x7b8   : > { %v1093_v19 = vpop.xlane.xlu1 %1092 }
 0x7b9   : > { %v1094_v20 = vsub.f32 %v1087_v16, %v1093_v19 }
 0x7bb   : > { %v1095_v21 = vmul.f32 1.442695, %v1094_v20 }
 0x7bc   : > { %v1103_v22 = vpop.permute.xlu1 %1102 }
 0x7bd   : > { %1759 = vpow2.f32 %v1095_v21  ;;  %1691 = vmatpush3.msk.msra.mxu1 %vm625_vm5, %v1103_v22 }
 0x7be   : > { %1700 = vmatprep.subr.mxu1 %v1777_v6 }
 0x7c0   : > { %v1256_v29 = vpop.permute.xlu1 %1255 }
 0x7c7   : > { %v1760_v23 = vpop.eup %1759 }
 0x7c8   : > { %v1097_v24 = vsel %vm607_vm4, %v1760_v23, 0.0 }
 0x7c9   : > { %1098 = vadd.xlane.f32.xlu0 %v1097_v24 }
 0x7df   : > { %1257 = vrot.lane.b32.xlu0 %v1909_v36, %s1787_s15 }
 0x856   : > { %v1099_v25 = vpop.xlane.xlu0 %1098 }
 0x857   : > { %1761 = vrcp.f32 %v1099_v25 }
 0x85a   : > { %v1258_v28 = vpop.permute.xlu0 %1257 }
 0x861   : > { %v1762_v26 = vpop.eup %1761 }
 0x862   : > { %v1101_v27 = vmul.f32 %v1762_v26, %v1760_v23 }
 0x864   : > { %1693 = vmatmul.mubr.msk.f32.vlgmr.msra.gmra.mrb[8].mxu1 %vm621_vm6, %v1101_v27 }
 0x865   : > { %1701 = vmatpush3.xpose.msk.msra.mxu1 %vm532_vm3, %v1258_v28  ;;  %1702 = vmatprep.mubr.msk.f32.mxu1 %vm1776_vm0, %v1777_v6 }
 0x866   : > { %1710 = vmatprep.subr.mxu1 %v1777_v6 }
 0x868   : > { %1703 = vmatmul.mubr.msk.f32.vlgmr.msra.gmra.mrb[10].mxu1 %vm532_vm3, %v1256_v29 }
 0x869   : > { %1712 = vmatprep.mubr.msk.f32.mxu1 %vm1776_vm0, %v1777_v6 }
 0x937   : > { %v1175_v31 = vpop.f32.mrb[8].mxu1 }
 0x938   : > { %v1694_v32 = vpop.f32.mrb[9].mxu1  ;;  %1698 = vmatmul.mubr.msk.f32.vlgmr.msra.gmra.mrb[10].mxu0 %vm532_vm3, %v1175_v31 }
 0x939   : > { %1707 = vmatprep.mubr.msk.f32.mxu0 %vm1776_vm0, %v1777_v6  ;;  %v1594_v6 = vld [vmem:[%s2013_s7 + $0x18] sm:$0xff] }
 0x93a   : > { %1711 = vmatpush3.msra.mxu1 %v1594_v6 }
 0x93b   : > { %v1329_v33 = vpop.f32.mrb[10].mxu1 }
 0x93c   : > { %v1704_v34 = vpop.f32.mrb[11].mxu1  ;;  %v1333_v35 = vsel %vm607_vm4, %v1329_v33, -inf }
 0x93d   : > { %1334 = vmax.xlane.f32.xlu1 %v1333_v35 }
 0x9ca   : > { %v1335_v37 = vpop.xlane.xlu1 %1334 }
 0x9cb   : > { %v1336_v38 = vsub.f32 %v1329_v33, %v1335_v37 }
 0x9cd   : > { %v1337_v39 = vmul.f32 1.442695, %v1336_v38 }
 0x9cf   : > { %1763 = vpow2.f32 %v1337_v39 }
 0x9d9   : > { %v1764_v40 = vpop.eup %1763 }
 0x9da   : > { %v1339_v41 = vsel %vm607_vm4, %v1764_v40, 0.0 }
 0x9db   : > { %1340 = vadd.xlane.f32.xlu0 %v1339_v41 }
 0x9f1   : > { %1344 = vrot.lane.b32.xlu0 %v1909_v36, %s1788_s18 }
 0xa0b   : > { %v1250_v42 = vpop.f32.mrb[10].mxu0 }
 0xa0c   : > { %v1254_v43 = vadd.f32 %v1250_v42, %v1010_v14  ;;  %v1699_v44 = vpop.f32.mrb[11].mxu0 }
 0xa68   : > { %v1341_v45 = vpop.xlane.xlu0 %1340 }
 0xa69   : > { %1765 = vrcp.f32 %v1341_v45 }
 0xa6c   : > { %v1345_v46 = vpop.permute.xlu0 %1344 }
 0xa6d   : > { %1706 = vmatpush3.msk.msra.mxu0 %vm625_vm5, %v1345_v46 }
 0xa73   : > { %v1766_v47 = vpop.eup %1765 }
 0xa74   : > { %v1343_v48 = vmul.f32 %v1766_v47, %v1764_v40 }
 0xa76   : > { %1708 = vmatmul.mubr.msk.f32.vlgmr.msra.gmra.mrb[12].mxu0 %vm621_vm6, %v1343_v48 }
 0xb49   : > { %v1417_v49 = vpop.f32.mrb[12].mxu0 }
 0xb4a   : > { %v1709_v36 = vpop.f32.mrb[13].mxu0  ;;  %1713 = vmatmul.mubr.msk.f32.vlgmr.msra.gmra.mrb[12].mxu1 %vm532_vm3, %v1417_v49 }
 0xc1d   : > { %v1492_v50 = vpop.f32.mrb[12].mxu1 }
 0xc1e   : > { %v1496_v51 = vadd.f32 %v1492_v50, %v1254_v43  ;;  %v1714_v52 = vpop.f32.mrb[13].mxu1 }
 0xc20   : > { %v1497_v54 = vadd.f32 %v1496_v51, %v1878_v11 }
 0xc22   : > { %v1505_v55 = vadd.f32 %v1596_v53, %v1497_v54 }
 0xc24   : > { %1506 = vst.msk [vmem:[%s327_s26] sm:$0xf] %vm416_vm2, %v1505_v55 }
 0xc25 PF: > { %s19_s30 = sadd.s32 1, %s1773_s30  }
 0xc26   : > { %p16_p4 = scmp.ge.s32.totalorder %s19_s30, 4  }
 0xc28   :  { %18 = sbr.rel (!%p16_p4) target bundleno = 1 (0x1), region = 89 }

// kernel: cross_frame_attention_block.6
= control target key start
LH: loop header
LB: loop body
LE: loop exit
PB: predicated region body
PF: predicated region fallthrough
CT: control target
= control target key end

     0   :  { %s1813_s27 = smov 0   ;;  %s2338_s0 = inlined_call_operand.vmem [shape: f32[8,8,32], index: 0, kind: input, shape index: {}]   ;;  %s2339_s1 = inlined_call_operand.vmem [shape: f32[8,1,32], index: 1, kind: input, shape index: {}]   ;;  %s2340_s2 = inlined_call_operand.vmem [shape: f32[1,32], index: 2, kind: input, shape index: {}]   ;;  %s2341_s3 = inlined_call_operand.vmem [shape: f32[1,32], index: 3, kind: input, shape index: {}]   ;;  %s2342_s4 = inlined_call_operand.vmem [shape: f32[32,96], index: 4, kind: input, shape index: {}]   ;;  %s2343_s5 = inlined_call_operand.vmem [shape: f32[1,96], index: 5, kind: input, shape index: {}]   ;;  %s2344_s6 = inlined_call_operand.vmem [shape: f32[8,4,9,8], index: 6, kind: output, shape index: {0}]   ;;  %s2345_s7 = inlined_call_operand.vmem [shape: f32[8,4,9,8], index: 7, kind: output, shape index: {1}]   ;;  %s2346_s8 = inlined_call_operand.vmem [shape: f32[8,4,9,8], index: 8, kind: output, shape index: {2}]  }
   0x1 LB: > { %s1476_s28 = sadd.s32 4294967295, %s1755_s27   ;;  %p1480_p0 = scmp.ge.s32.totalorder %s1755_s27, 1  ;;  %s1755_s27 = sphi %s1813_s27, %s19_s27  }
   0x2   : > { %p278_p1 = scmp.lt.s32.totalorder %s1755_s27, 3 }
   0x4   : > { %p279_p2 = pnand %p1480_p0, %p278_p1 }
   0x5   : > { %s1481_s29 = sshll.u32 (!%p279_p2), %s1476_s28, 2  ;;  %vm369_vm0 = vcmask (!%p279_p2), 253952   ;;  %vm365_vm1 = vcmask (!%p279_p2), 261120   ;;  %v410_v56 = vld [vmem:[%s2342_s4] sm:$0xff] (!%p279_p2)  ;;  %v411_v57 = vld [vmem:[%s2342_s4 + $0x8] sm:$0xff] (!%p279_p2)  ;;  %v412_v59 = vld [vmem:[%s2342_s4 + $0x10] sm:$0xff] (!%p279_p2) }
   0x6   : > { %282 = sbr.rel (%p279_p2) target bundleno = 841 (0x349), region = 44  ;;  %p330_p3 = scmp.lt.s32.totalorder (!%p279_p2), %s1481_s29, 7  ;;  %v1885_v58 = vpack.c.bf16 (!%p279_p2), %v411_v57, %v410_v56  ;;  %v413_v60 = vld [vmem:[%s2342_s4 + $0x18] sm:$0xff] (!%p279_p2)  ;;  %vm504_vm2 = vcmask (!%p279_p2), 57344   ;;  %vm502_vm3 = vcmask (!%p279_p2), 64512  }
   0x7   : > { %v1897_v61 = vpack.c.bf16 (!%p279_p2), %v413_v60, %v412_v59  ;;  %s1758_s13 = smov (!%p279_p2), 64   ;;  %s1760_s15 = smov (!%p279_p2), 88  }
   0x8   : > { %1683 = vmatprep.subr.bf16.mxu0 (!%p279_p2), %v1885_v58  ;;  %1691 = vmatprep.subr.bf16.mxu1 (!%p279_p2), %v1885_v58  ;;  %s1761_s16 = smov (!%p279_p2), 56   ;;  %s1762_s17 = smov (!%p279_p2), 112  }
   0x9   : > { %1685 = vmatpush3.bf16.msra.mxu0 (!%p279_p2), %v1885_v58  ;;  %1693 = vmatpush3.bf16.msra.mxu1 (!%p279_p2), %v1885_v58  ;;  %s1763_s18 = smov (!%p279_p2), 80   ;;  %s1764_s19 = smov (!%p279_p2), 48  }
   0xa   : > { %1687 = vmatprep.subr.bf16.mxu0 (!%p279_p2), %v1897_v61  ;;  %1695 = vmatprep.subr.bf16.mxu1 (!%p279_p2), %v1897_v61  ;;  %s1765_s20 = smov (!%p279_p2), 104   ;;  %s1766_s21 = smov (!%p279_p2), 72  }
   0xb   : > { %s1767_s22 = smov (!%p279_p2), 40  }
   0xd   : > { %s2348_s29 = smov (!%p330_p3, %s1481_s29), 7  ;;  %1689 = vmatpush3.bf16.msra.mxu0 %v1897_v61  ;;  %1697 = vmatpush3.bf16.msra.mxu1 %v1897_v61 }
   0xe   : > { %s338_s10 = scalar_lea.vmem %s2339_s1, %s2348_s29  ;;  %s1482_s11 = sshll.u32 %s2348_s29, 3  ;;  %1699 = vmatprep.subr.bf16.mxu0 %v1885_v58  ;;  %1707 = vmatprep.subr.bf16.mxu1 %v1885_v58 }
   0xf   : > { %v1517_v0 = vld [vmem:[%s338_s10 + $0x1] sm:$0x1]  ;;  %v362_v1 = vld [vmem:[%s338_s10] sm:$0x1]  ;;  %s333_s14 = scalar_lea.vmem %s2338_s0, %s1482_s11  ;;  %v1548_v8 = vld [vmem:[%s338_s10 + $0x2] sm:$0x1] }
  0x10   : > { %v614_v2 = vsel %vm369_vm0, %v1517_v0, 0.0  ;;  %v370_v3 = vsel %vm369_vm0, %v362_v1, 0.0  ;;  %v1516_v4 = vld [vmem:[%s333_s14 + $0x8] sm:$0xff]  ;;  %v361_v5 = vld [vmem:[%s333_s14] sm:$0xff]  ;;  %v1547_v9 = vld [vmem:[%s333_s14 + $0x10] sm:$0xff]  ;;  %v858_v10 = vsel %vm369_vm0, %v1548_v8, 0.0 }
  0x11   : > { %615 = vadd.xlane.f32.xlu1 %v614_v2  ;;  %371 = vadd.xlane.f32.xlu0 %v370_v3  ;;  %v611_v6 = vsel %vm365_vm1, %v1516_v4, 0.0  ;;  %v366_v7 = vsel %vm365_vm1, %v361_v5, 0.0  ;;  %v855_v11 = vsel %vm365_vm1, %v1547_v9, 0.0  ;;  %v1579_v12 = vld [vmem:[%s338_s10 + $0x3] sm:$0x1]  ;;  %v1578_v13 = vld [vmem:[%s333_s14 + $0x18] sm:$0xff] }
  0x12   : > { %v1102_v14 = vsel %vm369_vm0, %v1579_v12, 0.0  ;;  %v1099_v15 = vsel %vm365_vm1, %v1578_v13, 0.0  ;;  %s1934_s28 = sshll.u32 %s2348_s29, 6  ;;  %s1757_s29 = smov 96  }
  0x13   : > { %s1943_s12 = scalar_lea.vmem %s2344_s6, %s1934_s28  ;;  %s1759_s14 = smov 120  }
  0x14   : > { %s2087_s25 = scalar_lea.vmem %s2345_s7, %s1934_s28  ;;  %s2099_s9 = scalar_lea.vmem %s2346_s8, %s1934_s28 }
  0x15   : > { %612 = vadd.xlane.f32.xlu1 %v611_v6  ;;  %367 = vadd.xlane.f32.xlu0 %v366_v7 }
  0x19   : > { %859 = vadd.xlane.f32.xlu1 %v858_v10  ;;  %856 = vadd.xlane.f32.xlu0 %v855_v11 }
  0x1d   : > { %1103 = vadd.xlane.f32.xlu1 %v1102_v14  ;;  %1100 = vadd.xlane.f32.xlu0 %v1099_v15 }
  0x9e   : > { %v616_v16 = vpop.xlane.xlu1 %615  ;;  %v372_v17 = vpop.xlane.xlu0 %371 }
  0x9f   : > { %v618_v18 = vmul.f32 0.03125, %v616_v16  ;;  %v375_v19 = vmul.f32 0.03125, %v372_v17 }
  0xa1   : > { %v1839_v20 = vsub.f32 %v1517_v0, %v618_v18  ;;  %v1841_v21 = vsub.f32 %v362_v1, %v375_v19 }
  0xa2   : > { %v613_v22 = vpop.xlane.xlu1 %612  ;;  %v368_v23 = vpop.xlane.xlu0 %367 }
  0xa3   : > { %v617_v24 = vmul.f32 0.03125, %v613_v22  ;;  %v374_v25 = vmul.f32 0.03125, %v368_v23  ;;  %v379_v26 = vmul.f32 %v1841_v21, %v1841_v21  ;;  %v622_v27 = vmul.f32 %v1839_v20, %v1839_v20 }
  0xa5   : > { %v1847_v28 = vsub.f32 %v1516_v4, %v617_v24  ;;  %v1849_v29 = vsub.f32 %v361_v5, %v374_v25  ;;  %v383_v30 = vsel %vm369_vm0, %v379_v26, 0.0  ;;  %v626_v32 = vsel %vm369_vm0, %v622_v27, 0.0  ;;  %v1493_v27 = vld [vmem:[%s2340_s2] ss:$0 sm:$0xff] }
  0xa6   : > { %384 = vadd.xlane.f32.xlu1 %v383_v30  ;;  %v860_v31 = vpop.xlane.xlu1 %859  ;;  %v857_v33 = vpop.xlane.xlu0 %856 }
  0xa7   : > { %v862_v34 = vmul.f32 0.03125, %v860_v31  ;;  %v378_v35 = vmul.f32 %v1849_v29, %v1849_v29  ;;  %v861_v36 = vmul.f32 0.03125, %v857_v33  ;;  %v621_v37 = vmul.f32 %v1847_v28, %v1847_v28 }
  0xa9   : > { %v1857_v38 = vsub.f32 %v1548_v8, %v862_v34  ;;  %v380_v39 = vsel %vm365_vm1, %v378_v35, 0.0  ;;  %v1860_v40 = vsub.f32 %v1547_v9, %v861_v36  ;;  %v623_v42 = vsel %vm365_vm1, %v621_v37, 0.0  ;;  %v1494_v35 = vld [vmem:[%s2341_s3] ss:$0 sm:$0xff] }
  0xaa   : > { %627 = vadd.xlane.f32.xlu1 %v626_v32  ;;  %v1104_v41 = vpop.xlane.xlu1 %1103  ;;  %381 = vadd.xlane.f32.xlu0 %v380_v39  ;;  %v1101_v43 = vpop.xlane.xlu0 %1100 }
  0xab   : > { %v1106_v44 = vmul.f32 0.03125, %v1104_v41  ;;  %v866_v45 = vmul.f32 %v1857_v38, %v1857_v38  ;;  %v1105_v46 = vmul.f32 0.03125, %v1101_v43  ;;  %v865_v47 = vmul.f32 %v1860_v40, %v1860_v40 }
  0xad   : > { %v1867_v48 = vsub.f32 %v1579_v12, %v1106_v44  ;;  %v870_v49 = vsel %vm369_vm0, %v866_v45, 0.0  ;;  %v1870_v50 = vsub.f32 %v1578_v13, %v1105_v46  ;;  %v867_v52 = vsel %vm365_vm1, %v865_v47, 0.0 }
  0xae   : > { %871 = vadd.xlane.f32.xlu1 %v870_v49  ;;  %624 = vadd.xlane.f32.xlu0 %v623_v42 }
  0xaf   : > { %v1110_v51 = vmul.f32 %v1867_v48, %v1867_v48  ;;  %v1109_v53 = vmul.f32 %v1870_v50, %v1870_v50 }
  0xb1   : > { %v1114_v54 = vsel %vm369_vm0, %v1110_v51, 0.0  ;;  %v1111_v55 = vsel %vm365_vm1, %v1109_v53, 0.0 }
  0xb2   : > { %1115 = vadd.xlane.f32.xlu1 %v1114_v54  ;;  %868 = vadd.xlane.f32.xlu0 %v867_v52 }
  0xb6   : > { %1112 = vadd.xlane.f32.xlu0 %v1111_v55 }
 0x133   : > { %v385_v62 = vpop.xlane.xlu1 %384 }
 0x134   : > { %v387_v63 = vmul.f32 0.03125, %v385_v62 }
 0x136   : > { %v389_v0 = vadd.f32 1e-05, %v387_v63 }
 0x137   : > { %v628_v1 = vpop.xlane.xlu1 %627  ;;  %v382_v2 = vpop.xlane.xlu0 %381 }
 0x138   : > { %1733 = vrsqrt.f32 %v389_v0  ;;  %v630_v3 = vmul.f32 0.03125, %v628_v1  ;;  %v386_v4 = vmul.f32 0.03125, %v382_v2 }
 0x13a   : > { %v632_v5 = vadd.f32 1e-05, %v630_v3  ;;  %v388_v6 = vadd.f32 1e-05, %v386_v4 }
 0x13b   : > { %v872_v7 = vpop.xlane.xlu1 %871  ;;  %v625_v8 = vpop.xlane.xlu0 %624 }
 0x13c   : > { %1735 = vrsqrt.f32 %v632_v5  ;;  %v874_v9 = vmul.f32 0.03125, %v872_v7  ;;  %v629_v10 = vmul.f32 0.03125, %v625_v8 }
 0x13d   : > { %1737 = vrsqrt.f32 %v388_v6 }
 0x13e   : > { %v876_v11 = vadd.f32 1e-05, %v874_v9  ;;  %v631_v12 = vadd.f32 1e-05, %v629_v10 }
 0x13f   : > { %v1116_v13 = vpop.xlane.xlu1 %1115  ;;  %v869_v14 = vpop.xlane.xlu0 %868 }
 0x140   : > { %1739 = vrsqrt.f32 %v876_v11  ;;  %v1118_v15 = vmul.f32 0.03125, %v1116_v13  ;;  %v873_v16 = vmul.f32 0.03125, %v869_v14 }
 0x141   : > { %1741 = vrsqrt.f32 %v631_v12 }
 0x142   : > { %v1734_v17 = vpop.eup %1733  ;;  %v1120_v18 = vadd.f32 1e-05, %v1118_v15  ;;  %v875_v19 = vadd.f32 1e-05, %v873_v16 }
 0x143   : > { %v1113_v22 = vpop.xlane.xlu0 %1112  ;;  %v393_v24 = vmul.f32 %v1734_v17, %v1841_v21 }
 0x144   : > { %1743 = vrsqrt.f32 %v1120_v18  ;;  %v1117_v23 = vmul.f32 0.03125, %v1113_v22 }
 0x145   : > { %1745 = vrsqrt.f32 %v875_v19  ;;  %v401_v32 = vmul.f32 %v1493_v27, %v393_v24 }
 0x146   : > { %v1736_v25 = vpop.eup %1735  ;;  %v1119_v26 = vadd.f32 1e-05, %v1117_v23 }
 0x147   : > { %v1738_v30 = vpop.eup %1737  ;;  %v636_v33 = vmul.f32 %v1736_v25, %v1839_v20  ;;  %v409_v42 = vadd.f32 %v1494_v35, %v401_v32 }
 0x148   : > { %1747 = vrsqrt.f32 %v1119_v26  ;;  %v392_v31 = vmul.f32 %v1738_v30, %v1849_v29 }
 0x149   : > { %v644_v43 = vmul.f32 %v1493_v27, %v636_v33 }
 0x14a   : > { %v1740_v34 = vpop.eup %1739  ;;  %v400_v36 = vmul.f32 %v1493_v27, %v392_v31 }
 0x14b   : > { %v1742_v21 = vpop.eup %1741  ;;  %v880_v41 = vmul.f32 %v1740_v34, %v1857_v38  ;;  %v652_v49 = vadd.f32 %v1494_v35, %v644_v43 }
 0x14c   : > { %v408_v37 = vadd.f32 %v1494_v35, %v400_v36  ;;  %v635_v39 = vmul.f32 %v1742_v21, %v1847_v28 }
 0x14d   : > { %v888_v28 = vmul.f32 %v1493_v27, %v880_v41 }
 0x14e   : > { %v1744_v44 = vpop.eup %1743  ;;  %1646 = vmatprep.mubr.msk.f32.mxu0 %vm365_vm1, %v408_v37  ;;  %v643_v29 = vmul.f32 %v1493_v27, %v635_v39 }
 0x14f   : > { %v1746_v45 = vpop.eup %1745  ;;  %1647 = vmatmul.mubr.msk.f32.vlgmr.msra.gmra.mrb[0].mxu0 %vm365_vm1, %v409_v42  ;;  %v1124_v47 = vmul.f32 %v1744_v44, %v1867_v48  ;;  %v896_v53 = vadd.f32 %v1494_v35, %v888_v28 }
 0x150   : > { %1701 = vmatpush3.bf16.msra.mxu0 %v1885_v58  ;;  %v651_v20 = vadd.f32 %v1494_v35, %v643_v29  ;;  %v879_v46 = vmul.f32 %v1746_v45, %v1860_v40 }
 0x151   : > { %1703 = vmatprep.subr.bf16.mxu0 %v1897_v61  ;;  %v1132_v54 = vmul.f32 %v1493_v27, %v1124_v47 }
 0x152   : > { %v1748_v38 = vpop.eup %1747  ;;  %1657 = vmatprep.mubr.msk.f32.mxu1 %vm365_vm1, %v651_v20  ;;  %v887_v51 = vmul.f32 %v1493_v27, %v879_v46 }
 0x153   : > { %1658 = vmatmul.mubr.msk.f32.vlgmr.msra.gmra.mrb[0].mxu1 %vm365_vm1, %v652_v49  ;;  %v1123_v52 = vmul.f32 %v1748_v38, %v1870_v50  ;;  %v1140_v56 = vadd.f32 %v1494_v35, %v1132_v54  ;;  %v1495_v50 = vld [vmem:[%s2343_s5] ss:$0 sm:$0xff] }
 0x154   : > { %1705 = vmatpush3.bf16.msra.mxu0 %v1897_v61  ;;  %1709 = vmatpush3.bf16.msra.mxu1 %v1885_v58  ;;  %v895_v40 = vadd.f32 %v1494_v35, %v887_v51 }
 0x155   : > { %1711 = vmatprep.subr.bf16.mxu1 %v1897_v61  ;;  %v1131_v48 = vmul.f32 %v1493_v27, %v1123_v52 }
 0x156   : > { %1668 = vmatprep.mubr.msk.f32.mxu0 %vm365_vm1, %v895_v40 }
 0x157   : > { %1669 = vmatmul.mubr.msk.f32.vlgmr.msra.gmra.mrb[2].mxu0 %vm365_vm1, %v896_v53  ;;  %v1139_v55 = vadd.f32 %v1494_v35, %v1131_v48 }
 0x158   : > { %1713 = vmatpush3.bf16.msra.mxu1 %v1897_v61 }
 0x159   : > { %1679 = vmatprep.mubr.msk.f32.mxu1 %vm365_vm1, %v1139_v55 }
 0x15b   : > { %1680 = vmatmul.mubr.msk.f32.vlgmr.msra.gmra.mrb[2].mxu1 %vm365_vm1, %v1140_v56 }
 0x222   : > { %v1648_v57 = vpop.f32.mrb[0].mxu0 }
 0x223   : > { %v499_v58 = vadd.f32 %v1648_v57, %v1495_v50  ;;  %v493_v59 = vpop.f32.mrb[1].mxu0 }
 0x224   : > { %v1945_v60 = vadd.f32 %v1495_v50, %v493_v59 }
 0x225   : > { %505 = vst.msk [vmem:[%s1943_s12 + $0x8] sm:$0x1] %vm504_vm2, %v499_v58  ;;  %510 = vrot.lane.b32.xlu1 %v499_v58, %s1757_s29 }
 0x226   : > { %503 = vst.msk [vmem:[%s1943_s12] sm:$0xff] %vm502_vm3, %v1945_v60  ;;  %508 = vrot.lane.b32.xlu0 %v1945_v60, %s1757_s29  ;;  %v1659_v61 = vpop.f32.mrb[0].mxu1 }
 0x227   : > { %v1955_v62 = vadd.f32 %v1659_v61, %v1495_v50  ;;  %v736_v63 = vpop.f32.mrb[1].mxu1 }
 0x228   : > { %v1957_v0 = vadd.f32 %v1495_v50, %v736_v63 }
 0x229   : > { %1524 = vst.msk [vmem:[%s1943_s12 + $0x48] sm:$0x1] %vm504_vm2, %v1955_v62  ;;  %518 = vrot.lane.b32.xlu1 %v499_v58, %s1758_s13 }
 0x22a   : > { %1523 = vst.msk [vmem:[%s1943_s12 + $0x40] sm:$0xff] %vm502_vm3, %v1957_v0  ;;  %524 = vrot.lane.b32.xlu0 %v1945_v60, %s1759_s14  ;;  %v1670_v1 = vpop.f32.mrb[2].mxu0 }
 0x22b   : > { %v1968_v2 = vadd.f32 %v1670_v1, %v1495_v50  ;;  %v980_v3 = vpop.f32.mrb[3].mxu0 }
 0x22c   : > { %v1970_v4 = vadd.f32 %v1495_v50, %v980_v3 }
 0x22d   : > { %1555 = vst.msk [vmem:[%s1943_s12 + $0x88] sm:$0x1] %vm504_vm2, %v1968_v2  ;;  %526 = vrot.lane.b32.xlu1 %v499_v58, %s1759_s14 }
 0x22e   : > { %1554 = vst.msk [vmem:[%s1943_s12 + $0x80] sm:$0xff] %vm502_vm3, %v1970_v4  ;;  %533 = vrot.lane.b32.xlu0 %v1945_v60, %s1760_s15  ;;  %v1681_v5 = vpop.f32.mrb[2].mxu1 }
 0x22f   : > { %v1981_v6 = vadd.f32 %v1681_v5, %v1495_v50  ;;  %v1224_v7 = vpop.f32.mrb[3].mxu1 }
 0x230   : > { %v1983_v8 = vadd.f32 %v1495_v50, %v1224_v7 }
 0x231   : > { %1586 = vst.msk [vmem:[%s1943_s12 + $0xc8] sm:$0x1] %vm504_vm2, %v1981_v6  ;;  %535 = vrot.lane.b32.xlu1 %v499_v58, %s1760_s15 }
 0x232   : > { %1585 = vst.msk [vmem:[%s1943_s12 + $0xc0] sm:$0xff] %vm502_vm3, %v1983_v8  ;;  %542 = vrot.lane.b32.xlu0 %v1945_v60, %s1761_s16 }
 0x235   : > { %544 = vrot.lane.b32.xlu1 %v499_v58, %s1761_s16 }
 0x236   : > { %551 = vrot.lane.b32.xlu0 %v1945_v60, %s1762_s17 }
 0x239   : > { %553 = vrot.lane.b32.xlu1 %v499_v58, %s1762_s17 }
 0x23a   : > { %560 = vrot.lane.b32.xlu0 %v1945_v60, %s1763_s18 }
 0x23d   : > { %562 = vrot.lane.b32.xlu1 %v499_v58, %s1763_s18 }
 0x23e   : > { %569 = vrot.lane.b32.xlu0 %v1945_v60, %s1764_s19 }
 0x241   : > { %571 = vrot.lane.b32.xlu1 %v499_v58, %s1764_s19 }
 0x242   : > { %578 = vrot.lane.b32.xlu0 %v1945_v60, %s1765_s20 }
 0x245   : > { %580 = vrot.lane.b32.xlu1 %v499_v58, %s1765_s20 }
 0x246   : > { %587 = vrot.lane.b32.xlu0 %v1945_v60, %s1766_s21 }
 0x249   : > { %589 = vrot.lane.b32.xlu1 %v499_v58, %s1766_s21 }
 0x24a   : > { %596 = vrot.lane.b32.xlu0 %v1945_v60, %s1767_s22 }
 0x24d   : > { %598 = vrot.lane.b32.xlu1 %v499_v58, %s1767_s22 }
 0x24e   : > { %750 = vrot.lane.b32.xlu0 %v1957_v0, %s1757_s29 }
 0x251   : > { %752 = vrot.lane.b32.xlu1 %v1955_v62, %s1757_s29 }
 0x252   : > { %759 = vrot.lane.b32.xlu0 %v1957_v0, %s1758_s13 }
 0x255   : > { %761 = vrot.lane.b32.xlu1 %v1955_v62, %s1758_s13 }
 0x256   : > { %768 = vrot.lane.b32.xlu0 %v1957_v0, %s1759_s14 }
 0x259   : > { %770 = vrot.lane.b32.xlu1 %v1955_v62, %s1759_s14 }
 0x25a   : > { %777 = vrot.lane.b32.xlu0 %v1957_v0, %s1760_s15 }
 0x25d   : > { %779 = vrot.lane.b32.xlu1 %v1955_v62, %s1760_s15 }
 0x25e   : > { %786 = vrot.lane.b32.xlu0 %v1957_v0, %s1761_s16 }
 0x261   : > { %788 = vrot.lane.b32.xlu1 %v1955_v62, %s1761_s16 }
 0x262   : > { %795 = vrot.lane.b32.xlu0 %v1957_v0, %s1762_s17 }
 0x265   : > { %797 = vrot.lane.b32.xlu1 %v1955_v62, %s1762_s17 }
 0x266   : > { %804 = vrot.lane.b32.xlu0 %v1957_v0, %s1763_s18 }
 0x269   : > { %806 = vrot.lane.b32.xlu1 %v1955_v62, %s1763_s18 }
 0x26a   : > { %813 = vrot.lane.b32.xlu0 %v1957_v0, %s1764_s19 }
 0x26d   : > { %815 = vrot.lane.b32.xlu1 %v1955_v62, %s1764_s19 }
 0x26e   : > { %822 = vrot.lane.b32.xlu0 %v1957_v0, %s1765_s20 }
 0x271   : > { %824 = vrot.lane.b32.xlu1 %v1955_v62, %s1765_s20 }
 0x272   : > { %831 = vrot.lane.b32.xlu0 %v1957_v0, %s1766_s21 }
 0x275   : > { %833 = vrot.lane.b32.xlu1 %v1955_v62, %s1766_s21 }
 0x276   : > { %840 = vrot.lane.b32.xlu0 %v1957_v0, %s1767_s22 }
 0x279   : > { %842 = vrot.lane.b32.xlu1 %v1955_v62, %s1767_s22 }
 0x27a   : > { %994 = vrot.lane.b32.xlu0 %v1970_v4, %s1757_s29 }
 0x27d   : > { %516 = vrot.lane.b32.xlu1 %v1945_v60, %s1758_s13 }
 0x27e   : > { %1003 = vrot.lane.b32.xlu0 %v1970_v4, %s1758_s13 }
 0x281   : > { %996 = vrot.lane.b32.xlu1 %v1968_v2, %s1757_s29 }
 0x282   : > { %1012 = vrot.lane.b32.xlu0 %v1970_v4, %s1759_s14 }
 0x285   : > { %1005 = vrot.lane.b32.xlu1 %v1968_v2, %s1758_s13 }
 0x286   : > { %1021 = vrot.lane.b32.xlu0 %v1970_v4, %s1760_s15 }
 0x289   : > { %1014 = vrot.lane.b32.xlu1 %v1968_v2, %s1759_s14 }
 0x28a   : > { %1030 = vrot.lane.b32.xlu0 %v1970_v4, %s1761_s16 }
 0x28d   : > { %1023 = vrot.lane.b32.xlu1 %v1968_v2, %s1760_s15 }
 0x28e   : > { %1039 = vrot.lane.b32.xlu0 %v1970_v4, %s1762_s17 }
 0x291   : > { %1032 = vrot.lane.b32.xlu1 %v1968_v2, %s1761_s16 }
 0x292   : > { %1048 = vrot.lane.b32.xlu0 %v1970_v4, %s1763_s18 }
 0x295   : > { %1041 = vrot.lane.b32.xlu1 %v1968_v2, %s1762_s17 }
 0x296   : > { %1057 = vrot.lane.b32.xlu0 %v1970_v4, %s1764_s19 }
 0x297   : > { %v511_v9 = vpop.permute.xlu1 %510 }
 0x298   : > { %515 = vst.msk [vmem:[%s2087_s25 + $0x8] sm:$0x1] %vm504_vm2, %v511_v9  ;;  %v509_v10 = vpop.permute.xlu0 %508 }
 0x299   : > { %514 = vst.msk [vmem:[%s2087_s25] sm:$0xff] %vm502_vm3, %v509_v10  ;;  %1050 = vrot.lane.b32.xlu1 %v1968_v2, %s1763_s18 }
 0x29a   : > { %1066 = vrot.lane.b32.xlu0 %v1970_v4, %s1765_s20 }
 0x29b   : > { %v519_v11 = vpop.permute.xlu1 %518 }
 0x29c   : > { %523 = vst.msk [vmem:[%s2099_s9 + $0x8] sm:$0x1] %vm504_vm2, %v519_v11  ;;  %v525_v12 = vpop.permute.xlu0 %524 }
 0x29d   : > { %1498 = vst.msk [vmem:[%s1943_s12 + $0x10] sm:$0xff] %vm502_vm3, %v525_v12  ;;  %1059 = vrot.lane.b32.xlu1 %v1968_v2, %s1764_s19 }
 0x29e   : > { %1075 = vrot.lane.b32.xlu0 %v1970_v4, %s1766_s21 }
 0x29f   : > { %v527_v13 = vpop.permute.xlu1 %526 }
 0x2a0   : > { %1499 = vst.msk [vmem:[%s1943_s12 + $0x18] sm:$0x1] %vm504_vm2, %v527_v13  ;;  %v534_v14 = vpop.permute.xlu0 %533 }
 0x2a1   : > { %1500 = vst.msk [vmem:[%s2087_s25 + $0x10] sm:$0xff] %vm502_vm3, %v534_v14  ;;  %1068 = vrot.lane.b32.xlu1 %v1968_v2, %s1765_s20 }
 0x2a2   : > { %1084 = vrot.lane.b32.xlu0 %v1970_v4, %s1767_s22 }
 0x2a3   : > { %v536_v15 = vpop.permute.xlu1 %535 }
 0x2a4   : > { %1501 = vst.msk [vmem:[%s2087_s25 + $0x18] sm:$0x1] %vm504_vm2, %v536_v15  ;;  %v543_v16 = vpop.permute.xlu0 %542 }
 0x2a5   : > { %1502 = vst.msk [vmem:[%s2099_s9 + $0x10] sm:$0xff] %vm502_vm3, %v543_v16  ;;  %1077 = vrot.lane.b32.xlu1 %v1968_v2, %s1766_s21 }
 0x2a6   : > { %1238 = vrot.lane.b32.xlu0 %v1983_v8, %s1757_s29 }
 0x2a7   : > { %v545_v17 = vpop.permute.xlu1 %544 }
 0x2a8   : > { %1503 = vst.msk [vmem:[%s2099_s9 + $0x18] sm:$0x1] %vm504_vm2, %v545_v17  ;;  %v552_v18 = vpop.permute.xlu0 %551 }
 0x2a9   : > { %1504 = vst.msk [vmem:[%s1943_s12 + $0x20] sm:$0xff] %vm502_vm3, %v552_v18  ;;  %1086 = vrot.lane.b32.xlu1 %v1968_v2, %s1767_s22 }
 0x2aa   : > { %1247 = vrot.lane.b32.xlu0 %v1983_v8, %s1758_s13 }
 0x2ab   : > { %v554_v19 = vpop.permute.xlu1 %553 }
 0x2ac   : > { %1505 = vst.msk [vmem:[%s1943_s12 + $0x28] sm:$0x1] %vm504_vm2, %v554_v19  ;;  %v561_v22 = vpop.permute.xlu0 %560 }
 0x2ad   : > { %1506 = vst.msk [vmem:[%s2087_s25 + $0x20] sm:$0xff] %vm502_vm3, %v561_v22  ;;  %1240 = vrot.lane.b32.xlu1 %v1981_v6, %s1757_s29 }
 0x2ae   : > { %1256 = vrot.lane.b32.xlu0 %v1983_v8, %s1759_s14 }
 0x2af   : > { %v563_v23 = vpop.permute.xlu1 %562 }
 0x2b0   : > { %1507 = vst.msk [vmem:[%s2087_s25 + $0x28] sm:$0x1] %vm504_vm2, %v563_v23  ;;  %v570_v24 = vpop.permute.xlu0 %569 }
 0x2b1   : > { %1508 = vst.msk [vmem:[%s2099_s9 + $0x20] sm:$0xff] %vm502_vm3, %v570_v24  ;;  %1249 = vrot.lane.b32.xlu1 %v1981_v6, %s1758_s13 }
 0x2b2   : > { %1265 = vrot.lane.b32.xlu0 %v1983_v8, %s1760_s15 }
 0x2b3   : > { %v572_v25 = vpop.permute.xlu1 %571 }
 0x2b4   : > { %1509 = vst.msk [vmem:[%s2099_s9 + $0x28] sm:$0x1] %vm504_vm2, %v572_v25  ;;  %v579_v26 = vpop.permute.xlu0 %578 }
 0x2b5   : > { %1510 = vst.msk [vmem:[%s1943_s12 + $0x30] sm:$0xff] %vm502_vm3, %v579_v26  ;;  %1258 = vrot.lane.b32.xlu1 %v1981_v6, %s1759_s14 }
 0x2b6   : > { %1274 = vrot.lane.b32.xlu0 %v1983_v8, %s1761_s16 }
 0x2b7   : > { %v581_v27 = vpop.permute.xlu1 %580 }
 0x2b8   : > { %1511 = vst.msk [vmem:[%s1943_s12 + $0x38] sm:$0x1] %vm504_vm2, %v581_v27  ;;  %v588_v30 = vpop.permute.xlu0 %587 }
 0x2b9   : > { %1512 = vst.msk [vmem:[%s2087_s25 + $0x30] sm:$0xff] %vm502_vm3, %v588_v30  ;;  %1267 = vrot.lane.b32.xlu1 %v1981_v6, %s1760_s15 }
 0x2ba   : > { %1283 = vrot.lane.b32.xlu0 %v1983_v8, %s1762_s17 }
 0x2bb   : > { %v590_v31 = vpop.permute.xlu1 %589 }
 0x2bc   : > { %1513 = vst.msk [vmem:[%s2087_s25 + $0x38] sm:$0x1] %vm504_vm2, %v590_v31  ;;  %v597_v32 = vpop.permute.xlu0 %596 }
 0x2bd   : > { %1514 = vst.msk [vmem:[%s2099_s9 + $0x30] sm:$0xff] %vm502_vm3, %v597_v32  ;;  %1276 = vrot.lane.b32.xlu1 %v1981_v6, %s1761_s16 }
 0x2be   : > { %1292 = vrot.lane.b32.xlu0 %v1983_v8, %s1763_s18 }
 0x2bf   : > { %v599_v33 = vpop.permute.xlu1 %598 }
 0x2c0   : > { %1515 = vst.msk [vmem:[%s2099_s9 + $0x38] sm:$0x1] %vm504_vm2, %v599_v33  ;;  %v751_v34 = vpop.permute.xlu0 %750 }
 0x2c1   : > { %1525 = vst.msk [vmem:[%s2087_s25 + $0x40] sm:$0xff] %vm502_vm3, %v751_v34  ;;  %1285 = vrot.lane.b32.xlu1 %v1981_v6, %s1762_s17 }
 0x2c2   : > { %1301 = vrot.lane.b32.xlu0 %v1983_v8, %s1764_s19 }
 0x2c3   : > { %v753_v35 = vpop.permute.xlu1 %752 }
 0x2c4   : > { %1526 = vst.msk [vmem:[%s2087_s25 + $0x48] sm:$0x1] %vm504_vm2, %v753_v35  ;;  %v760_v36 = vpop.permute.xlu0 %759 }
 0x2c5   : > { %1294 = vrot.lane.b32.xlu1 %v1981_v6, %s1763_s18  ;;  %1527 = vst.msk [vmem:[%s2099_s9 + $0x40] sm:$0xff] %vm502_vm3, %v760_v36 }
 0x2c6   : > { %1310 = vrot.lane.b32.xlu0 %v1983_v8, %s1765_s20 }
 0x2c7   : > { %v762_v21 = vpop.permute.xlu1 %761 }
 0x2c8   : > { %1528 = vst.msk [vmem:[%s2099_s9 + $0x48] sm:$0x1] %vm504_vm2, %v762_v21  ;;  %v769_v37 = vpop.permute.xlu0 %768 }
 0x2c9   : > { %1529 = vst.msk [vmem:[%s1943_s12 + $0x50] sm:$0xff] %vm502_vm3, %v769_v37  ;;  %1303 = vrot.lane.b32.xlu1 %v1981_v6, %s1764_s19 }
 0x2ca   : > { %1319 = vrot.lane.b32.xlu0 %v1983_v8, %s1766_s21 }
 0x2cb   : > { %v771_v39 = vpop.permute.xlu1 %770 }
 0x2cc   : > { %1530 = vst.msk [vmem:[%s1943_s12 + $0x58] sm:$0x1] %vm504_vm2, %v771_v39  ;;  %v778_v41 = vpop.permute.xlu0 %777 }
 0x2cd   : > { %1531 = vst.msk [vmem:[%s2087_s25 + $0x50] sm:$0xff] %vm502_vm3, %v778_v41  ;;  %1312 = vrot.lane.b32.xlu1 %v1981_v6, %s1765_s20 }
 0x2ce   : > { %1328 = vrot.lane.b32.xlu0 %v1983_v8, %s1767_s22 }
 0x2cf   : > { %v780_v42 = vpop.permute.xlu1 %779 }
 0x2d0   : > { %1532 = vst.msk [vmem:[%s2087_s25 + $0x58] sm:$0x1] %vm504_vm2, %v780_v42  ;;  %v787_v43 = vpop.permute.xlu0 %786 }
 0x2d1   : > { %1533 = vst.msk [vmem:[%s2099_s9 + $0x50] sm:$0xff] %vm502_vm3, %v787_v43  ;;  %1321 = vrot.lane.b32.xlu1 %v1981_v6, %s1766_s21 }
 0x2d3   : > { %v789_v44 = vpop.permute.xlu1 %788 }
 0x2d4   : > { %1534 = vst.msk [vmem:[%s2099_s9 + $0x58] sm:$0x1] %vm504_vm2, %v789_v44  ;;  %v796_v29 = vpop.permute.xlu0 %795 }
 0x2d5   : > { %1535 = vst.msk [vmem:[%s1943_s12 + $0x60] sm:$0xff] %vm502_vm3, %v796_v29  ;;  %1330 = vrot.lane.b32.xlu1 %v1981_v6, %s1767_s22 }
 0x2d7   : > { %v798_v45 = vpop.permute.xlu1 %797 }
 0x2d8   : > { %1536 = vst.msk [vmem:[%s1943_s12 + $0x68] sm:$0x1] %vm504_vm2, %v798_v45  ;;  %v805_v20 = vpop.permute.xlu0 %804 }
 0x2d9   : > { %1537 = vst.msk [vmem:[%s2087_s25 + $0x60] sm:$0xff] %vm502_vm3, %v805_v20 }
 0x2db   : > { %v807_v46 = vpop.permute.xlu1 %806 }
 0x2dc   : > { %1538 = vst.msk [vmem:[%s2087_s25 + $0x68] sm:$0x1] %vm504_vm2, %v807_v46  ;;  %v814_v47 = vpop.permute.xlu0 %813 }
 0x2dd   : > { %1539 = vst.msk [vmem:[%s2099_s9 + $0x60] sm:$0xff] %vm502_vm3, %v814_v47 }
 0x2df   : > { %v816_v49 = vpop.permute.xlu1 %815 }
 0x2e0   : > { %1540 = vst.msk [vmem:[%s2099_s9 + $0x68] sm:$0x1] %vm504_vm2, %v816_v49  ;;  %v823_v28 = vpop.permute.xlu0 %822 }
 0x2e1   : > { %1541 = vst.msk [vmem:[%s1943_s12 + $0x70] sm:$0xff] %vm502_vm3, %v823_v28 }
 0x2e3   : > { %v825_v38 = vpop.permute.xlu1 %824 }
 0x2e4   : > { %1542 = vst.msk [vmem:[%s1943_s12 + $0x78] sm:$0x1] %vm504_vm2, %v825_v38  ;;  %v832_v51 = vpop.permute.xlu0 %831 }
 0x2e5   : > { %1543 = vst.msk [vmem:[%s2087_s25 + $0x70] sm:$0xff] %vm502_vm3, %v832_v51 }
 0x2e7   : > { %v834_v52 = vpop.permute.xlu1 %833 }
 0x2e8   : > { %1544 = vst.msk [vmem:[%s2087_s25 + $0x78] sm:$0x1] %vm504_vm2, %v834_v52  ;;  %v841_v40 = vpop.permute.xlu0 %840 }
 0x2e9   : > { %1545 = vst.msk [vmem:[%s2099_s9 + $0x70] sm:$0xff] %vm502_vm3, %v841_v40 }
 0x2eb   : > { %v843_v53 = vpop.permute.xlu1 %842 }
 0x2ec   : > { %1546 = vst.msk [vmem:[%s2099_s9 + $0x78] sm:$0x1] %vm504_vm2, %v843_v53  ;;  %v995_v48 = vpop.permute.xlu0 %994 }
 0x2ed   : > { %1556 = vst.msk [vmem:[%s2087_s25 + $0x80] sm:$0xff] %vm502_vm3, %v995_v48 }
 0x2ef   : > { %v517_v54 = vpop.permute.xlu1 %516 }
 0x2f0   : > { %522 = vst.msk [vmem:[%s2099_s9] sm:$0xff] %vm502_vm3, %v517_v54  ;;  %v1004_v55 = vpop.permute.xlu0 %1003 }
 0x2f1   : > { %1558 = vst.msk [vmem:[%s2099_s9 + $0x80] sm:$0xff] %vm502_vm3, %v1004_v55 }
 0x2f3   : > { %v997_v56 = vpop.permute.xlu1 %996 }
 0x2f4   : > { %1557 = vst.msk [vmem:[%s2087_s25 + $0x88] sm:$0x1] %vm504_vm2, %v997_v56  ;;  %v1013_v50 = vpop.permute.xlu0 %1012 }
 0x2f5   : > { %1560 = vst.msk [vmem:[%s1943_s12 + $0x90] sm:$0xff] %vm502_vm3, %v1013_v50 }
 0x2f7   : > { %v1006_v57 = vpop.permute.xlu1 %1005 }
 0x2f8   : > { %1559 = vst.msk [vmem:[%s2099_s9 + $0x88] sm:$0x1] %vm504_vm2, %v1006_v57  ;;  %v1022_v58 = vpop.permute.xlu0 %1021 }
 0x2f9   : > { %1562 = vst.msk [vmem:[%s2087_s25 + $0x90] sm:$0xff] %vm502_vm3, %v1022_v58 }
 0x2fb   : > { %v1015_v59 = vpop.permute.xlu1 %1014 }
 0x2fc   : > { %1561 = vst.msk [vmem:[%s1943_s12 + $0x98] sm:$0x1] %vm504_vm2, %v1015_v59  ;;  %v1031_v60 = vpop.permute.xlu0 %1030 }
 0x2fd   : > { %1564 = vst.msk [vmem:[%s2099_s9 + $0x90] sm:$0xff] %vm502_vm3, %v1031_v60 }
 0x2ff   : > { %v1024_v61 = vpop.permute.xlu1 %1023 }
 0x300   : > { %1563 = vst.msk [vmem:[%s2087_s25 + $0x98] sm:$0x1] %vm504_vm2, %v1024_v61  ;;  %v1040_v62 = vpop.permute.xlu0 %1039 }
 0x301   : > { %1566 = vst.msk [vmem:[%s1943_s12 + $0xa0] sm:$0xff] %vm502_vm3, %v1040_v62 }
 0x303   : > { %v1033_v63 = vpop.permute.xlu1 %1032 }
 0x304   : > { %1565 = vst.msk [vmem:[%s2099_s9 + $0x98] sm:$0x1] %vm504_vm2, %v1033_v63  ;;  %v1049_v0 = vpop.permute.xlu0 %1048 }
 0x305   : > { %1568 = vst.msk [vmem:[%s2087_s25 + $0xa0] sm:$0xff] %vm502_vm3, %v1049_v0 }
 0x307   : > { %v1042_v1 = vpop.permute.xlu1 %1041 }
 0x308   : > { %1567 = vst.msk [vmem:[%s1943_s12 + $0xa8] sm:$0x1] %vm504_vm2, %v1042_v1  ;;  %v1058_v2 = vpop.permute.xlu0 %1057 }
 0x309   : > { %1570 = vst.msk [vmem:[%s2099_s9 + $0xa0] sm:$0xff] %vm502_vm3, %v1058_v2 }
 0x30b   : > { %v1051_v3 = vpop.permute.xlu1 %1050 }
 0x30c   : > { %1569 = vst.msk [vmem:[%s2087_s25 + $0xa8] sm:$0x1] %vm504_vm2, %v1051_v3  ;;  %v1067_v4 = vpop.permute.xlu0 %1066 }
 0x30d   : > { %1572 = vst.msk [vmem:[%s1943_s12 + $0xb0] sm:$0xff] %vm502_vm3, %v1067_v4 }
 0x30f   : > { %v1060_v5 = vpop.permute.xlu1 %1059 }
 0x310   : > { %1571 = vst.msk [vmem:[%s2099_s9 + $0xa8] sm:$0x1] %vm504_vm2, %v1060_v5  ;;  %v1076_v6 = vpop.permute.xlu0 %1075 }
 0x311   : > { %1574 = vst.msk [vmem:[%s2087_s25 + $0xb0] sm:$0xff] %vm502_vm3, %v1076_v6 }
 0x313   : > { %v1069_v7 = vpop.permute.xlu1 %1068 }
 0x314   : > { %1573 = vst.msk [vmem:[%s1943_s12 + $0xb8] sm:$0x1] %vm504_vm2, %v1069_v7  ;;  %v1085_v8 = vpop.permute.xlu0 %1084 }
 0x315   : > { %1576 = vst.msk [vmem:[%s2099_s9 + $0xb0] sm:$0xff] %vm502_vm3, %v1085_v8 }
 0x317   : > { %v1078_v9 = vpop.permute.xlu1 %1077 }
 0x318   : > { %1575 = vst.msk [vmem:[%s2087_s25 + $0xb8] sm:$0x1] %vm504_vm2, %v1078_v9  ;;  %v1239_v10 = vpop.permute.xlu0 %1238 }
 0x319   : > { %1587 = vst.msk [vmem:[%s2087_s25 + $0xc0] sm:$0xff] %vm502_vm3, %v1239_v10 }
 0x31b   : > { %v1087_v11 = vpop.permute.xlu1 %1086 }
 0x31c   : > { %1577 = vst.msk [vmem:[%s2099_s9 + $0xb8] sm:$0x1] %vm504_vm2, %v1087_v11  ;;  %v1248_v12 = vpop.permute.xlu0 %1247 }
 0x31d   : > { %1589 = vst.msk [vmem:[%s2099_s9 + $0xc0] sm:$0xff] %vm502_vm3, %v1248_v12 }
 0x31f   : > { %v1241_v13 = vpop.permute.xlu1 %1240 }
 0x320   : > { %1588 = vst.msk [vmem:[%s2087_s25 + $0xc8] sm:$0x1] %vm504_vm2, %v1241_v13  ;;  %v1257_v14 = vpop.permute.xlu0 %1256 }
 0x321   : > { %1591 = vst.msk [vmem:[%s1943_s12 + $0xd0] sm:$0xff] %vm502_vm3, %v1257_v14 }
 0x323   : > { %v1250_v15 = vpop.permute.xlu1 %1249 }
 0x324   : > { %1590 = vst.msk [vmem:[%s2099_s9 + $0xc8] sm:$0x1] %vm504_vm2, %v1250_v15  ;;  %v1266_v16 = vpop.permute.xlu0 %1265 }
 0x325   : > { %1593 = vst.msk [vmem:[%s2087_s25 + $0xd0] sm:$0xff] %vm502_vm3, %v1266_v16 }
 0x327   : > { %v1259_v17 = vpop.permute.xlu1 %1258 }
 0x328   : > { %1592 = vst.msk [vmem:[%s1943_s12 + $0xd8] sm:$0x1] %vm504_vm2, %v1259_v17  ;;  %v1275_v18 = vpop.permute.xlu0 %1274 }
 0x329   : > { %1595 = vst.msk [vmem:[%s2099_s9 + $0xd0] sm:$0xff] %vm502_vm3, %v1275_v18 }
 0x32b   : > { %v1268_v19 = vpop.permute.xlu1 %1267 }
 0x32c   : > { %1594 = vst.msk [vmem:[%s2087_s25 + $0xd8] sm:$0x1] %vm504_vm2, %v1268_v19  ;;  %v1284_v22 = vpop.permute.xlu0 %1283 }
 0x32d   : > { %1597 = vst.msk [vmem:[%s1943_s12 + $0xe0] sm:$0xff] %vm502_vm3, %v1284_v22 }
 0x32f   : > { %v1277_v23 = vpop.permute.xlu1 %1276 }
 0x330   : > { %1596 = vst.msk [vmem:[%s2099_s9 + $0xd8] sm:$0x1] %vm504_vm2, %v1277_v23  ;;  %v1293_v24 = vpop.permute.xlu0 %1292 }
 0x331   : > { %1599 = vst.msk [vmem:[%s2087_s25 + $0xe0] sm:$0xff] %vm502_vm3, %v1293_v24 }
 0x333   : > { %v1286_v25 = vpop.permute.xlu1 %1285 }
 0x334   : > { %1598 = vst.msk [vmem:[%s1943_s12 + $0xe8] sm:$0x1] %vm504_vm2, %v1286_v25  ;;  %v1302_v26 = vpop.permute.xlu0 %1301 }
 0x335   : > { %1601 = vst.msk [vmem:[%s2099_s9 + $0xe0] sm:$0xff] %vm502_vm3, %v1302_v26 }
 0x337   : > { %v1295_v27 = vpop.permute.xlu1 %1294 }
 0x338   : > { %1600 = vst.msk [vmem:[%s2087_s25 + $0xe8] sm:$0x1] %vm504_vm2, %v1295_v27  ;;  %v1311_v30 = vpop.permute.xlu0 %1310 }
 0x339   : > { %1603 = vst.msk [vmem:[%s1943_s12 + $0xf0] sm:$0xff] %vm502_vm3, %v1311_v30 }
 0x33b   : > { %v1304_v31 = vpop.permute.xlu1 %1303 }
 0x33c   : > { %1602 = vst.msk [vmem:[%s2099_s9 + $0xe8] sm:$0x1] %vm504_vm2, %v1304_v31  ;;  %v1320_v32 = vpop.permute.xlu0 %1319 }
 0x33d   : > { %1605 = vst.msk [vmem:[%s2087_s25 + $0xf0] sm:$0xff] %vm502_vm3, %v1320_v32 }
 0x33f   : > { %v1313_v33 = vpop.permute.xlu1 %1312 }
 0x340   : > { %1604 = vst.msk [vmem:[%s1943_s12 + $0xf8] sm:$0x1] %vm504_vm2, %v1313_v33  ;;  %v1329_v34 = vpop.permute.xlu0 %1328 }
 0x341   : > { %1607 = vst.msk [vmem:[%s2099_s9 + $0xf0] sm:$0xff] %vm502_vm3, %v1329_v34 }
 0x343   : > { %v1322_v35 = vpop.permute.xlu1 %1321 }
 0x344   : > { %1606 = vst.msk [vmem:[%s2087_s25 + $0xf8] sm:$0x1] %vm504_vm2, %v1322_v35 }
 0x347   : > { %v1331_v36 = vpop.permute.xlu1 %1330 }
 0x348   : > { %1608 = vst.msk [vmem:[%s2099_s9 + $0xf8] sm:$0x1] %vm504_vm2, %v1331_v36 }
 0x349 PF: > { %s19_s27 = sadd.s32 1, %s1755_s27  }
 0x34a   : > { %p16_p4 = scmp.ge.s32.totalorder %s19_s27, 4  }
 0x34c   :  { %18 = sbr.rel (!%p16_p4) target bundleno = 1 (0x1), region = 152 }

// kernel: cross_frame_attention_block.8
= control target key start
LH: loop header
LB: loop body
LE: loop exit
PB: predicated region body
PF: predicated region fallthrough
CT: control target
= control target key end

     0   :  { %s1797_s15 = smov 0   ;;  %s1958_s0 = inlined_call_operand.vmem [shape: f32[8,4,9,8], index: 0, kind: input, shape index: {}]   ;;  %s1959_s1 = inlined_call_operand.vmem [shape: f32[8,8,32], index: 1, kind: input, shape index: {}]   ;;  %s1960_s2 = inlined_call_operand.vmem [shape: f32[4,8,32], index: 2, kind: input, shape index: {}]   ;;  %s1961_s3 = inlined_call_operand.vmem [shape: f32[1,32], index: 3, kind: input, shape index: {}]   ;;  %s1962_s4 = inlined_call_operand.vmem [shape: f32[8,8,32], index: 4, kind: output, shape index: {}]  }
   0x1 LB: > { %s1572_s16 = sadd.s32 4294967295, %s1768_s15   ;;  %p1576_p0 = scmp.ge.s32.totalorder %s1768_s15, 1  ;;  %s1768_s15 = sphi %s1797_s15, %s14_s15  }
   0x2   : > { %p175_p1 = scmp.lt.s32.totalorder %s1768_s15, 3 }
   0x4   : > { %p176_p2 = pnand %p1576_p0, %p175_p1 }
   0x5   : > { %v1808_v0 = vld [vmem:[%s1960_s2 + $0x8] sm:$0xff] (!%p176_p2)  ;;  %v1813_v1 = vld [vmem:[%s1960_s2] sm:$0xff] (!%p176_p2)  ;;  %s1577_s21 = sshll.u32 (!%p176_p2), %s1572_s16, 2  ;;  %v1770_v2 = vmov (!%p176_p2), 0.0   ;;  %vm1771_vm0 = vmmov (!%p176_p2), 0   ;;  %vm232_vm1 = vcmask (!%p176_p2), 64512  }
   0x6   : > { %179 = sbr.rel (%p176_p2) target bundleno = 266 (0x10a), region = 36  ;;  %1672 = vmatprep.subr.mxu0 (!%p176_p2), %v1770_v2  ;;  %1677 = vmatprep.subr.mxu1 (!%p176_p2), %v1770_v2  ;;  %p208_p3 = scmp.lt.s32.totalorder (!%p176_p2), %s1577_s21, 7  ;;  %v1836_v3 = vld [vmem:[%s1960_s2 + $0x10] sm:$0xff] (!%p176_p2)  ;;  %v1841_v4 = vld [vmem:[%s1960_s2 + $0x18] sm:$0xff] (!%p176_p2)  ;;  %v1594_v33 = vld [vmem:[%s1961_s3] ss:$0 sm:$0xff] (!%p176_p2) }
   0x7   : > { %1673 = vmatpush3.msra.mxu0 (!%p176_p2), %v1808_v0  ;;  %1674 = vmatprep.mubr.msk.f32.mxu0 (!%p176_p2), %vm1771_vm0, %v1770_v2  ;;  %vm545_vm2 = vcmask (!%p176_p2), 261120  }
   0x8   : > { %1678 = vmatpush3.msra.mxu1 (!%p176_p2), %v1813_v1  ;;  %1679 = vmatprep.mubr.msk.f32.mxu1 (!%p176_p2), %vm1771_vm0, %v1770_v2 }
   0x9   : > { %1682 = vmatprep.subr.mxu0 (!%p176_p2), %v1770_v2  ;;  %1687 = vmatprep.subr.mxu1 (!%p176_p2), %v1770_v2 }
   0xd   : > { %s1964_s21 = smov (!%p208_p3, %s1577_s21), 7 }
   0xe   : > { %s1639_s22 = sshll.u32 %s1964_s21, 6  ;;  %s1581_s30 = sshll.u32 %s1964_s21, 3 }
   0xf   : > { %s1831_s25 = scalar_lea.vmem %s1958_s0, %s1639_s22  ;;  %s1933_s7 = scalar_lea.vmem %s1959_s1, %s1581_s30 }
  0x10   : > { %v1584_v5 = vld [vmem:[%s1831_s25 + $0x10] sm:$0xff]  ;;  %v226_v6 = vld [vmem:[%s1831_s25] sm:$0xff]  ;;  %s1942_s12 = scalar_lea.vmem %s1962_s4, %s1581_s30  ;;  %v1606_v46 = vld [vmem:[%s1933_s7 + $0x8] sm:$0xff] }
  0x11   : > { %1675 = vmatmul.mubr.msk.f32.vlgmr.msra.gmra.mrb[0].mxu0 %vm232_vm1, %v1584_v5  ;;  %1680 = vmatmul.mubr.msk.f32.vlgmr.msra.gmra.mrb[0].mxu1 %vm232_vm1, %v226_v6  ;;  %v1588_v7 = vld [vmem:[%s1831_s25 + $0x20] sm:$0xff]  ;;  %v1591_v8 = vld [vmem:[%s1831_s25 + $0x30] sm:$0xff] }
  0x12   : > { %1683 = vmatpush3.msra.mxu0 %v1836_v3  ;;  %1688 = vmatpush3.msra.mxu1 %v1841_v4  ;;  %v1596_v9 = vld [vmem:[%s1831_s25 + $0x50] sm:$0xff]  ;;  %v1595_v10 = vld [vmem:[%s1831_s25 + $0x40] sm:$0xff] }
  0x13   : > { %1684 = vmatprep.mubr.msk.f32.mxu0 %vm1771_vm0, %v1770_v2  ;;  %1689 = vmatprep.mubr.msk.f32.mxu1 %vm1771_vm0, %v1770_v2  ;;  %v1600_v11 = vld [vmem:[%s1831_s25 + $0x60] sm:$0xff]  ;;  %v1603_v12 = vld [vmem:[%s1831_s25 + $0x70] sm:$0xff] }
  0x14   : > { %1692 = vmatprep.subr.mxu0 %v1770_v2  ;;  %1697 = vmatprep.subr.mxu1 %v1770_v2  ;;  %v1610_v13 = vld [vmem:[%s1831_s25 + $0x90] sm:$0xff]  ;;  %v1609_v14 = vld [vmem:[%s1831_s25 + $0x80] sm:$0xff] }
  0x15   : > { %1685 = vmatmul.mubr.msk.f32.vlgmr.msra.gmra.mrb[2].mxu0 %vm232_vm1, %v1588_v7  ;;  %1690 = vmatmul.mubr.msk.f32.vlgmr.msra.gmra.mrb[2].mxu1 %vm232_vm1, %v1591_v8  ;;  %v1614_v15 = vld [vmem:[%s1831_s25 + $0xa0] sm:$0xff]  ;;  %v1617_v16 = vld [vmem:[%s1831_s25 + $0xb0] sm:$0xff] }
  0x16   : > { %1693 = vmatpush3.msra.mxu0 %v1808_v0  ;;  %1698 = vmatpush3.msra.mxu1 %v1813_v1  ;;  %v1624_v17 = vld [vmem:[%s1831_s25 + $0xd0] sm:$0xff]  ;;  %v1623_v18 = vld [vmem:[%s1831_s25 + $0xc0] sm:$0xff] }
  0x17   : > { %1694 = vmatprep.mubr.msk.f32.mxu0 %vm1771_vm0, %v1770_v2  ;;  %1699 = vmatprep.mubr.msk.f32.mxu1 %vm1771_vm0, %v1770_v2  ;;  %v1628_v19 = vld [vmem:[%s1831_s25 + $0xe0] sm:$0xff]  ;;  %v1631_v20 = vld [vmem:[%s1831_s25 + $0xf0] sm:$0xff] }
  0x18   : > { %1702 = vmatprep.subr.mxu0 %v1770_v2  ;;  %1707 = vmatprep.subr.mxu1 %v1770_v2  ;;  %v535_v31 = vld [vmem:[%s1933_s7] sm:$0xff]  ;;  %v1620_v60 = vld [vmem:[%s1933_s7 + $0x10] sm:$0xff] }
  0x19   : > { %1695 = vmatmul.mubr.msk.f32.vlgmr.msra.gmra.mrb[4].mxu0 %vm232_vm1, %v1596_v9  ;;  %1700 = vmatmul.mubr.msk.f32.vlgmr.msra.gmra.mrb[4].mxu1 %vm232_vm1, %v1595_v10  ;;  %v1634_v10 = vld [vmem:[%s1933_s7 + $0x18] sm:$0xff] }
  0x1a   : > { %1703 = vmatpush3.msra.mxu0 %v1836_v3  ;;  %1708 = vmatpush3.msra.mxu1 %v1841_v4 }
  0x1b   : > { %1704 = vmatprep.mubr.msk.f32.mxu0 %vm1771_vm0, %v1770_v2  ;;  %1709 = vmatprep.mubr.msk.f32.mxu1 %vm1771_vm0, %v1770_v2 }
  0x1c   : > { %1712 = vmatprep.subr.mxu0 %v1770_v2  ;;  %1717 = vmatprep.subr.mxu1 %v1770_v2 }
  0x1d   : > { %1705 = vmatmul.mubr.msk.f32.vlgmr.msra.gmra.mrb[6].mxu0 %vm232_vm1, %v1600_v11  ;;  %1710 = vmatmul.mubr.msk.f32.vlgmr.msra.gmra.mrb[6].mxu1 %vm232_vm1, %v1603_v12 }
  0x1e   : > { %1713 = vmatpush3.msra.mxu0 %v1808_v0  ;;  %1718 = vmatpush3.msra.mxu1 %v1813_v1 }
  0x1f   : > { %1714 = vmatprep.mubr.msk.f32.mxu0 %vm1771_vm0, %v1770_v2  ;;  %1719 = vmatprep.mubr.msk.f32.mxu1 %vm1771_vm0, %v1770_v2 }
  0x20   : > { %1722 = vmatprep.subr.mxu0 %v1770_v2  ;;  %1727 = vmatprep.subr.mxu1 %v1770_v2 }
  0x21   : > { %1715 = vmatmul.mubr.msk.f32.vlgmr.msra.gmra.mrb[8].mxu0 %vm232_vm1, %v1610_v13  ;;  %1720 = vmatmul.mubr.msk.f32.vlgmr.msra.gmra.mrb[8].mxu1 %vm232_vm1, %v1609_v14 }
  0x22   : > { %1723 = vmatpush3.msra.mxu0 %v1836_v3  ;;  %1728 = vmatpush3.msra.mxu1 %v1841_v4 }
  0x23   : > { %1724 = vmatprep.mubr.msk.f32.mxu0 %vm1771_vm0, %v1770_v2  ;;  %1729 = vmatprep.mubr.msk.f32.mxu1 %vm1771_vm0, %v1770_v2 }
  0x24   : > { %1732 = vmatprep.subr.mxu0 %v1770_v2  ;;  %1737 = vmatprep.subr.mxu1 %v1770_v2 }
  0x25   : > { %1725 = vmatmul.mubr.msk.f32.vlgmr.msra.gmra.mrb[10].mxu0 %vm232_vm1, %v1614_v15  ;;  %1730 = vmatmul.mubr.msk.f32.vlgmr.msra.gmra.mrb[10].mxu1 %vm232_vm1, %v1617_v16 }
  0x26   : > { %1733 = vmatpush3.msra.mxu0 %v1808_v0  ;;  %1738 = vmatpush3.msra.mxu1 %v1813_v1 }
  0x27   : > { %1734 = vmatprep.mubr.msk.f32.mxu0 %vm1771_vm0, %v1770_v2  ;;  %1739 = vmatprep.mubr.msk.f32.mxu1 %vm1771_vm0, %v1770_v2 }
  0x28   : > { %1742 = vmatprep.subr.mxu0 %v1770_v2  ;;  %1747 = vmatprep.subr.mxu1 %v1770_v2 }
  0x29   : > { %1735 = vmatmul.mubr.msk.f32.vlgmr.msra.gmra.mrb[12].mxu0 %vm232_vm1, %v1624_v17  ;;  %1740 = vmatmul.mubr.msk.f32.vlgmr.msra.gmra.mrb[12].mxu1 %vm232_vm1, %v1623_v18 }
  0x2a   : > { %1743 = vmatpush3.msra.mxu0 %v1836_v3  ;;  %1748 = vmatpush3.msra.mxu1 %v1841_v4 }
  0x2b   : > { %1744 = vmatprep.mubr.msk.f32.mxu0 %vm1771_vm0, %v1770_v2  ;;  %1749 = vmatprep.mubr.msk.f32.mxu1 %vm1771_vm0, %v1770_v2 }
  0x2d   : > { %1745 = vmatmul.mubr.msk.f32.vlgmr.msra.gmra.mrb[14].mxu0 %vm232_vm1, %v1628_v19  ;;  %1750 = vmatmul.mubr.msk.f32.vlgmr.msra.gmra.mrb[14].mxu1 %vm232_vm1, %v1631_v20 }
  0xe4   : > { %v302_v21 = vpop.f32.mrb[0].mxu0  ;;  %v375_v22 = vpop.f32.mrb[0].mxu1 }
  0xe5   : > { %v376_v23 = vadd.f32 %v375_v22, %v302_v21  ;;  %v1676_v24 = vpop.f32.mrb[1].mxu0  ;;  %v1681_v25 = vpop.f32.mrb[1].mxu1 }
  0xe8   : > { %v452_v26 = vpop.f32.mrb[2].mxu0  ;;  %v530_v27 = vpop.f32.mrb[2].mxu1 }
  0xe9   : > { %v456_v28 = vadd.f32 %v452_v26, %v376_v23  ;;  %v1686_v29 = vpop.f32.mrb[3].mxu0  ;;  %v1691_v30 = vpop.f32.mrb[3].mxu1 }
  0xeb   : > { %v534_v32 = vadd.f32 %v530_v27, %v456_v28 }
  0xec   : > { %v622_v34 = vpop.f32.mrb[4].mxu0  ;;  %v695_v35 = vpop.f32.mrb[4].mxu1 }
  0xed   : > { %v536_v36 = vadd.f32 %v535_v31, %v534_v32  ;;  %v696_v37 = vadd.f32 %v695_v35, %v622_v34  ;;  %v1696_v38 = vpop.f32.mrb[5].mxu0  ;;  %v1701_v39 = vpop.f32.mrb[5].mxu1 }
  0xef   : > { %v544_v40 = vadd.f32 %v1594_v33, %v536_v36 }
  0xf0   : > { %v771_v41 = vpop.f32.mrb[6].mxu0  ;;  %v848_v42 = vpop.f32.mrb[6].mxu1 }
  0xf1   : > { %546 = vst.msk [vmem:[%s1942_s12] sm:$0xff] %vm545_vm2, %v544_v40  ;;  %v775_v43 = vadd.f32 %v771_v41, %v696_v37  ;;  %v1706_v44 = vpop.f32.mrb[7].mxu0  ;;  %v1711_v45 = vpop.f32.mrb[7].mxu1 }
  0xf3   : > { %v852_v47 = vadd.f32 %v848_v42, %v775_v43 }
  0xf4   : > { %v941_v48 = vpop.f32.mrb[8].mxu0  ;;  %v1014_v49 = vpop.f32.mrb[8].mxu1 }
  0xf5   : > { %v855_v50 = vadd.f32 %v1606_v46, %v852_v47  ;;  %v1015_v51 = vadd.f32 %v1014_v49, %v941_v48  ;;  %v1716_v52 = vpop.f32.mrb[9].mxu0  ;;  %v1721_v53 = vpop.f32.mrb[9].mxu1 }
  0xf7   : > { %v863_v54 = vadd.f32 %v1594_v33, %v855_v50 }
  0xf8   : > { %v1090_v55 = vpop.f32.mrb[10].mxu0  ;;  %v1167_v56 = vpop.f32.mrb[10].mxu1 }
  0xf9   : > { %1608 = vst.msk [vmem:[%s1942_s12 + $0x8] sm:$0xff] %vm545_vm2, %v863_v54  ;;  %v1094_v57 = vadd.f32 %v1090_v55, %v1015_v51  ;;  %v1726_v58 = vpop.f32.mrb[11].mxu0  ;;  %v1731_v59 = vpop.f32.mrb[11].mxu1 }
  0xfb   : > { %v1171_v61 = vadd.f32 %v1167_v56, %v1094_v57 }
  0xfc   : > { %v1260_v62 = vpop.f32.mrb[12].mxu0  ;;  %v1333_v63 = vpop.f32.mrb[12].mxu1 }
  0xfd   : > { %v1174_v0 = vadd.f32 %v1620_v60, %v1171_v61  ;;  %v1334_v1 = vadd.f32 %v1333_v63, %v1260_v62  ;;  %v1736_v2 = vpop.f32.mrb[13].mxu0  ;;  %v1741_v3 = vpop.f32.mrb[13].mxu1 }
  0xff   : > { %v1182_v4 = vadd.f32 %v1594_v33, %v1174_v0 }
 0x100   : > { %v1409_v5 = vpop.f32.mrb[14].mxu0  ;;  %v1486_v6 = vpop.f32.mrb[14].mxu1 }
 0x101   : > { %1622 = vst.msk [vmem:[%s1942_s12 + $0x10] sm:$0xff] %vm545_vm2, %v1182_v4  ;;  %v1413_v7 = vadd.f32 %v1409_v5, %v1334_v1  ;;  %v1746_v8 = vpop.f32.mrb[15].mxu0  ;;  %v1751_v9 = vpop.f32.mrb[15].mxu1 }
 0x103   : > { %v1490_v11 = vadd.f32 %v1486_v6, %v1413_v7 }
 0x105   : > { %v1493_v12 = vadd.f32 %v1634_v10, %v1490_v11 }
 0x107   : > { %v1501_v13 = vadd.f32 %v1594_v33, %v1493_v12 }
 0x109   : > { %1636 = vst.msk [vmem:[%s1942_s12 + $0x18] sm:$0xff] %vm545_vm2, %v1501_v13 }
 0x10a PF: > { %s14_s15 = sadd.s32 1, %s1768_s15  }
 0x10b   : > { %p11_p4 = scmp.ge.s32.totalorder %s14_s15, 4  }
 0x10d   :  { %13 = sbr.rel (!%p11_p4) target bundleno = 1 (0x1), region = 93 }

// kernel: cross_frame_attention_block.9
= control target key start
LH: loop header
LB: loop body
LE: loop exit
PB: predicated region body
PF: predicated region fallthrough
CT: control target
= control target key end

     0   :  { %s897_s24 = smov 0   ;;  %s1029_s0 = inlined_call_operand.vmem [shape: f32[64,32], index: 0, kind: input, shape index: {}]   ;;  %s1030_s1 = inlined_call_operand.vmem [shape: f32[1,32], index: 1, kind: input, shape index: {}]   ;;  %s1031_s2 = inlined_call_operand.vmem [shape: f32[1,32], index: 2, kind: input, shape index: {}]   ;;  %s1032_s3 = inlined_call_operand.vmem [shape: f32[32,128], index: 3, kind: input, shape index: {}]   ;;  %s1033_s4 = inlined_call_operand.vmem [shape: f32[1,128], index: 4, kind: input, shape index: {}]   ;;  %s1034_s5 = inlined_call_operand.vmem [shape: f32[128,32], index: 5, kind: input, shape index: {}]   ;;  %s1035_s6 = inlined_call_operand.vmem [shape: f32[1,32], index: 6, kind: input, shape index: {}]   ;;  %s1036_s7 = inlined_call_operand.vmem [shape: f32[64,32], index: 7, kind: output, shape index: {}]  }
   0x1 LB: > { %s674_s25 = sadd.s32 4294967295, %s855_s24   ;;  %p678_p0 = scmp.ge.s32.totalorder %s855_s24, 1  ;;  %s855_s24 = sphi %s897_s24, %s17_s24  }
   0x2   : > { %p238_p1 = scmp.lt.s32.totalorder %s855_s24, 3 }
   0x4   : > { %p239_p2 = pnand %p678_p0, %p238_p1 }
   0x5   : > { %s679_s26 = sshll.u32 (!%p239_p2), %s674_s25, 2  ;;  %vm288_vm0 = vcmask (!%p239_p2), 261120   ;;  %v362_v28 = vld [vmem:[%s1032_s3] sm:$0xff] (!%p239_p2)  ;;  %v363_v29 = vld [vmem:[%s1032_s3 + $0x8] sm:$0xff] (!%p239_p2)  ;;  %v364_v30 = vld [vmem:[%s1032_s3 + $0x10] sm:$0xff] (!%p239_p2) }
   0x6   : > { %242 = sbr.rel (%p239_p2) target bundleno = 802 (0x322), region = 48  ;;  %p271_p3 = scmp.lt.s32.totalorder (!%p239_p2), %s679_s26, 7  ;;  %v777_v31 = vpack.c.bf16 (!%p239_p2), %v363_v29, %v362_v28  ;;  %v365_v32 = vld [vmem:[%s1032_s3 + $0x18] sm:$0xff] (!%p239_p2)  ;;  %v683_v47 = vld [vmem:[%s1030_s1] ss:$0 sm:$0xff] (!%p239_p2) }
   0x7   : > { %v781_v33 = vpack.c.bf16 (!%p239_p2), %v365_v32, %v364_v30  ;;  %v684_v49 = vld [vmem:[%s1031_s2] ss:$0 sm:$0xff] (!%p239_p2) }
   0x8   : > { %778 = vmatprep.subr.bf16.mxu0 (!%p239_p2), %v777_v31  ;;  %v685_v28 = vld [vmem:[%s1033_s4] ss:$0 sm:$0xff] (!%p239_p2) }
   0x9   : > { %780 = vmatpush3.bf16.msra.mxu0 (!%p239_p2), %v777_v31 }
   0xa   : > { %782 = vmatprep.subr.bf16.mxu0 (!%p239_p2), %v781_v33 }
   0xd   : > { %s1038_s26 = smov (!%p271_p3, %s679_s26), 7  ;;  %784 = vmatpush3.bf16.msra.mxu0 %v781_v33 }
   0xe   : > { %s680_s27 = sshll.u32 %s1038_s26, 3 }
   0xf   : > { %s274_s30 = scalar_lea.vmem %s1029_s0, %s680_s27  ;;  %s280_s18 = scalar_lea.vmem %s1036_s7, %s680_s27 }
  0x10   : > { %v913_v0 = vld [vmem:[%s274_s30] sm:$0xff]  ;;  %v915_v1 = vld [vmem:[%s274_s30 + $0x10] sm:$0xff]  ;;  %v917_v2 = vld [vmem:[%s274_s30 + $0x8] sm:$0xff] }
  0x11   : > { %v289_v3 = vsel %vm288_vm0, %v913_v0, 0.0  ;;  %v295_v4 = vsel %vm288_vm0, %v915_v1, 0.0  ;;  %v923_v5 = vld [vmem:[%s274_s30 + $0x18] sm:$0xff]  ;;  %v292_v6 = vsel %vm288_vm0, %v917_v2, 0.0 }
  0x12   : > { %290 = vadd.xlane.f32.xlu0 %v289_v3  ;;  %296 = vadd.xlane.f32.xlu1 %v295_v4  ;;  %v298_v7 = vsel %vm288_vm0, %v923_v5, 0.0  ;;  %v502_v3 = vld [vmem:[%s1034_s5] sm:$0xff]  ;;  %v503_v4 = vld [vmem:[%s1034_s5 + $0x8] sm:$0xff] }
  0x16   : > { %293 = vadd.xlane.f32.xlu0 %v292_v6  ;;  %299 = vadd.xlane.f32.xlu1 %v298_v7  ;;  %v785_v6 = vpack.c.bf16 %v503_v4, %v502_v3  ;;  %v504_v7 = vld [vmem:[%s1034_s5 + $0x10] sm:$0xff] }
  0x18   : > { %786 = vmatprep.subr.bf16.mxu1 %v785_v6 }
  0x19   : > { %788 = vmatpush3.bf16.msra.mxu1 %v785_v6 }
  0x9f   : > { %v291_v8 = vpop.xlane.xlu0 %290  ;;  %v297_v9 = vpop.xlane.xlu1 %296 }
  0xa0   : > { %v302_v10 = vmul.f32 0.03125, %v291_v8  ;;  %v304_v11 = vmul.f32 0.03125, %v297_v9  ;;  %v505_v8 = vld [vmem:[%s1034_s5 + $0x18] sm:$0xff] }
  0xa1   : > { %v789_v9 = vpack.c.bf16 %v505_v8, %v504_v7 }
  0xa2   : > { %v306_v12 = vsub.f32 %v913_v0, %v302_v10  ;;  %v308_v13 = vsub.f32 %v915_v1, %v304_v11  ;;  %v506_v10 = vld [vmem:[%s1034_s5 + $0x20] sm:$0xff]  ;;  %v507_v11 = vld [vmem:[%s1034_s5 + $0x28] sm:$0xff] }
  0xa3   : > { %v294_v14 = vpop.xlane.xlu0 %293  ;;  %v300_v15 = vpop.xlane.xlu1 %299  ;;  %790 = vmatprep.subr.bf16.mxu1 %v789_v9 }
  0xa4   : > { %v303_v16 = vmul.f32 0.03125, %v294_v14  ;;  %v305_v17 = vmul.f32 0.03125, %v300_v15  ;;  %v310_v18 = vmul.f32 %v306_v12, %v306_v12  ;;  %v312_v19 = vmul.f32 %v308_v13, %v308_v13  ;;  %792 = vmatpush3.bf16.msra.mxu1 %v789_v9  ;;  %v509_v14 = vld [vmem:[%s1034_s5 + $0x38] sm:$0xff] }
  0xa6   : > { %v307_v20 = vsub.f32 %v917_v2, %v303_v16  ;;  %v309_v21 = vsub.f32 %v923_v5, %v305_v17  ;;  %v314_v22 = vsel %vm288_vm0, %v310_v18, 0.0  ;;  %v320_v23 = vsel %vm288_vm0, %v312_v19, 0.0  ;;  %v510_v16 = vld [vmem:[%s1034_s5 + $0x40] sm:$0xff]  ;;  %v511_v17 = vld [vmem:[%s1034_s5 + $0x48] sm:$0xff]  ;;  %v512_v19 = vld [vmem:[%s1034_s5 + $0x50] sm:$0xff] }
  0xa7   : > { %315 = vadd.xlane.f32.xlu0 %v314_v22  ;;  %v801_v18 = vpack.c.bf16 %v511_v17, %v510_v16  ;;  %v514_v22 = vld [vmem:[%s1034_s5 + $0x60] sm:$0xff] }
  0xa8   : > { %v311_v24 = vmul.f32 %v307_v20, %v307_v20  ;;  %v313_v25 = vmul.f32 %v309_v21, %v309_v21 }
  0xaa   : > { %v317_v26 = vsel %vm288_vm0, %v311_v24, 0.0  ;;  %v323_v27 = vsel %vm288_vm0, %v313_v25, 0.0  ;;  %v516_v25 = vld [vmem:[%s1034_s5 + $0x70] sm:$0xff] }
  0xab   : > { %321 = vadd.xlane.f32.xlu0 %v320_v23  ;;  %318 = vadd.xlane.f32.xlu1 %v317_v26  ;;  %v515_v23 = vld [vmem:[%s1034_s5 + $0x68] sm:$0xff]  ;;  %v517_v26 = vld [vmem:[%s1034_s5 + $0x78] sm:$0xff] }
  0xac   : > { %v809_v24 = vpack.c.bf16 %v515_v23, %v514_v22 }
  0xaf   : > { %324 = vadd.xlane.f32.xlu1 %v323_v27  ;;  %v813_v27 = vpack.c.bf16 %v517_v26, %v516_v25 }
 0x134   : > { %v316_v34 = vpop.xlane.xlu0 %315 }
 0x135   : > { %v326_v35 = vmul.f32 0.03125, %v316_v34 }
 0x137   : > { %v330_v36 = vadd.f32 1e-05, %v326_v35 }
 0x138   : > { %v319_v37 = vpop.xlane.xlu1 %318  ;;  %v322_v38 = vpop.xlane.xlu0 %321 }
 0x139   : > { %825 = vrsqrt.f32 %v330_v36  ;;  %v327_v39 = vmul.f32 0.03125, %v319_v37  ;;  %v328_v40 = vmul.f32 0.03125, %v322_v38 }
 0x13b   : > { %v331_v41 = vadd.f32 1e-05, %v327_v39  ;;  %v332_v42 = vadd.f32 1e-05, %v328_v40 }
 0x13c   : > { %v325_v43 = vpop.xlane.xlu1 %324 }
 0x13d   : > { %827 = vrsqrt.f32 %v331_v41  ;;  %v329_v44 = vmul.f32 0.03125, %v325_v43 }
 0x13e   : > { %829 = vrsqrt.f32 %v332_v42 }
 0x13f   : > { %v333_v45 = vadd.f32 1e-05, %v329_v44 }
 0x141   : > { %831 = vrsqrt.f32 %v333_v45 }
 0x143   : > { %v826_v46 = vpop.eup %825 }
 0x144   : > { %v338_v48 = vmul.f32 %v826_v46, %v306_v12  ;;  %v793_v12 = vpack.c.bf16 %v507_v11, %v506_v10 }
 0x146   : > { %v348_v50 = vmul.f32 %v683_v47, %v338_v48  ;;  %794 = vmatprep.subr.bf16.mxu1 %v793_v12 }
 0x147   : > { %v828_v51 = vpop.eup %827  ;;  %796 = vmatpush3.bf16.msra.mxu1 %v793_v12 }
 0x148   : > { %v830_v52 = vpop.eup %829  ;;  %v358_v53 = vadd.f32 %v684_v49, %v348_v50  ;;  %v339_v54 = vmul.f32 %v828_v51, %v307_v20  ;;  %v513_v20 = vld [vmem:[%s1034_s5 + $0x58] sm:$0xff] }
 0x149   : > { %v340_v55 = vmul.f32 %v830_v52, %v308_v13  ;;  %v508_v13 = vld [vmem:[%s1034_s5 + $0x30] sm:$0xff] }
 0x14a   : > { %733 = vmatprep.mubr.msk.f32.mxu0 %vm288_vm0, %v358_v53  ;;  %v349_v56 = vmul.f32 %v683_v47, %v339_v54  ;;  %v797_v15 = vpack.c.bf16 %v509_v14, %v508_v13 }
 0x14b   : > { %v832_v57 = vpop.eup %831  ;;  %v350_v58 = vmul.f32 %v683_v47, %v340_v55 }
 0x14c   : > { %v359_v59 = vadd.f32 %v684_v49, %v349_v56  ;;  %v341_v60 = vmul.f32 %v832_v57, %v309_v21  ;;  %798 = vmatprep.subr.bf16.mxu1 %v797_v15  ;;  %v805_v21 = vpack.c.bf16 %v513_v20, %v512_v19 }
 0x14d   : > { %v360_v61 = vadd.f32 %v684_v49, %v350_v58  ;;  %800 = vmatpush3.bf16.msra.mxu1 %v797_v15 }
 0x14e   : > { %734 = vmatmul.mubr.msk.f32.vlgmr.msra.gmra.mrb[0].mxu0 %vm288_vm0, %v359_v59  ;;  %v351_v62 = vmul.f32 %v683_v47, %v341_v60  ;;  %802 = vmatprep.subr.bf16.mxu1 %v801_v18 }
 0x14f   : > { %736 = vmatprep.mubr.msk.f32.mxu0 %vm288_vm0, %v360_v61  ;;  %v694_v61 = vld [vmem:[%s1035_s6] ss:$0 sm:$0xff] }
 0x150   : > { %v361_v63 = vadd.f32 %v684_v49, %v351_v62 }
 0x151   : > { %804 = vmatpush3.bf16.msra.mxu1 %v801_v18 }
 0x152   : > { %737 = vmatmul.mubr.msk.f32.gmra.mrb[2].mxu0 %vm288_vm0, %v361_v63  ;;  %806 = vmatprep.subr.bf16.mxu1 %v805_v21 }
 0x155   : > { %808 = vmatpush3.bf16.msra.mxu1 %v805_v21 }
 0x156   : > { %810 = vmatprep.subr.bf16.mxu1 %v809_v24 }
 0x159   : > { %812 = vmatpush3.bf16.msra.mxu1 %v809_v24 }
 0x15a   : > { %814 = vmatprep.subr.bf16.mxu1 %v813_v27 }
 0x15d   : > { %816 = vmatpush3.bf16.msra.mxu1 %v813_v27 }
 0x221   : > { %v735_v29 = vpop.f32.mrb[0].mxu0 }
 0x222   : > { %v457_v30 = vadd.f32 %v735_v29, %v685_v28  ;;  %v451_v31 = vpop.f32.mrb[1].mxu0 }
 0x223   : > { %v452_v32 = vadd.f32 %v685_v28, %v451_v31 }
 0x224   : > { %v691_v33 = vmul.f32 -1.702, %v457_v30 }
 0x225   : > { %v690_v34 = vmul.f32 -1.702, %v452_v32  ;;  %v738_v35 = vpop.f32.mrb[2].mxu0 }
 0x226   : > { %v480_v36 = vmul.f32 1.442695, %v691_v33  ;;  %v467_v37 = vadd.f32 %v738_v35, %v685_v28  ;;  %v461_v38 = vpop.f32.mrb[3].mxu0 }
 0x227   : > { %v478_v39 = vmul.f32 1.442695, %v690_v34  ;;  %v462_v40 = vadd.f32 %v685_v28, %v461_v38 }
 0x228   : > { %833 = vpow2.f32 %v480_v36  ;;  %v693_v41 = vmul.f32 -1.702, %v467_v37 }
 0x229   : > { %835 = vpow2.f32 %v478_v39  ;;  %v692_v42 = vmul.f32 -1.702, %v462_v40 }
 0x22a   : > { %v484_v43 = vmul.f32 1.442695, %v693_v41 }
 0x22b   : > { %v482_v44 = vmul.f32 1.442695, %v692_v42 }
 0x22c   : > { %837 = vpow2.f32 %v484_v43 }
 0x22d   : > { %839 = vpow2.f32 %v482_v44 }
 0x232   : > { %v834_v45 = vpop.eup %833 }
 0x233   : > { %v836_v46 = vpop.eup %835  ;;  %v487_v47 = vadd.f32 1.0, %v834_v45 }
 0x234   : > { %v486_v48 = vadd.f32 1.0, %v836_v46 }
 0x235   : > { %841 = vrcp.f32 %v487_v47 }
 0x236   : > { %v838_v49 = vpop.eup %837  ;;  %843 = vrcp.f32 %v486_v48 }
 0x237   : > { %v840_v50 = vpop.eup %839  ;;  %v489_v51 = vadd.f32 1.0, %v838_v49 }
 0x238   : > { %v488_v52 = vadd.f32 1.0, %v840_v50 }
 0x239   : > { %845 = vrcp.f32 %v489_v51 }
 0x23a   : > { %847 = vrcp.f32 %v488_v52 }
 0x23f   : > { %v842_v53 = vpop.eup %841 }
 0x240   : > { %v844_v54 = vpop.eup %843  ;;  %v499_v56 = vmul.f32 %v842_v53, %v457_v30 }
 0x241   : > { %v498_v55 = vmul.f32 %v844_v54, %v452_v32 }
 0x243   : > { %v846_v57 = vpop.eup %845  ;;  %771 = vmatprep.mubr.f32.mxu1 %v498_v55 }
 0x244   : > { %v848_v58 = vpop.eup %847  ;;  %772 = vmatmul.mubr.f32.vlgmr.msra.gmra.mrb[0].mxu1 %v499_v56  ;;  %v501_v60 = vmul.f32 %v846_v57, %v467_v37 }
 0x245   : > { %v500_v59 = vmul.f32 %v848_v58, %v462_v40 }
 0x247   : > { %774 = vmatprep.mubr.f32.mxu1 %v500_v59 }
 0x248   : > { %775 = vmatmul.mubr.f32.gmra.mrb[2].mxu1 %v501_v60 }
 0x317   : > { %v773_v62 = vpop.f32.mrb[0].mxu1 }
 0x318   : > { %v597_v63 = vadd.f32 %v773_v62, %v694_v61  ;;  %v591_v3 = vpop.f32.mrb[1].mxu1 }
 0x319   : > { %v592_v4 = vadd.f32 %v694_v61, %v591_v3 }
 0x31a   : > { %v611_v8 = vadd.f32 %v597_v63, %v917_v2 }
 0x31b   : > { %v610_v6 = vadd.f32 %v592_v4, %v913_v0  ;;  %v776_v7 = vpop.f32.mrb[2].mxu1 }
 0x31c   : > { %v607_v9 = vadd.f32 %v776_v7, %v694_v61  ;;  %v601_v10 = vpop.f32.mrb[3].mxu1  ;;  %615 = vst.msk [vmem:[%s280_s18 + $0x8] sm:$0xff] %vm288_vm0, %v611_v8 }
 0x31d   : > { %614 = vst.msk [vmem:[%s280_s18] sm:$0xff] %vm288_vm0, %v610_v6  ;;  %v602_v11 = vadd.f32 %v694_v61, %v601_v10 }
 0x31e   : > { %v613_v13 = vadd.f32 %v607_v9, %v923_v5 }
 0x31f   : > { %v612_v12 = vadd.f32 %v602_v11, %v915_v1 }
 0x320   : > { %617 = vst.msk [vmem:[%s280_s18 + $0x18] sm:$0xff] %vm288_vm0, %v613_v13 }
 0x321   : > { %616 = vst.msk [vmem:[%s280_s18 + $0x10] sm:$0xff] %vm288_vm0, %v612_v12 }
 0x322 PF: > { %s17_s24 = sadd.s32 1, %s855_s24  }
 0x323   : > { %p14_p4 = scmp.ge.s32.totalorder %s17_s24, 4  }
 0x325   :  { %16 = sbr.rel (!%p14_p4) target bundleno = 1 (0x1), region = 78 }

</bundles_post_ra>
